<compile_context>
chip_gen: v5e
topology: v5e:2x2
jax: 0.10.0
libtpu: 0.0.40
codegen_flags: <defaults>
</compile_context>

<pallas_src>
import functools
import math

import jax
import jax.numpy as jnp
from jax.experimental import pallas as pl
from jax.experimental.pallas import tpu as pltpu

LN_EPS = 1e-5
LANE = 128


def _round_up(x, m):
    return (x + m - 1) // m * m


def _layer_norm_masked(x, w, b, mask, n_real, eps=LN_EPS):
    """LayerNorm over the first n_real columns of a lane-padded (N, Ep) slab.

    Padded columns of the result are exactly zero (w/b are zero-padded and the
    centered value is masked), so the zero-padding invariant survives layers.
    """
    inv_n = 1.0 / n_real
    mu = jnp.sum(x * mask, axis=-1, keepdims=True) * inv_n
    xc = (x - mu) * mask
    var = jnp.sum(xc * xc, axis=-1, keepdims=True) * inv_n
    return xc * jax.lax.rsqrt(var + eps) * w + b


def fused_encoder_kernel(x_ref, wq_ref, wk_ref, wv_ref, bq_ref, bk_ref, bv_ref,
                         wo_ref, bo_ref, ln1w_ref, ln1b_ref,
                         w1_ref, b1_ref, w2_ref, b2_ref, ln2w_ref, ln2b_ref,
                         fnw_ref, fnb_ref, out_ref, *, S, B, H, E, HDP):
    """One grid step == one encoder layer; final LN fused on the last step.

    x_ref / out_ref: (N=B*S, Ep) f32 (batch-major rows, lane-padded columns).
    QKV projections live in a head-padded layout: head h occupies lane block
    [h*HDP, h*HDP + HDP) with only the first hd lanes nonzero (HDP = 128k).
    Per-layer weights arrive already sliced to this layer by the BlockSpecs.
    """
    l = pl.program_id(0)
    n_layers = pl.num_programs(0)
    N, Ep = out_ref.shape
    hd = E // H
    scale = 1.0 / math.sqrt(hd)

    col = jax.lax.broadcasted_iota(jnp.int32, (1, Ep), 1)
    mask = (col < E).astype(jnp.float32)

    # Layer carry: out_ref holds the running activation; seed it from x at l=0.
    @pl.when(l == 0)
    def _():
        out_ref[...] = x_ref[...]

    x = out_ref[...]                      # (N, Ep) f32, padded cols are zero
    xb = x.astype(jnp.bfloat16)

    # QKV projections (bf16 operands, f32 MXU accumulation). Weight rows past E
    # and padded head lanes are zero, so padding never contributes.
    q = jnp.dot(xb, wq_ref[...], preferred_element_type=jnp.float32) + bq_ref[...]
    k = jnp.dot(xb, wk_ref[...], preferred_element_type=jnp.float32) + bk_ref[...]
    v = jnp.dot(xb, wv_ref[...], preferred_element_type=jnp.float32) + bv_ref[...]
    q = q * scale                         # (N, H*HDP)

    # Per-head scaled-dot-product attention. Each head slice is a full,
    # 128-lane-aligned block (no relayout); both einsums run in bf16 on the
    # MXU with f32 accumulation. The head outputs are folded directly into the
    # output projection (no concatenate of lane-sparse slabs).
    attn = jnp.zeros((N, Ep), jnp.float32)
    for h in range(H):
        c0 = h * HDP
        qh = q[:, c0:c0 + HDP].reshape(B, S, HDP).astype(jnp.bfloat16)
        kh = k[:, c0:c0 + HDP].reshape(B, S, HDP).astype(jnp.bfloat16)
        vh = v[:, c0:c0 + HDP].reshape(B, S, HDP).astype(jnp.bfloat16)
        s = jnp.einsum('bqd,bkd->bqk', qh, kh,
                       preferred_element_type=jnp.float32)
        s = s - jnp.max(s, axis=-1, keepdims=True)
        p = jnp.exp(s)
        inv_l = pl.reciprocal(jnp.sum(p, axis=-1, keepdims=True), approx=False)
        ctx_h = jnp.einsum('bqk,bkd->bqd', p.astype(jnp.bfloat16), vh,
                           preferred_element_type=jnp.float32) * inv_l
        attn = attn + jnp.dot(ctx_h.reshape(N, HDP).astype(jnp.bfloat16),
                              wo_ref[c0:c0 + HDP, :],
                              preferred_element_type=jnp.float32)
    attn_out = attn + bo_ref[...]

    # dropout == identity (eval-mode semantics); post-norm residual.
    x1 = _layer_norm_masked(x + attn_out, ln1w_ref[...], ln1b_ref[...], mask, E)

    # Feed-forward: linear -> relu -> linear.
    # TODO(synk): chunk along FF for large N / v7x VMEM budgets.
    hmid = jnp.dot(x1.astype(jnp.bfloat16), w1_ref[...],
                   preferred_element_type=jnp.float32) + b1_ref[...]
    hmid = jnp.maximum(hmid, 0.0)
    ff = jnp.dot(hmid.astype(jnp.bfloat16), w2_ref[...],
                 preferred_element_type=jnp.float32) + b2_ref[...]

    y = _layer_norm_masked(x1 + ff, ln2w_ref[...], ln2b_ref[...], mask, E)
    out_ref[...] = y

    # Final stack LayerNorm fused into the last layer's step.
    @pl.when(l == n_layers - 1)
    def _():
        out_ref[...] = _layer_norm_masked(y, fnw_ref[...], fnb_ref[...], mask, E)


def transformer_block_forward(x, prepared, *, num_heads):
    # x: (S, B, E)  -- PyTorch TransformerEncoder default layout (batch_first=False)
    S, B, E = x.shape
    assert E % num_heads == 0
    Ep, Hp, hdp = prepared['Ep'], prepared['Hp'], prepared['hdp']
    L, FF = prepared['L'], prepared['FF']
    N = B * S

    # Batch-major flatten + lane-dense pad of the embedding dim.
    xf = jnp.transpose(x, (1, 0, 2)).reshape(N, E)
    xp = jnp.pad(xf, ((0, 0), (0, Ep - E)))

    kernel = functools.partial(fused_encoder_kernel, S=S, B=B, H=num_heads,
                               E=E, HDP=hdp)

    def shared(shape):                    # same block every layer step
        return pl.BlockSpec(shape, lambda l: (0,) * len(shape))

    def per_layer(shape):                 # stacked (L, *shape): pick layer l
        return pl.BlockSpec((None,) + shape, lambda l: (l,) + (0,) * len(shape))

    in_specs = [
        shared((N, Ep)),                                            # x
        per_layer((Ep, Hp)), per_layer((Ep, Hp)), per_layer((Ep, Hp)),  # wq wk wv
        per_layer((1, Hp)), per_layer((1, Hp)), per_layer((1, Hp)),     # bq bk bv
        per_layer((Hp, Ep)), per_layer((1, Ep)),                    # wo bo
        per_layer((1, Ep)), per_layer((1, Ep)),                     # ln1 w,b
        per_layer((Ep, FF)), per_layer((1, FF)),                    # w1 b1
        per_layer((FF, Ep)), per_layer((1, Ep)),                    # w2 b2
        per_layer((1, Ep)), per_layer((1, Ep)),                     # ln2 w,b
        shared((1, Ep)), shared((1, Ep)),                           # final norm w,b
    ]

    out = pl.pallas_call(
        kernel,
        out_shape=jax.ShapeDtypeStruct((N, Ep), jnp.float32),
        grid_spec=pltpu.PrefetchScalarGridSpec(
            num_scalar_prefetch=0,
            grid=(L,),
            in_specs=in_specs,
            out_specs=pl.BlockSpec((N, Ep), lambda l: (0, 0)),
        ),
        input_output_aliases={0: 0},       # activation slab reuses the input buffer
        compiler_params=pltpu.CompilerParams(
            dimension_semantics=("arbitrary",),   # layers are sequential
            vmem_limit_bytes=48 * 1024 * 1024),
        # TODO(synk): add a leading batch-tiled "parallel" grid axis for v7x.
    )(xp,
      prepared['wq'], prepared['wk'], prepared['wv'],
      prepared['bq'], prepared['bk'], prepared['bv'],
      prepared['wo'], prepared['bo'], prepared['ln1w'], prepared['ln1b'],
      prepared['w1'], prepared['b1'], prepared['w2'], prepared['b2'],
      prepared['ln2w'], prepared['ln2b'],
      prepared['fnw'], prepared['fnb'])

    return jnp.transpose(out[:, :E].reshape(B, S, E), (1, 0, 2))


def init_params(key, embed_dim, num_heads, num_layers, dim_feedforward=2048):
    """Random params in the PyTorch parameter layout (in_proj (3E,E), etc.)."""
    E, FF = embed_dim, dim_feedforward
    layers = []
    for li in range(num_layers):
        k = jax.random.fold_in(key, li)
        ks = jax.random.split(k, 8)
        layers.append(dict(
            in_proj_w=jax.random.normal(ks[0], (3 * E, E), jnp.float32) * 0.02,
            in_proj_b=jax.random.normal(ks[1], (3 * E,), jnp.float32) * 0.02,
            out_proj_w=jax.random.normal(ks[2], (E, E), jnp.float32) * 0.02,
            out_proj_b=jax.random.normal(ks[3], (E,), jnp.float32) * 0.02,
            lin1_w=jax.random.normal(ks[4], (FF, E), jnp.float32) * 0.02,
            lin1_b=jax.random.normal(ks[5], (FF,), jnp.float32) * 0.02,
            lin2_w=jax.random.normal(ks[6], (E, FF), jnp.float32) * 0.02,
            lin2_b=jax.random.normal(ks[7], (E,), jnp.float32) * 0.02,
            ln1_w=jnp.ones((E,), jnp.float32), ln1_b=jnp.zeros((E,), jnp.float32),
            ln2_w=jnp.ones((E,), jnp.float32), ln2_b=jnp.zeros((E,), jnp.float32),
        ))
    return dict(layers=layers,
                norm_w=jnp.ones((E,), jnp.float32),
                norm_b=jnp.zeros((E,), jnp.float32))


def prepare_params(params, embed_dim, num_heads, dim_feedforward=2048):
    """Transpose, lane/head-pad, cast matmul weights to bf16, and stack all
    per-layer tensors with a leading layer dim for the layer grid.

    Layouts produced:
      wq/wk/wv: (L, Ep, H*hdp) — head h's hd output columns sit in lane block
                [h*hdp, h*hdp+hd), rest zero (hdp = round_up(hd, 128)).
      wo:       (L, H*hdp, Ep) — matching head-padded rows, Ep-padded columns.
      w1/w2, ln/bias vectors: Ep lane-padded. Matmul weights bf16, biases f32.
    """
    E, H, FF = embed_dim, num_heads, dim_feedforward
    hd = E // H
    hdp = _round_up(hd, LANE)             # >= 128: per-head lane block
    Ep = _round_up(E, LANE)
    Hp = H * hdp
    L = len(params['layers'])

    def qkv_weight(wt):                   # (E, H*hd) -> (Ep, H*hdp) bf16
        w = wt.reshape(E, H, hd)
        w = jnp.pad(w, ((0, Ep - E), (0, 0), (0, hdp - hd)))
        return w.reshape(Ep, Hp).astype(jnp.bfloat16)

    def qkv_bias(b):                      # (H*hd,) -> (1, H*hdp) f32
        b = jnp.pad(b.reshape(H, hd), ((0, 0), (0, hdp - hd)))
        return b.reshape(1, Hp)

    def out_weight(wt):                   # (H*hd, E) -> (H*hdp, Ep) bf16
        w = wt.reshape(H, hd, E)
        w = jnp.pad(w, ((0, 0), (0, hdp - hd), (0, Ep - E)))
        return w.reshape(Hp, Ep).astype(jnp.bfloat16)

    def pad_rows(w):                      # (E, C) -> (Ep, C) bf16
        return jnp.pad(w, ((0, Ep - w.shape[0]), (0, 0))).astype(jnp.bfloat16)

    def pad_cols(w):                      # (R, E) -> (R, Ep) bf16
        return jnp.pad(w, ((0, 0), (0, Ep - w.shape[1]))).astype(jnp.bfloat16)

    def pad_vec(v):                       # (E,) -> (1, Ep) f32
        return jnp.pad(v, (0, Ep - v.shape[0])).reshape(1, Ep)

    keys = ['wq', 'wk', 'wv', 'bq', 'bk', 'bv', 'wo', 'bo',
            'ln1w', 'ln1b', 'w1', 'b1', 'w2', 'b2', 'ln2w', 'ln2b']
    acc = {k: [] for k in keys}
    for lp in params['layers']:
        ipw, ipb = lp['in_proj_w'], lp['in_proj_b']
        acc['wq'].append(qkv_weight(ipw[:E].T))
        acc['wk'].append(qkv_weight(ipw[E:2 * E].T))
        acc['wv'].append(qkv_weight(ipw[2 * E:].T))
        acc['bq'].append(qkv_bias(ipb[:E]))
        acc['bk'].append(qkv_bias(ipb[E:2 * E]))
        acc['bv'].append(qkv_bias(ipb[2 * E:]))
        acc['wo'].append(out_weight(lp['out_proj_w'].T))
        acc['bo'].append(pad_vec(lp['out_proj_b']))
        acc['ln1w'].append(pad_vec(lp['ln1_w']))
        acc['ln1b'].append(pad_vec(lp['ln1_b']))
        acc['w1'].append(pad_rows(lp['lin1_w'].T))
        acc['b1'].append(lp['lin1_b'].reshape(1, FF))
        acc['w2'].append(pad_cols(lp['lin2_w'].T))
        acc['b2'].append(pad_vec(lp['lin2_b']))
        acc['ln2w'].append(pad_vec(lp['ln2_w']))
        acc['ln2b'].append(pad_vec(lp['ln2_b']))

    prepared = {k: jnp.stack(v, axis=0) for k, v in acc.items()}
    prepared['fnw'] = pad_vec(params['norm_w'])
    prepared['fnb'] = pad_vec(params['norm_b'])
    prepared['Ep'] = Ep
    prepared['Hp'] = Hp
    prepared['hdp'] = hdp
    prepared['L'] = L
    prepared['FF'] = FF
    return prepared


if __name__ == "__main__":
    embed_dim, num_heads, num_layers = 32, 4, 2
    seq_len, batch = 8, 2

    key = jax.random.PRNGKey(0)
    kx, kp = jax.random.split(key)
    x = jax.random.normal(kx, (seq_len, batch, embed_dim), jnp.float32)
    params = init_params(kp, embed_dim, num_heads, num_layers)
    prepared = prepare_params(params, embed_dim, num_heads)

    out = transformer_block_forward(x, prepared, num_heads=num_heads)
    jax.block_until_ready(out)
    assert out.shape == (seq_len, batch, embed_dim)
    assert bool(jnp.all(jnp.isfinite(out)))
    print("KERNEL_OK")
</pallas_src>

<mosaic_0001>
module attributes {stable_mosaic.version = 11 : i64} {
  func.func @fused_encoder_kernel(%arg0: i32, %arg1: memref<16x128xf32, #tpu.memory_space<vmem>>, %arg2: memref<1x128x512xbf16, #tpu.memory_space<vmem>>, %arg3: memref<1x128x512xbf16, #tpu.memory_space<vmem>>, %arg4: memref<1x128x512xbf16, #tpu.memory_space<vmem>>, %arg5: memref<1x1x512xf32, #tpu.memory_space<vmem>>, %arg6: memref<1x1x512xf32, #tpu.memory_space<vmem>>, %arg7: memref<1x1x512xf32, #tpu.memory_space<vmem>>, %arg8: memref<1x512x128xbf16, #tpu.memory_space<vmem>>, %arg9: memref<1x1x128xf32, #tpu.memory_space<vmem>>, %arg10: memref<1x1x128xf32, #tpu.memory_space<vmem>>, %arg11: memref<1x1x128xf32, #tpu.memory_space<vmem>>, %arg12: memref<1x128x2048xbf16, #tpu.memory_space<vmem>>, %arg13: memref<1x1x2048xf32, #tpu.memory_space<vmem>>, %arg14: memref<1x2048x128xbf16, #tpu.memory_space<vmem>>, %arg15: memref<1x1x128xf32, #tpu.memory_space<vmem>>, %arg16: memref<1x1x128xf32, #tpu.memory_space<vmem>>, %arg17: memref<1x1x128xf32, #tpu.memory_space<vmem>>, %arg18: memref<1x128xf32, #tpu.memory_space<vmem>>, %arg19: memref<1x128xf32, #tpu.memory_space<vmem>>, %arg20: memref<16x128xf32, #tpu.memory_space<vmem>>) attributes {dimension_semantics = [#tpu.dimension_semantics<arbitrary>], iteration_bounds = array<i64: 2>, scalar_prefetch = 0 : i64, scratch_operands = 0 : i64, tpu.core_type = #tpu.core_type<tc>, window_params = [{pipeline_mode = #tpu.pipeline_mode<synchronous>, transform_indices = @transform_0, window_bounds = array<i64: 16, 128>}, {transform_indices = @transform_1, window_bounds = array<i64: 1, 128, 512>}, {transform_indices = @transform_2, window_bounds = array<i64: 1, 128, 512>}, {transform_indices = @transform_3, window_bounds = array<i64: 1, 128, 512>}, {transform_indices = @transform_4, window_bounds = array<i64: 1, 1, 512>}, {transform_indices = @transform_5, window_bounds = array<i64: 1, 1, 512>}, {transform_indices = @transform_6, window_bounds = array<i64: 1, 1, 512>}, {transform_indices = @transform_7, window_bounds = array<i64: 1, 512, 128>}, {transform_indices = @transform_8, window_bounds = array<i64: 1, 1, 128>}, {transform_indices = @transform_9, window_bounds = array<i64: 1, 1, 128>}, {transform_indices = @transform_10, window_bounds = array<i64: 1, 1, 128>}, {transform_indices = @transform_11, window_bounds = array<i64: 1, 128, 2048>}, {transform_indices = @transform_12, window_bounds = array<i64: 1, 1, 2048>}, {transform_indices = @transform_13, window_bounds = array<i64: 1, 2048, 128>}, {transform_indices = @transform_14, window_bounds = array<i64: 1, 1, 128>}, {transform_indices = @transform_15, window_bounds = array<i64: 1, 1, 128>}, {transform_indices = @transform_16, window_bounds = array<i64: 1, 1, 128>}, {pipeline_mode = #tpu.pipeline_mode<synchronous>, transform_indices = @transform_17, window_bounds = array<i64: 1, 128>}, {pipeline_mode = #tpu.pipeline_mode<synchronous>, transform_indices = @transform_18, window_bounds = array<i64: 1, 128>}, {pipeline_mode = #tpu.pipeline_mode<synchronous>, transform_indices = @transform_19, window_bounds = array<i64: 16, 128>}]} {
    %0 = tpu.iota {dimensions = array<i32: 1>} : vector<1x128xi32>
    %c32_i32 = arith.constant 32 : i32
    %1 = vector.broadcast %c32_i32 : i32 to vector<1x128xi32>
    %2 = arith.cmpi slt, %0, %1 : vector<1x128xi32>
    %3 = arith.extui %2 : vector<1x128xi1> to vector<1x128xi32>
    %4 = arith.sitofp %3 : vector<1x128xi32> to vector<1x128xf32>
    %c0_i32 = arith.constant 0 : i32
    %5 = arith.cmpi eq, %arg0, %c0_i32 : i32
    %6 = arith.extui %5 : i1 to i32
    %c0_i32_0 = arith.constant 0 : i32
    %7 = arith.cmpi ne, %6, %c0_i32_0 : i32
    scf.if %7 {
      %c0_96 = arith.constant 0 : index
      %c0_97 = arith.constant 0 : index
      %230 = vector.load %arg1[%c0_96, %c0_97] : memref<16x128xf32, #tpu.memory_space<vmem>>, vector<16x128xf32>
      %c0_98 = arith.constant 0 : index
      %c0_99 = arith.constant 0 : index
      %231 = vector.load %arg20[%c0_98, %c0_99] : memref<16x128xf32, #tpu.memory_space<vmem>>, vector<16x128xf32>
      tpu.vector_store %arg20[%c0_98, %c0_99], %230 {strides = array<i32>} : memref<16x128xf32, #tpu.memory_space<vmem>>, vector<16x128xf32>,
    } else {
    }
    %c0 = arith.constant 0 : index
    %c0_1 = arith.constant 0 : index
    %8 = vector.load %arg20[%c0, %c0_1] : memref<16x128xf32, #tpu.memory_space<vmem>>, vector<16x128xf32>
    %9 = arith.truncf %8 : vector<16x128xf32> to vector<16x128xbf16>
    %c0_2 = arith.constant 0 : index
    %c0_3 = arith.constant 0 : index
    %c0_4 = arith.constant 0 : index
    %10 = vector.load %arg2[%c0_2, %c0_3, %c0_4] : memref<1x128x512xbf16, #tpu.memory_space<vmem>>, vector<1x128x512xbf16>
    %11 = vector.shape_cast %10 : vector<1x128x512xbf16> to vector<128x512xbf16>
    %cst = arith.constant dense<0.000000e+00> : vector<16x512xf32>
    %12 = tpu.matmul %9, %11, %cst {dimension_numbers = #tpu.dot_dimension_numbers<[1], [0], [0], [1], [0, 0, 1, 1], [], []>} : vector<16x128xbf16>, vector<128x512xbf16>, vector<16x512xf32> -> vector<16x512xf32>
    %c0_5 = arith.constant 0 : index
    %c0_6 = arith.constant 0 : index
    %c0_7 = arith.constant 0 : index
    %13 = vector.load %arg5[%c0_5, %c0_6, %c0_7] : memref<1x1x512xf32, #tpu.memory_space<vmem>>, vector<1x1x512xf32>
    %14 = vector.shape_cast %13 : vector<1x1x512xf32> to vector<1x512xf32>
    %15 = vector.broadcast %14 : vector<1x512xf32> to vector<16x512xf32>
    %16 = arith.addf %12, %15 : vector<16x512xf32>
    %c0_8 = arith.constant 0 : index
    %c0_9 = arith.constant 0 : index
    %c0_10 = arith.constant 0 : index
    %17 = vector.load %arg3[%c0_8, %c0_9, %c0_10] : memref<1x128x512xbf16, #tpu.memory_space<vmem>>, vector<1x128x512xbf16>
    %18 = vector.shape_cast %17 : vector<1x128x512xbf16> to vector<128x512xbf16>
    %cst_11 = arith.constant dense<0.000000e+00> : vector<16x512xf32>
    %19 = tpu.matmul %9, %18, %cst_11 {dimension_numbers = #tpu.dot_dimension_numbers<[1], [0], [0], [1], [0, 0, 1, 1], [], []>} : vector<16x128xbf16>, vector<128x512xbf16>, vector<16x512xf32> -> vector<16x512xf32>
    %c0_12 = arith.constant 0 : index
    %c0_13 = arith.constant 0 : index
    %c0_14 = arith.constant 0 : index
    %20 = vector.load %arg6[%c0_12, %c0_13, %c0_14] : memref<1x1x512xf32, #tpu.memory_space<vmem>>, vector<1x1x512xf32>
    %21 = vector.shape_cast %20 : vector<1x1x512xf32> to vector<1x512xf32>
    %22 = vector.broadcast %21 : vector<1x512xf32> to vector<16x512xf32>
    %23 = arith.addf %19, %22 : vector<16x512xf32>
    %c0_15 = arith.constant 0 : index
    %c0_16 = arith.constant 0 : index
    %c0_17 = arith.constant 0 : index
    %24 = vector.load %arg4[%c0_15, %c0_16, %c0_17] : memref<1x128x512xbf16, #tpu.memory_space<vmem>>, vector<1x128x512xbf16>
    %25 = vector.shape_cast %24 : vector<1x128x512xbf16> to vector<128x512xbf16>
    %cst_18 = arith.constant dense<0.000000e+00> : vector<16x512xf32>
    %26 = tpu.matmul %9, %25, %cst_18 {dimension_numbers = #tpu.dot_dimension_numbers<[1], [0], [0], [1], [0, 0, 1, 1], [], []>} : vector<16x128xbf16>, vector<128x512xbf16>, vector<16x512xf32> -> vector<16x512xf32>
    %c0_19 = arith.constant 0 : index
    %c0_20 = arith.constant 0 : index
    %c0_21 = arith.constant 0 : index
    %27 = vector.load %arg7[%c0_19, %c0_20, %c0_21] : memref<1x1x512xf32, #tpu.memory_space<vmem>>, vector<1x1x512xf32>
    %28 = vector.shape_cast %27 : vector<1x1x512xf32> to vector<1x512xf32>
    %29 = vector.broadcast %28 : vector<1x512xf32> to vector<16x512xf32>
    %30 = arith.addf %26, %29 : vector<16x512xf32>
    %cst_22 = arith.constant 0.353553385 : f32
    %31 = vector.broadcast %cst_22 : f32 to vector<16x512xf32>
    %32 = arith.mulf %16, %31 : vector<16x512xf32>
    %cst_23 = arith.constant 0.000000e+00 : f32
    %33 = vector.broadcast %cst_23 : f32 to vector<16x128xf32>
    %34 = vector.extract_strided_slice %32 {offsets = [0, 0], sizes = [16, 128], strides = [1, 1]} : vector<16x512xf32> to vector<16x128xf32>
    %35 = vector.shape_cast %34 : vector<16x128xf32> to vector<2x8x128xf32>
    %36 = arith.truncf %35 : vector<2x8x128xf32> to vector<2x8x128xbf16>
    %37 = vector.extract_strided_slice %23 {offsets = [0, 0], sizes = [16, 128], strides = [1, 1]} : vector<16x512xf32> to vector<16x128xf32>
    %38 = vector.shape_cast %37 : vector<16x128xf32> to vector<2x8x128xf32>
    %39 = arith.truncf %38 : vector<2x8x128xf32> to vector<2x8x128xbf16>
    %40 = vector.extract_strided_slice %30 {offsets = [0, 0], sizes = [16, 128], strides = [1, 1]} : vector<16x512xf32> to vector<16x128xf32>
    %41 = vector.shape_cast %40 : vector<16x128xf32> to vector<2x8x128xf32>
    %42 = arith.truncf %41 : vector<2x8x128xf32> to vector<2x8x128xbf16>
    "tpu.trace_start"() <{level = 10 : i32, message = "bqd,bkd->bqk"}> : () -> ()
    %cst_24 = arith.constant dense<0.000000e+00> : vector<2x8x8xf32>
    %43 = tpu.matmul %36, %39, %cst_24 {dimension_numbers = #tpu.dot_dimension_numbers<[2], [2], [1], [1], [0, 0, 0, 1, 1, 1], [0], [0]>} : vector<2x8x128xbf16>, vector<2x8x128xbf16>, vector<2x8x8xf32> -> vector<2x8x8xf32>
    "tpu.trace_stop"() : () -> ()
    %cst_25 = arith.constant dense<0xFF800000> : vector<2x8xf32>
    %44 = vector.multi_reduction <maximumf>, %43, %cst_25 [2] : vector<2x8x8xf32> to vector<2x8xf32>
    %45 = vector.shape_cast %44 : vector<2x8xf32> to vector<2x8x1xf32>
    %46 = vector.broadcast %45 : vector<2x8x1xf32> to vector<2x8x8xf32>
    %47 = arith.subf %43, %46 : vector<2x8x8xf32>
    %48 = math.exp %47 : vector<2x8x8xf32>
    %cst_26 = arith.constant dense<0.000000e+00> : vector<2x8xf32>
    %49 = vector.multi_reduction <add>, %48, %cst_26 [2] : vector<2x8x8xf32> to vector<2x8xf32>
    %50 = vector.shape_cast %49 : vector<2x8xf32> to vector<2x8x1xf32>
    %51 = tpu.reciprocal %50 : vector<2x8x1xf32> -> vector<2x8x1xf32>
    %52 = arith.truncf %48 : vector<2x8x8xf32> to vector<2x8x8xbf16>
    "tpu.trace_start"() <{level = 10 : i32, message = "bqk,bkd->bqd"}> : () -> ()
    %cst_27 = arith.constant dense<0.000000e+00> : vector<2x8x128xf32>
    %53 = tpu.matmul %52, %42, %cst_27 {dimension_numbers = #tpu.dot_dimension_numbers<[2], [1], [1], [2], [0, 0, 0, 1, 1, 2], [0], [0]>} : vector<2x8x8xbf16>, vector<2x8x128xbf16>, vector<2x8x128xf32> -> vector<2x8x128xf32>
    "tpu.trace_stop"() : () -> ()
    %54 = vector.broadcast %51 : vector<2x8x1xf32> to vector<2x8x128xf32>
    %55 = arith.mulf %53, %54 : vector<2x8x128xf32>
    %56 = vector.shape_cast %55 : vector<2x8x128xf32> to vector<16x128xf32>
    %57 = arith.truncf %56 : vector<16x128xf32> to vector<16x128xbf16>
    %c0_28 = arith.constant 0 : index
    %c0_29 = arith.constant 0 : index
    %c0_30 = arith.constant 0 : index
    %58 = vector.load %arg8[%c0_28, %c0_29, %c0_30] : memref<1x512x128xbf16, #tpu.memory_space<vmem>>, vector<1x128x128xbf16>
    %59 = vector.shape_cast %58 : vector<1x128x128xbf16> to vector<128x128xbf16>
    %cst_31 = arith.constant dense<0.000000e+00> : vector<16x128xf32>
    %60 = tpu.matmul %57, %59, %cst_31 {dimension_numbers = #tpu.dot_dimension_numbers<[1], [0], [0], [1], [0, 0, 1, 1], [], []>} : vector<16x128xbf16>, vector<128x128xbf16>, vector<16x128xf32> -> vector<16x128xf32>
    %61 = arith.addf %33, %60 : vector<16x128xf32>
    %62 = vector.extract_strided_slice %32 {offsets = [0, 128], sizes = [16, 128], strides = [1, 1]} : vector<16x512xf32> to vector<16x128xf32>
    %63 = vector.shape_cast %62 : vector<16x128xf32> to vector<2x8x128xf32>
    %64 = arith.truncf %63 : vector<2x8x128xf32> to vector<2x8x128xbf16>
    %65 = vector.extract_strided_slice %23 {offsets = [0, 128], sizes = [16, 128], strides = [1, 1]} : vector<16x512xf32> to vector<16x128xf32>
    %66 = vector.shape_cast %65 : vector<16x128xf32> to vector<2x8x128xf32>
    %67 = arith.truncf %66 : vector<2x8x128xf32> to vector<2x8x128xbf16>
    %68 = vector.extract_strided_slice %30 {offsets = [0, 128], sizes = [16, 128], strides = [1, 1]} : vector<16x512xf32> to vector<16x128xf32>
    %69 = vector.shape_cast %68 : vector<16x128xf32> to vector<2x8x128xf32>
    %70 = arith.truncf %69 : vector<2x8x128xf32> to vector<2x8x128xbf16>
    "tpu.trace_start"() <{level = 10 : i32, message = "bqd,bkd->bqk"}> : () -> ()
    %cst_32 = arith.constant dense<0.000000e+00> : vector<2x8x8xf32>
    %71 = tpu.matmul %64, %67, %cst_32 {dimension_numbers = #tpu.dot_dimension_numbers<[2], [2], [1], [1], [0, 0, 0, 1, 1, 1], [0], [0]>} : vector<2x8x128xbf16>, vector<2x8x128xbf16>, vector<2x8x8xf32> -> vector<2x8x8xf32>
    "tpu.trace_stop"() : () -> ()
    %cst_33 = arith.constant dense<0xFF800000> : vector<2x8xf32>
    %72 = vector.multi_reduction <maximumf>, %71, %cst_33 [2] : vector<2x8x8xf32> to vector<2x8xf32>
    %73 = vector.shape_cast %72 : vector<2x8xf32> to vector<2x8x1xf32>
    %74 = vector.broadcast %73 : vector<2x8x1xf32> to vector<2x8x8xf32>
    %75 = arith.subf %71, %74 : vector<2x8x8xf32>
    %76 = math.exp %75 : vector<2x8x8xf32>
    %cst_34 = arith.constant dense<0.000000e+00> : vector<2x8xf32>
    %77 = vector.multi_reduction <add>, %76, %cst_34 [2] : vector<2x8x8xf32> to vector<2x8xf32>
    %78 = vector.shape_cast %77 : vector<2x8xf32> to vector<2x8x1xf32>
    %79 = tpu.reciprocal %78 : vector<2x8x1xf32> -> vector<2x8x1xf32>
    %80 = arith.truncf %76 : vector<2x8x8xf32> to vector<2x8x8xbf16>
    "tpu.trace_start"() <{level = 10 : i32, message = "bqk,bkd->bqd"}> : () -> ()
    %cst_35 = arith.constant dense<0.000000e+00> : vector<2x8x128xf32>
    %81 = tpu.matmul %80, %70, %cst_35 {dimension_numbers = #tpu.dot_dimension_numbers<[2], [1], [1], [2], [0, 0, 0, 1, 1, 2], [0], [0]>} : vector<2x8x8xbf16>, vector<2x8x128xbf16>, vector<2x8x128xf32> -> vector<2x8x128xf32>
    "tpu.trace_stop"() : () -> ()
    %82 = vector.broadcast %79 : vector<2x8x1xf32> to vector<2x8x128xf32>
    %83 = arith.mulf %81, %82 : vector<2x8x128xf32>
    %84 = vector.shape_cast %83 : vector<2x8x128xf32> to vector<16x128xf32>
    %85 = arith.truncf %84 : vector<16x128xf32> to vector<16x128xbf16>
    %c0_36 = arith.constant 0 : index
    %c128 = arith.constant 128 : index
    %c0_37 = arith.constant 0 : index
    %86 = vector.load %arg8[%c0_36, %c128, %c0_37] : memref<1x512x128xbf16, #tpu.memory_space<vmem>>, vector<1x128x128xbf16>
    %87 = vector.shape_cast %86 : vector<1x128x128xbf16> to vector<128x128xbf16>
    %cst_38 = arith.constant dense<0.000000e+00> : vector<16x128xf32>
    %88 = tpu.matmul %85, %87, %cst_38 {dimension_numbers = #tpu.dot_dimension_numbers<[1], [0], [0], [1], [0, 0, 1, 1], [], []>} : vector<16x128xbf16>, vector<128x128xbf16>, vector<16x128xf32> -> vector<16x128xf32>
    %89 = arith.addf %61, %88 : vector<16x128xf32>
    %90 = vector.extract_strided_slice %32 {offsets = [0, 256], sizes = [16, 128], strides = [1, 1]} : vector<16x512xf32> to vector<16x128xf32>
    %91 = vector.shape_cast %90 : vector<16x128xf32> to vector<2x8x128xf32>
    %92 = arith.truncf %91 : vector<2x8x128xf32> to vector<2x8x128xbf16>
    %93 = vector.extract_strided_slice %23 {offsets = [0, 256], sizes = [16, 128], strides = [1, 1]} : vector<16x512xf32> to vector<16x128xf32>
    %94 = vector.shape_cast %93 : vector<16x128xf32> to vector<2x8x128xf32>
    %95 = arith.truncf %94 : vector<2x8x128xf32> to vector<2x8x128xbf16>
    %96 = vector.extract_strided_slice %30 {offsets = [0, 256], sizes = [16, 128], strides = [1, 1]} : vector<16x512xf32> to vector<16x128xf32>
    %97 = vector.shape_cast %96 : vector<16x128xf32> to vector<2x8x128xf32>
    %98 = arith.truncf %97 : vector<2x8x128xf32> to vector<2x8x128xbf16>
    "tpu.trace_start"() <{level = 10 : i32, message = "bqd,bkd->bqk"}> : () -> ()
    %cst_39 = arith.constant dense<0.000000e+00> : vector<2x8x8xf32>
    %99 = tpu.matmul %92, %95, %cst_39 {dimension_numbers = #tpu.dot_dimension_numbers<[2], [2], [1], [1], [0, 0, 0, 1, 1, 1], [0], [0]>} : vector<2x8x128xbf16>, vector<2x8x128xbf16>, vector<2x8x8xf32> -> vector<2x8x8xf32>
    "tpu.trace_stop"() : () -> ()
    %cst_40 = arith.constant dense<0xFF800000> : vector<2x8xf32>
    %100 = vector.multi_reduction <maximumf>, %99, %cst_40 [2] : vector<2x8x8xf32> to vector<2x8xf32>
    %101 = vector.shape_cast %100 : vector<2x8xf32> to vector<2x8x1xf32>
    %102 = vector.broadcast %101 : vector<2x8x1xf32> to vector<2x8x8xf32>
    %103 = arith.subf %99, %102 : vector<2x8x8xf32>
    %104 = math.exp %103 : vector<2x8x8xf32>
    %cst_41 = arith.constant dense<0.000000e+00> : vector<2x8xf32>
    %105 = vector.multi_reduction <add>, %104, %cst_41 [2] : vector<2x8x8xf32> to vector<2x8xf32>
    %106 = vector.shape_cast %105 : vector<2x8xf32> to vector<2x8x1xf32>
    %107 = tpu.reciprocal %106 : vector<2x8x1xf32> -> vector<2x8x1xf32>
    %108 = arith.truncf %104 : vector<2x8x8xf32> to vector<2x8x8xbf16>
    "tpu.trace_start"() <{level = 10 : i32, message = "bqk,bkd->bqd"}> : () -> ()
    %cst_42 = arith.constant dense<0.000000e+00> : vector<2x8x128xf32>
    %109 = tpu.matmul %108, %98, %cst_42 {dimension_numbers = #tpu.dot_dimension_numbers<[2], [1], [1], [2], [0, 0, 0, 1, 1, 2], [0], [0]>} : vector<2x8x8xbf16>, vector<2x8x128xbf16>, vector<2x8x128xf32> -> vector<2x8x128xf32>
    "tpu.trace_stop"() : () -> ()
    %110 = vector.broadcast %107 : vector<2x8x1xf32> to vector<2x8x128xf32>
    %111 = arith.mulf %109, %110 : vector<2x8x128xf32>
    %112 = vector.shape_cast %111 : vector<2x8x128xf32> to vector<16x128xf32>
    %113 = arith.truncf %112 : vector<16x128xf32> to vector<16x128xbf16>
    %c0_43 = arith.constant 0 : index
    %c256 = arith.constant 256 : index
    %c0_44 = arith.constant 0 : index
    %114 = vector.load %arg8[%c0_43, %c256, %c0_44] : memref<1x512x128xbf16, #tpu.memory_space<vmem>>, vector<1x128x128xbf16>
    %115 = vector.shape_cast %114 : vector<1x128x128xbf16> to vector<128x128xbf16>
    %cst_45 = arith.constant dense<0.000000e+00> : vector<16x128xf32>
    %116 = tpu.matmul %113, %115, %cst_45 {dimension_numbers = #tpu.dot_dimension_numbers<[1], [0], [0], [1], [0, 0, 1, 1], [], []>} : vector<16x128xbf16>, vector<128x128xbf16>, vector<16x128xf32> -> vector<16x128xf32>
    %117 = arith.addf %89, %116 : vector<16x128xf32>
    %118 = vector.extract_strided_slice %32 {offsets = [0, 384], sizes = [16, 128], strides = [1, 1]} : vector<16x512xf32> to vector<16x128xf32>
    %119 = vector.shape_cast %118 : vector<16x128xf32> to vector<2x8x128xf32>
    %120 = arith.truncf %119 : vector<2x8x128xf32> to vector<2x8x128xbf16>
    %121 = vector.extract_strided_slice %23 {offsets = [0, 384], sizes = [16, 128], strides = [1, 1]} : vector<16x512xf32> to vector<16x128xf32>
    %122 = vector.shape_cast %121 : vector<16x128xf32> to vector<2x8x128xf32>
    %123 = arith.truncf %122 : vector<2x8x128xf32> to vector<2x8x128xbf16>
    %124 = vector.extract_strided_slice %30 {offsets = [0, 384], sizes = [16, 128], strides = [1, 1]} : vector<16x512xf32> to vector<16x128xf32>
    %125 = vector.shape_cast %124 : vector<16x128xf32> to vector<2x8x128xf32>
    %126 = arith.truncf %125 : vector<2x8x128xf32> to vector<2x8x128xbf16>
    "tpu.trace_start"() <{level = 10 : i32, message = "bqd,bkd->bqk"}> : () -> ()
    %cst_46 = arith.constant dense<0.000000e+00> : vector<2x8x8xf32>
    %127 = tpu.matmul %120, %123, %cst_46 {dimension_numbers = #tpu.dot_dimension_numbers<[2], [2], [1], [1], [0, 0, 0, 1, 1, 1], [0], [0]>} : vector<2x8x128xbf16>, vector<2x8x128xbf16>, vector<2x8x8xf32> -> vector<2x8x8xf32>
    "tpu.trace_stop"() : () -> ()
    %cst_47 = arith.constant dense<0xFF800000> : vector<2x8xf32>
    %128 = vector.multi_reduction <maximumf>, %127, %cst_47 [2] : vector<2x8x8xf32> to vector<2x8xf32>
    %129 = vector.shape_cast %128 : vector<2x8xf32> to vector<2x8x1xf32>
    %130 = vector.broadcast %129 : vector<2x8x1xf32> to vector<2x8x8xf32>
    %131 = arith.subf %127, %130 : vector<2x8x8xf32>
    %132 = math.exp %131 : vector<2x8x8xf32>
    %cst_48 = arith.constant dense<0.000000e+00> : vector<2x8xf32>
    %133 = vector.multi_reduction <add>, %132, %cst_48 [2] : vector<2x8x8xf32> to vector<2x8xf32>
    %134 = vector.shape_cast %133 : vector<2x8xf32> to vector<2x8x1xf32>
    %135 = tpu.reciprocal %134 : vector<2x8x1xf32> -> vector<2x8x1xf32>
    %136 = arith.truncf %132 : vector<2x8x8xf32> to vector<2x8x8xbf16>
    "tpu.trace_start"() <{level = 10 : i32, message = "bqk,bkd->bqd"}> : () -> ()
    %cst_49 = arith.constant dense<0.000000e+00> : vector<2x8x128xf32>
    %137 = tpu.matmul %136, %126, %cst_49 {dimension_numbers = #tpu.dot_dimension_numbers<[2], [1], [1], [2], [0, 0, 0, 1, 1, 2], [0], [0]>} : vector<2x8x8xbf16>, vector<2x8x128xbf16>, vector<2x8x128xf32> -> vector<2x8x128xf32>
    "tpu.trace_stop"() : () -> ()
    %138 = vector.broadcast %135 : vector<2x8x1xf32> to vector<2x8x128xf32>
    %139 = arith.mulf %137, %138 : vector<2x8x128xf32>
    %140 = vector.shape_cast %139 : vector<2x8x128xf32> to vector<16x128xf32>
    %141 = arith.truncf %140 : vector<16x128xf32> to vector<16x128xbf16>
    %c0_50 = arith.constant 0 : index
    %c384 = arith.constant 384 : index
    %c0_51 = arith.constant 0 : index
    %142 = vector.load %arg8[%c0_50, %c384, %c0_51] : memref<1x512x128xbf16, #tpu.memory_space<vmem>>, vector<1x128x128xbf16>
    %143 = vector.shape_cast %142 : vector<1x128x128xbf16> to vector<128x128xbf16>
    %cst_52 = arith.constant dense<0.000000e+00> : vector<16x128xf32>
    %144 = tpu.matmul %141, %143, %cst_52 {dimension_numbers = #tpu.dot_dimension_numbers<[1], [0], [0], [1], [0, 0, 1, 1], [], []>} : vector<16x128xbf16>, vector<128x128xbf16>, vector<16x128xf32> -> vector<16x128xf32>
    %145 = arith.addf %117, %144 : vector<16x128xf32>
    %c0_53 = arith.constant 0 : index
    %c0_54 = arith.constant 0 : index
    %c0_55 = arith.constant 0 : index
    %146 = vector.load %arg9[%c0_53, %c0_54, %c0_55] : memref<1x1x128xf32, #tpu.memory_space<vmem>>, vector<1x1x128xf32>
    %147 = vector.shape_cast %146 : vector<1x1x128xf32> to vector<1x128xf32>
    %148 = vector.broadcast %147 : vector<1x128xf32> to vector<16x128xf32>
    %149 = arith.addf %145, %148 : vector<16x128xf32>
    %150 = arith.addf %8, %149 : vector<16x128xf32>
    %c0_56 = arith.constant 0 : index
    %c0_57 = arith.constant 0 : index
    %c0_58 = arith.constant 0 : index
    %151 = vector.load %arg10[%c0_56, %c0_57, %c0_58] : memref<1x1x128xf32, #tpu.memory_space<vmem>>, vector<1x1x128xf32>
    %152 = vector.shape_cast %151 : vector<1x1x128xf32> to vector<1x128xf32>
    %c0_59 = arith.constant 0 : index
    %c0_60 = arith.constant 0 : index
    %c0_61 = arith.constant 0 : index
    %153 = vector.load %arg11[%c0_59, %c0_60, %c0_61] : memref<1x1x128xf32, #tpu.memory_space<vmem>>, vector<1x1x128xf32>
    %154 = vector.shape_cast %153 : vector<1x1x128xf32> to vector<1x128xf32>
    %155 = vector.broadcast %4 : vector<1x128xf32> to vector<16x128xf32>
    %156 = arith.mulf %150, %155 : vector<16x128xf32>
    %cst_62 = arith.constant dense<0.000000e+00> : vector<16xf32>
    %157 = vector.multi_reduction <add>, %156, %cst_62 [1] : vector<16x128xf32> to vector<16xf32>
    %158 = vector.shape_cast %157 : vector<16xf32> to vector<16x1xf32>
    %cst_63 = arith.constant 3.125000e-02 : f32
    %159 = vector.broadcast %cst_63 : f32 to vector<16x1xf32>
    %160 = arith.mulf %158, %159 : vector<16x1xf32>
    %161 = vector.broadcast %160 : vector<16x1xf32> to vector<16x128xf32>
    %162 = arith.subf %150, %161 : vector<16x128xf32>
    %163 = vector.broadcast %4 : vector<1x128xf32> to vector<16x128xf32>
    %164 = arith.mulf %162, %163 : vector<16x128xf32>
    %165 = arith.mulf %164, %164 : vector<16x128xf32>
    %cst_64 = arith.constant dense<0.000000e+00> : vector<16xf32>
    %166 = vector.multi_reduction <add>, %165, %cst_64 [1] : vector<16x128xf32> to vector<16xf32>
    %167 = vector.shape_cast %166 : vector<16xf32> to vector<16x1xf32>
    %cst_65 = arith.constant 3.125000e-02 : f32
    %168 = vector.broadcast %cst_65 : f32 to vector<16x1xf32>
    %169 = arith.mulf %167, %168 : vector<16x1xf32>
    %cst_66 = arith.constant 9.99999974E-6 : f32
    %170 = vector.broadcast %cst_66 : f32 to vector<16x1xf32>
    %171 = arith.addf %169, %170 : vector<16x1xf32>
    %172 = math.rsqrt %171 : vector<16x1xf32>
    %173 = vector.broadcast %172 : vector<16x1xf32> to vector<16x128xf32>
    %174 = arith.mulf %164, %173 : vector<16x128xf32>
    %175 = vector.broadcast %152 : vector<1x128xf32> to vector<16x128xf32>
    %176 = arith.mulf %174, %175 : vector<16x128xf32>
    %177 = vector.broadcast %154 : vector<1x128xf32> to vector<16x128xf32>
    %178 = arith.addf %176, %177 : vector<16x128xf32>
    %179 = arith.truncf %178 : vector<16x128xf32> to vector<16x128xbf16>
    %c0_67 = arith.constant 0 : index
    %c0_68 = arith.constant 0 : index
    %c0_69 = arith.constant 0 : index
    %180 = vector.load %arg12[%c0_67, %c0_68, %c0_69] : memref<1x128x2048xbf16, #tpu.memory_space<vmem>>, vector<1x128x2048xbf16>
    %181 = vector.shape_cast %180 : vector<1x128x2048xbf16> to vector<128x2048xbf16>
    %cst_70 = arith.constant dense<0.000000e+00> : vector<16x2048xf32>
    %182 = tpu.matmul %179, %181, %cst_70 {dimension_numbers = #tpu.dot_dimension_numbers<[1], [0], [0], [1], [0, 0, 1, 1], [], []>} : vector<16x128xbf16>, vector<128x2048xbf16>, vector<16x2048xf32> -> vector<16x2048xf32>
    %c0_71 = arith.constant 0 : index
    %c0_72 = arith.constant 0 : index
    %c0_73 = arith.constant 0 : index
    %183 = vector.load %arg13[%c0_71, %c0_72, %c0_73] : memref<1x1x2048xf32, #tpu.memory_space<vmem>>, vector<1x1x2048xf32>
    %184 = vector.shape_cast %183 : vector<1x1x2048xf32> to vector<1x2048xf32>
    %185 = vector.broadcast %184 : vector<1x2048xf32> to vector<16x2048xf32>
    %186 = arith.addf %182, %185 : vector<16x2048xf32>
    %cst_74 = arith.constant 0.000000e+00 : f32
    %187 = vector.broadcast %cst_74 : f32 to vector<16x2048xf32>
    %188 = arith.maximumf %186, %187 : vector<16x2048xf32>
    %189 = arith.truncf %188 : vector<16x2048xf32> to vector<16x2048xbf16>
    %c0_75 = arith.constant 0 : index
    %c0_76 = arith.constant 0 : index
    %c0_77 = arith.constant 0 : index
    %190 = vector.load %arg14[%c0_75, %c0_76, %c0_77] : memref<1x2048x128xbf16, #tpu.memory_space<vmem>>, vector<1x2048x128xbf16>
    %191 = vector.shape_cast %190 : vector<1x2048x128xbf16> to vector<2048x128xbf16>
    %cst_78 = arith.constant dense<0.000000e+00> : vector<16x128xf32>
    %192 = tpu.matmul %189, %191, %cst_78 {dimension_numbers = #tpu.dot_dimension_numbers<[1], [0], [0], [1], [0, 0, 1, 1], [], []>} : vector<16x2048xbf16>, vector<2048x128xbf16>, vector<16x128xf32> -> vector<16x128xf32>
    %c0_79 = arith.constant 0 : index
    %c0_80 = arith.constant 0 : index
    %c0_81 = arith.constant 0 : index
    %193 = vector.load %arg15[%c0_79, %c0_80, %c0_81] : memref<1x1x128xf32, #tpu.memory_space<vmem>>, vector<1x1x128xf32>
    %194 = vector.shape_cast %193 : vector<1x1x128xf32> to vector<1x128xf32>
    %195 = vector.broadcast %194 : vector<1x128xf32> to vector<16x128xf32>
    %196 = arith.addf %192, %195 : vector<16x128xf32>
    %197 = arith.addf %178, %196 : vector<16x128xf32>
    %c0_82 = arith.constant 0 : index
    %c0_83 = arith.constant 0 : index
    %c0_84 = arith.constant 0 : index
    %198 = vector.load %arg16[%c0_82, %c0_83, %c0_84] : memref<1x1x128xf32, #tpu.memory_space<vmem>>, vector<1x1x128xf32>
    %199 = vector.shape_cast %198 : vector<1x1x128xf32> to vector<1x128xf32>
    %c0_85 = arith.constant 0 : index
    %c0_86 = arith.constant 0 : index
    %c0_87 = arith.constant 0 : index
    %200 = vector.load %arg17[%c0_85, %c0_86, %c0_87] : memref<1x1x128xf32, #tpu.memory_space<vmem>>, vector<1x1x128xf32>
    %201 = vector.shape_cast %200 : vector<1x1x128xf32> to vector<1x128xf32>
    %202 = vector.broadcast %4 : vector<1x128xf32> to vector<16x128xf32>
    %203 = arith.mulf %197, %202 : vector<16x128xf32>
    %cst_88 = arith.constant dense<0.000000e+00> : vector<16xf32>
    %204 = vector.multi_reduction <add>, %203, %cst_88 [1] : vector<16x128xf32> to vector<16xf32>
    %205 = vector.shape_cast %204 : vector<16xf32> to vector<16x1xf32>
    %cst_89 = arith.constant 3.125000e-02 : f32
    %206 = vector.broadcast %cst_89 : f32 to vector<16x1xf32>
    %207 = arith.mulf %205, %206 : vector<16x1xf32>
    %208 = vector.broadcast %207 : vector<16x1xf32> to vector<16x128xf32>
    %209 = arith.subf %197, %208 : vector<16x128xf32>
    %210 = vector.broadcast %4 : vector<1x128xf32> to vector<16x128xf32>
    %211 = arith.mulf %209, %210 : vector<16x128xf32>
    %212 = arith.mulf %211, %211 : vector<16x128xf32>
    %cst_90 = arith.constant dense<0.000000e+00> : vector<16xf32>
    %213 = vector.multi_reduction <add>, %212, %cst_90 [1] : vector<16x128xf32> to vector<16xf32>
    %214 = vector.shape_cast %213 : vector<16xf32> to vector<16x1xf32>
    %cst_91 = arith.constant 3.125000e-02 : f32
    %215 = vector.broadcast %cst_91 : f32 to vector<16x1xf32>
    %216 = arith.mulf %214, %215 : vector<16x1xf32>
    %cst_92 = arith.constant 9.99999974E-6 : f32
    %217 = vector.broadcast %cst_92 : f32 to vector<16x1xf32>
    %218 = arith.addf %216, %217 : vector<16x1xf32>
    %219 = math.rsqrt %218 : vector<16x1xf32>
    %220 = vector.broadcast %219 : vector<16x1xf32> to vector<16x128xf32>
    %221 = arith.mulf %211, %220 : vector<16x128xf32>
    %222 = vector.broadcast %199 : vector<1x128xf32> to vector<16x128xf32>
    %223 = arith.mulf %221, %222 : vector<16x128xf32>
    %224 = vector.broadcast %201 : vector<1x128xf32> to vector<16x128xf32>
    %225 = arith.addf %223, %224 : vector<16x128xf32>
    %c0_93 = arith.constant 0 : index
    %c0_94 = arith.constant 0 : index
    %226 = vector.load %arg20[%c0_93, %c0_94] : memref<16x128xf32, #tpu.memory_space<vmem>>, vector<16x128xf32>
    tpu.vector_store %arg20[%c0_93, %c0_94], %225 {strides = array<i32>} : memref<16x128xf32, #tpu.memory_space<vmem>>, vector<16x128xf32>,
    %c1_i32 = arith.constant 1 : i32
    %227 = arith.cmpi eq, %arg0, %c1_i32 : i32
    %228 = arith.extui %227 : i1 to i32
    %c0_i32_95 = arith.constant 0 : i32
    %229 = arith.cmpi ne, %228, %c0_i32_95 : i32
    scf.if %229 {
      %c0_96 = arith.constant 0 : index
      %c0_97 = arith.constant 0 : index
      %230 = vector.load %arg18[%c0_96, %c0_97] : memref<1x128xf32, #tpu.memory_space<vmem>>, vector<1x128xf32>
      %c0_98 = arith.constant 0 : index
      %c0_99 = arith.constant 0 : index
      %231 = vector.load %arg19[%c0_98, %c0_99] : memref<1x128xf32, #tpu.memory_space<vmem>>, vector<1x128xf32>
      %232 = vector.broadcast %4 : vector<1x128xf32> to vector<16x128xf32>
      %233 = arith.mulf %225, %232 : vector<16x128xf32>
      %cst_100 = arith.constant dense<0.000000e+00> : vector<16xf32>
      %234 = vector.multi_reduction <add>, %233, %cst_100 [1] : vector<16x128xf32> to vector<16xf32>
      %235 = vector.shape_cast %234 : vector<16xf32> to vector<16x1xf32>
      %cst_101 = arith.constant 3.125000e-02 : f32
      %236 = vector.broadcast %cst_101 : f32 to vector<16x1xf32>
      %237 = arith.mulf %235, %236 : vector<16x1xf32>
      %238 = vector.broadcast %237 : vector<16x1xf32> to vector<16x128xf32>
      %239 = arith.subf %225, %238 : vector<16x128xf32>
      %240 = vector.broadcast %4 : vector<1x128xf32> to vector<16x128xf32>
      %241 = arith.mulf %239, %240 : vector<16x128xf32>
      %242 = arith.mulf %241, %241 : vector<16x128xf32>
      %cst_102 = arith.constant dense<0.000000e+00> : vector<16xf32>
      %243 = vector.multi_reduction <add>, %242, %cst_102 [1] : vector<16x128xf32> to vector<16xf32>
      %244 = vector.shape_cast %243 : vector<16xf32> to vector<16x1xf32>
      %cst_103 = arith.constant 3.125000e-02 : f32
      %245 = vector.broadcast %cst_103 : f32 to vector<16x1xf32>
      %246 = arith.mulf %244, %245 : vector<16x1xf32>
      %cst_104 = arith.constant 9.99999974E-6 : f32
      %247 = vector.broadcast %cst_104 : f32 to vector<16x1xf32>
      %248 = arith.addf %246, %247 : vector<16x1xf32>
      %249 = math.rsqrt %248 : vector<16x1xf32>
      %250 = vector.broadcast %249 : vector<16x1xf32> to vector<16x128xf32>
      %251 = arith.mulf %241, %250 : vector<16x128xf32>
      %252 = vector.broadcast %230 : vector<1x128xf32> to vector<16x128xf32>
      %253 = arith.mulf %251, %252 : vector<16x128xf32>
      %254 = vector.broadcast %231 : vector<1x128xf32> to vector<16x128xf32>
      %255 = arith.addf %253, %254 : vector<16x128xf32>
      %c0_105 = arith.constant 0 : index
      %c0_106 = arith.constant 0 : index
      %256 = vector.load %arg20[%c0_105, %c0_106] : memref<16x128xf32, #tpu.memory_space<vmem>>, vector<16x128xf32>
      tpu.vector_store %arg20[%c0_105, %c0_106], %255 {strides = array<i32>} : memref<16x128xf32, #tpu.memory_space<vmem>>, vector<16x128xf32>,
    } else {
    }
    return
  }
  func.func @transform_0(%arg0: i32) -> (i32, i32) {
    %c0_i32 = arith.constant 0 : i32
    %c0_i32_0 = arith.constant 0 : i32
    %c0_i32_1 = arith.constant 0 : i32
    return %c0_i32, %c0_i32_0 : i32, i32
  }
  func.func @transform_1(%arg0: i32) -> (i32, i32, i32) {
    %c0_i32 = arith.constant 0 : i32
    %c0_i32_0 = arith.constant 0 : i32
    %c0_i32_1 = arith.constant 0 : i32
    return %arg0, %c0_i32, %c0_i32_0 : i32, i32, i32
  }
  func.func @transform_2(%arg0: i32) -> (i32, i32, i32) {
    %c0_i32 = arith.constant 0 : i32
    %c0_i32_0 = arith.constant 0 : i32
    %c0_i32_1 = arith.constant 0 : i32
    return %arg0, %c0_i32, %c0_i32_0 : i32, i32, i32
  }
  func.func @transform_3(%arg0: i32) -> (i32, i32, i32) {
    %c0_i32 = arith.constant 0 : i32
    %c0_i32_0 = arith.constant 0 : i32
    %c0_i32_1 = arith.constant 0 : i32
    return %arg0, %c0_i32, %c0_i32_0 : i32, i32, i32
  }
  func.func @transform_4(%arg0: i32) -> (i32, i32, i32) {
    %c0_i32 = arith.constant 0 : i32
    %c0_i32_0 = arith.constant 0 : i32
    %c0_i32_1 = arith.constant 0 : i32
    return %arg0, %c0_i32, %c0_i32_0 : i32, i32, i32
  }
  func.func @transform_5(%arg0: i32) -> (i32, i32, i32) {
    %c0_i32 = arith.constant 0 : i32
    %c0_i32_0 = arith.constant 0 : i32
    %c0_i32_1 = arith.constant 0 : i32
    return %arg0, %c0_i32, %c0_i32_0 : i32, i32, i32
  }
  func.func @transform_6(%arg0: i32) -> (i32, i32, i32) {
    %c0_i32 = arith.constant 0 : i32
    %c0_i32_0 = arith.constant 0 : i32
    %c0_i32_1 = arith.constant 0 : i32
    return %arg0, %c0_i32, %c0_i32_0 : i32, i32, i32
  }
  func.func @transform_7(%arg0: i32) -> (i32, i32, i32) {
    %c0_i32 = arith.constant 0 : i32
    %c0_i32_0 = arith.constant 0 : i32
    %c0_i32_1 = arith.constant 0 : i32
    return %arg0, %c0_i32, %c0_i32_0 : i32, i32, i32
  }
  func.func @transform_8(%arg0: i32) -> (i32, i32, i32) {
    %c0_i32 = arith.constant 0 : i32
    %c0_i32_0 = arith.constant 0 : i32
    %c0_i32_1 = arith.constant 0 : i32
    return %arg0, %c0_i32, %c0_i32_0 : i32, i32, i32
  }
  func.func @transform_9(%arg0: i32) -> (i32, i32, i32) {
    %c0_i32 = arith.constant 0 : i32
    %c0_i32_0 = arith.constant 0 : i32
    %c0_i32_1 = arith.constant 0 : i32
    return %arg0, %c0_i32, %c0_i32_0 : i32, i32, i32
  }
  func.func @transform_10(%arg0: i32) -> (i32, i32, i32) {
    %c0_i32 = arith.constant 0 : i32
    %c0_i32_0 = arith.constant 0 : i32
    %c0_i32_1 = arith.constant 0 : i32
    return %arg0, %c0_i32, %c0_i32_0 : i32, i32, i32
  }
  func.func @transform_11(%arg0: i32) -> (i32, i32, i32) {
    %c0_i32 = arith.constant 0 : i32
    %c0_i32_0 = arith.constant 0 : i32
    %c0_i32_1 = arith.constant 0 : i32
    return %arg0, %c0_i32, %c0_i32_0 : i32, i32, i32
  }
  func.func @transform_12(%arg0: i32) -> (i32, i32, i32) {
    %c0_i32 = arith.constant 0 : i32
    %c0_i32_0 = arith.constant 0 : i32
    %c0_i32_1 = arith.constant 0 : i32
    return %arg0, %c0_i32, %c0_i32_0 : i32, i32, i32
  }
  func.func @transform_13(%arg0: i32) -> (i32, i32, i32) {
    %c0_i32 = arith.constant 0 : i32
    %c0_i32_0 = arith.constant 0 : i32
    %c0_i32_1 = arith.constant 0 : i32
    return %arg0, %c0_i32, %c0_i32_0 : i32, i32, i32
  }
  func.func @transform_14(%arg0: i32) -> (i32, i32, i32) {
    %c0_i32 = arith.constant 0 : i32
    %c0_i32_0 = arith.constant 0 : i32
    %c0_i32_1 = arith.constant 0 : i32
    return %arg0, %c0_i32, %c0_i32_0 : i32, i32, i32
  }
  func.func @transform_15(%arg0: i32) -> (i32, i32, i32) {
    %c0_i32 = arith.constant 0 : i32
    %c0_i32_0 = arith.constant 0 : i32
    %c0_i32_1 = arith.constant 0 : i32
    return %arg0, %c0_i32, %c0_i32_0 : i32, i32, i32
  }
  func.func @transform_16(%arg0: i32) -> (i32, i32, i32) {
    %c0_i32 = arith.constant 0 : i32
    %c0_i32_0 = arith.constant 0 : i32
    %c0_i32_1 = arith.constant 0 : i32
    return %arg0, %c0_i32, %c0_i32_0 : i32, i32, i32
  }
  func.func @transform_17(%arg0: i32) -> (i32, i32) {
    %c0_i32 = arith.constant 0 : i32
    %c0_i32_0 = arith.constant 0 : i32
    %c0_i32_1 = arith.constant 0 : i32
    return %c0_i32, %c0_i32_0 : i32, i32
  }
  func.func @transform_18(%arg0: i32) -> (i32, i32) {
    %c0_i32 = arith.constant 0 : i32
    %c0_i32_0 = arith.constant 0 : i32
    %c0_i32_1 = arith.constant 0 : i32
    return %c0_i32, %c0_i32_0 : i32, i32
  }
  func.func @transform_19(%arg0: i32) -> (i32, i32) {
    %c0_i32 = arith.constant 0 : i32
    %c0_i32_0 = arith.constant 0 : i32
    %c0_i32_1 = arith.constant 0 : i32
    return %c0_i32, %c0_i32_0 : i32, i32
  }
}

</mosaic_0001>

<bundles_post_ra>
// kernel: tpu_custom_call.1
= control target key start
LH: loop header
LB: loop body
LE: loop exit
PB: predicated region body
PF: predicated region fallthrough
CT: control target
= control target key end

     0   :  { %s9494_s0 = inlined_call_operand.hbm [shape: f32[16,128], index: 0, kind: input, shape index: {}, may-alias: {0,19}]   ;;  %s9495_s1 = inlined_call_operand.hbm [shape: bf16[2,128,512], index: 1, kind: input, shape index: {}]   ;;  %s9496_s2 = inlined_call_operand.hbm [shape: bf16[2,128,512], index: 2, kind: input, shape index: {}]   ;;  %s9497_s3 = inlined_call_operand.hbm [shape: bf16[2,128,512], index: 3, kind: input, shape index: {}]   ;;  %s9498_s4 = inlined_call_operand.vmem [shape: f32[2,1,512], index: 4, kind: input, shape index: {}]   ;;  %s9499_s5 = inlined_call_operand.hbm [shape: f32[2,1,512], index: 5, kind: input, shape index: {}]   ;;  %s9500_s6 = inlined_call_operand.hbm [shape: f32[2,1,512], index: 6, kind: input, shape index: {}]   ;;  %s9501_s7 = inlined_call_operand.hbm [shape: bf16[2,512,128], index: 7, kind: input, shape index: {}]   ;;  %s9502_s8 = inlined_call_operand.vmem [shape: f32[2,1,128], index: 8, kind: input, shape index: {}]   ;;  %s9503_s9 = inlined_call_operand.hbm [shape: f32[2,1,128], index: 9, kind: input, shape index: {}]   ;;  %s9504_s10 = inlined_call_operand.hbm [shape: f32[2,1,128], index: 10, kind: input, shape index: {}]   ;;  %s9505_s11 = inlined_call_operand.hbm [shape: bf16[2,128,2048], index: 11, kind: input, shape index: {}]   ;;  %s9506_s12 = inlined_call_operand.vmem [shape: f32[2,1,2048], index: 12, kind: input, shape index: {}]   ;;  %s9507_s13 = inlined_call_operand.hbm [shape: bf16[2,2048,128], index: 13, kind: input, shape index: {}]   ;;  %s9508_s14 = inlined_call_operand.vmem [shape: f32[2,1,128], index: 14, kind: input, shape index: {}]   ;;  %s9509_s15 = inlined_call_operand.vmem [shape: f32[2,1,128], index: 15, kind: input, shape index: {}]   ;;  %s9510_s16 = inlined_call_operand.hbm [shape: f32[2,1,128], index: 16, kind: input, shape index: {}]   ;;  %s9511_s17 = inlined_call_operand.vmem [shape: f32[1,128], index: 17, kind: input, shape index: {}]   ;;  %s9512_s18 = inlined_call_operand.vmem [shape: f32[1,128], index: 18, kind: input, shape index: {}]   ;;  %s9513_s19 = inlined_call_operand.hbm [shape: f32[16,128], index: 19, kind: output, shape index: {}, may-alias: {0,19}]  }
   0x1   :  { %9541 = sst [smem:[#allocation35_spill]] %s9494_s0 }
   0x2   :  { %9542 = sst [smem:[#allocation36_spill]] %s9495_s1 }
   0x3   :  { %9543 = sst [smem:[#allocation37_spill]] %s9496_s2 }
   0x4   :  { %9544 = sst [smem:[#allocation38_spill]] %s9497_s3 }
   0x5   :  { %9545 = sst [smem:[#allocation39_spill]] %s9498_s4 }
   0x6   :  { %9546 = sst [smem:[#allocation40_spill]] %s9499_s5 }
   0x7   :  { %9547 = sst [smem:[#allocation41_spill]] %s9500_s6 }
   0x8   :  { %9548 = sst [smem:[#allocation42_spill]] %s9501_s7 }
   0x9   :  { %9549 = sst [smem:[#allocation43_spill]] %s9502_s8 }
   0xa   :  { %9550 = sst [smem:[#allocation44_spill]] %s9503_s9 }
   0xb   :  { %9551 = sst [smem:[#allocation45_spill]] %s9504_s10 }
   0xc   :  { %9552 = sst [smem:[#allocation46_spill]] %s9505_s11 }
   0xd   :  { %9553 = sst [smem:[#allocation47_spill]] %s9506_s12 }
   0xe   :  { %9554 = sst [smem:[#allocation48_spill]] %s9507_s13 }
   0xf   :  { %9555 = sst [smem:[#allocation49_spill]] %s9508_s14 }
  0x10   :  { %9556 = sst [smem:[#allocation50_spill]] %s9509_s15 }
  0x11   :  { %9557 = sst [smem:[#allocation51_spill]] %s9510_s16 }
  0x12   :  { %9558 = sst [smem:[#allocation52_spill]] %s9511_s17 }
  0x13   :  { %9559 = sst [smem:[#allocation53_spill]] %s9512_s18 }
  0x14   :  { %9560 = sst [smem:[#allocation54_spill]] %s9513_s19 }
  0x15   :  { %24 = vsyncpa [#allocation3], 0 }
  0x16   :  { %25 = vsyncpa [#allocation6], 0 }
  0x17   :  { %27 = vsyncpa [#allocation6 + $0x1], 0 }
  0x18   :  { %28 = vsyncpa [#allocation9], 0 }
  0x19   :  { %30 = vsyncpa [#allocation9 + $0x1], 0 }
  0x1a   :  { %31 = vsyncpa [#allocation12], 0 }
  0x1b   :  { %33 = vsyncpa [#allocation12 + $0x1], 0 }
  0x1c   :  { %34 = vsyncpa [#allocation15], 0 }
  0x1d   :  { %36 = vsyncpa [#allocation15 + $0x1], 0 }
  0x1e   :  { %37 = vsyncpa [#allocation18], 0 }
  0x1f   :  { %39 = vsyncpa [#allocation18 + $0x1], 0 }
  0x20   :  { %40 = vsyncpa [#allocation21], 0 }
  0x21   :  { %42 = vsyncpa [#allocation21 + $0x1], 0 }
  0x22   :  { %43 = vsyncpa [#allocation4], 0  ;;  %s8239_s0 = smov 0   ;;  %s8241_s30 = smov 0  }
  0x23   :  { %s8243_s20 = smov 0   ;;  %s8245_s21 = smov 0  }
  0x24 LB: > { %9561 = sst [smem:[#allocation31_spill]] %s8121_s20  ;;  %s8260_s1 = sadd.s32 1, %s8125_s21   ;;  %s8125_s21 = sphi %s8245_s21, %s9609_s21   ;;  %s8121_s20 = sphi %s8243_s20, %s9611_s20   ;;  %s8117_s30 = sphi %s8241_s30, %s9613_s30   ;;  %s8113_s0 = sphi %s8239_s0, %s9612_s0  }
  0x25   : > { %9562 = sst [smem:[#allocation32_spill]] %s8260_s1  ;;  %s77_s22 = sadd.s32 1, %s8121_s20 }
  0x26   : > { %s74_s2 = ssub.s32 %s8125_s21, %s8260_s1  ;;  %p84_p0 = scmp.ne.s32.totalorder %s8121_s20, %s8117_s30 }
  0x27   : > { %p75_p1 = scmp.eq.s32.totalorder %s74_s2, 0  ;;  %p85_p2 = scmp.eq.s32.totalorder %s8125_s21, 0 }
  0x28   : > { %p7573_p3 = scmp.lt.s32.totalorder %s8125_s21, 2  ;;  %s8273_s24 = sand.u32 1, %s8125_s21  }
  0x29   : > { %s8270_s23 = scalar_select %p75_p1, %s8121_s20, %s77_s22  }
  0x2a   : > { %p86_p4 = por %p85_p2, %p84_p0  ;;  %s8276_s25 = sand.u32 1, %s8121_s20  }
  0x2b   : > { %9563 = sst [smem:[#allocation33_spill]] %s8270_s23  ;;  %s8279_s3 = sshll.u32 %s8276_s25, 8 }
  0x2c   : > { %9564 = sst [smem:[#allocation34_spill]] %s8279_s3  ;;  %s8282_s26 = sshll.u32 %s8125_s21, 8 }
  0x2d   : > { %s9565_s29 = sld [smem:[#allocation36_spill]]  ;;  %s591_s22 = scalar_lea.vmem [#allocation5], %s8279_s3 }
  0x2e   : > { %s599_s23 = sshll.u32 %s591_s22, 4  ;;  %p8291_p5 = pnand %p7573_p3, %p86_p4  ;;  %s600_s23 = int_to_ptr.vmem [resolvable:$true] %s599_s23 }
  0x30   : > { %p8298_p7 = pneg %p8291_p5 }
  0x33   : > { %s596_s2 = scalar_lea.hbm %s9565_s29, %s8282_s26  ;;  %s7682_s22 = scalar_lea.hbm %s9565_s29, 512 }
  0x34   : > { %s597_s1 = sshll.u32 %s596_s2, 4  ;;  %s598_s1 = int_to_ptr.hbm [resolvable:$true] %s597_s1 }
  0x35   : > { %s7675_s18 = sshra.s32 %s598_s1, 4  ;;  %s7676_s18 = int_to_ptr.hbm [resolvable:$true] %s7675_s18 }
  0x36   : > { %s7677_s17 = scalar_lea.hbm %s7676_s18, 256  ;;  %p7683_p10 = scmp.lt.s32.totalorder %s7676_s18, %s9565_s29 }
  0x37   : > { %p7678_p6 = scmp.ne.s32.totalorder %s7676_s18, %s7677_s17  ;;  %p7684_p11 = scmp.lt.s32.totalorder %s7682_s22, %s7677_s17 }
  0x39   : > { %p7680_p8 = pnand %p8298_p7, %p7678_p6  ;;  %p7685_p12 = por %p7684_p11, %p7683_p10 }
  0x3b   : > { %p7681_p9 = pneg %p7680_p8 }
  0x3d   : > { %p7686_p13 = pnand %p7685_p12, %p7681_p9 }
  0x3f   : > { %7689 = shalt.err (!%p7686_p13)
}
  0x40   : > { %s9534_s19 = smov 256   ;;  %s9535_s12 = smov 16  }
  0x41   : > { %s9568_s28 = scalar_lea.sflag [#allocation6], %s8273_s24  ;;  %s9569_s17 = sld [smem:[#allocation38_spill]] }
  0x42   : > { %7541 = dma.hbm_to_vmem [thread:$0]  (!%p8291_p5), %s598_s1, 4096, %s600_s23, %s9568_s28, %s9534_s19, %s9534_s19, %s9535_s12  }
  0x43   : > { %s635_s2 = scalar_lea.vmem [#allocation8], %s8279_s3  ;;  %s9530_s4 = sshll.u32 %s8276_s25, 2 }
  0x44   : > { %s643_s22 = sshll.u32 %s635_s2, 4  ;;  %s9527_s8 = scalar_lea.sflag [#allocation9], %s8273_s24  ;;  %s644_s22 = int_to_ptr.vmem [resolvable:$true] %s643_s22 }
  0x47   : > { %s640_s18 = scalar_lea.hbm %s9569_s17, %s8282_s26  ;;  %s7712_s23 = scalar_lea.hbm %s9569_s17, 512 }
  0x48   : > { %s641_s29 = sshll.u32 %s640_s18, 4  ;;  %s642_s29 = int_to_ptr.hbm [resolvable:$true] %s641_s29 }
  0x49   : > { %s7705_s16 = sshra.s32 %s642_s29, 4  ;;  %s7706_s16 = int_to_ptr.hbm [resolvable:$true] %s7705_s16 }
  0x4a   : > { %s7707_s10 = scalar_lea.hbm %s7706_s16, 256  ;;  %p7713_p3 = scmp.lt.s32.totalorder %s7706_s16, %s9569_s17 }
  0x4b   : > { %p7708_p0 = scmp.ne.s32.totalorder %s7706_s16, %s7707_s10  ;;  %p7714_p4 = scmp.lt.s32.totalorder %s7712_s23, %s7707_s10 }
  0x4d   : > { %p7710_p1 = pnand %p7708_p0, %p8298_p7  ;;  %p7715_p6 = por %p7714_p4, %p7713_p3 }
  0x4f   : > { %p7711_p2 = pneg %p7710_p1 }
  0x51   : > { %p7716_p8 = pnand %p7715_p6, %p7711_p2 }
  0x53   : > { %7719 = shalt.err (!%p7716_p8)
}
  0x54   : > { %7547 = dma.hbm_to_vmem [thread:$0]  (!%p8291_p5), %s642_s29, 4096, %s644_s22, %s9527_s8, %s9534_s19, %s9534_s19, %s9535_s12  }
  0x55   : > { %s5539_s7 = sshll.u32 %s8125_s21, 2  ;;  %s9570_s5 = sld [smem:[#allocation40_spill]] }
  0x56   : > { %s9571_s6 = sld [smem:[#allocation41_spill]]  ;;  %s683_s28 = scalar_lea.vmem [#allocation11], %s9530_s4 }
  0x57   : > { %s691_s14 = sshll.u32 %s683_s28, 4  ;;  %s9528_s17 = scalar_lea.sflag [#allocation12], %s8273_s24  ;;  %s692_s14 = int_to_ptr.vmem [resolvable:$true] %s691_s14 }
  0x5b   : > { %s8343_s10 = scalar_lea.hbm %s9570_s5, %s5539_s7 }
  0x5c   : > { %s687_s1 = scalar_lea.hbm %s9571_s6, %s5539_s7  ;;  %s7742_s18 = scalar_lea.hbm %s9571_s6, 8 }
  0x5d   : > { %s689_s23 = sshll.u32 %s687_s1, 4  ;;  %s690_s23 = int_to_ptr.hbm [resolvable:$true] %s689_s23 }
  0x5e   : > { %s7735_s3 = sshra.s32 %s690_s23, 4  ;;  %s7736_s3 = int_to_ptr.hbm [resolvable:$true] %s7735_s3 }
  0x5f   : > { %s7737_s29 = scalar_lea.hbm %s7736_s3, 4  ;;  %p7743_p12 = scmp.lt.s32.totalorder %s7736_s3, %s9571_s6 }
  0x60   : > { %p7738_p9 = scmp.ne.s32.totalorder %s7736_s3, %s7737_s29  ;;  %p7744_p13 = scmp.lt.s32.totalorder %s7742_s18, %s7737_s29 }
  0x62   : > { %p7740_p10 = pnand %p7738_p9, %p8298_p7  ;;  %p7745_p0 = por %p7744_p13, %p7743_p12 }
  0x64   : > { %p7741_p11 = pneg %p7740_p10 }
  0x66   : > { %p7746_p1 = pnand %p7745_p0, %p7741_p11 }
  0x68   : > { %7749 = shalt.err (!%p7746_p1)
}
  0x69   : > { %7553 = dma.hbm_to_vmem [thread:$0]  (!%p8291_p5), %s690_s23, 64, %s692_s14, %s9528_s17  }
  0x6a   : > { %s9572_s9 = sld [smem:[#allocation44_spill]]  ;;  %s729_s22 = scalar_lea.vmem [#allocation14], %s8276_s25 }
  0x6b   : > { %s736_s15 = sshll.u32 %s729_s22, 4  ;;  %s9529_s29 = scalar_lea.sflag [#allocation15], %s8273_s24  ;;  %s737_s15 = int_to_ptr.vmem [resolvable:$true] %s736_s15 }
  0x70   : > { %s732_s28 = scalar_lea.hbm %s9572_s9, %s8125_s21  ;;  %s7772_s23 = scalar_lea.hbm %s9572_s9, 2 }
  0x71   : > { %s734_s3 = sshll.u32 %s732_s28, 4  ;;  %s735_s3 = int_to_ptr.hbm [resolvable:$true] %s734_s3 }
  0x72   : > { %s7765_s18 = sshra.s32 %s735_s3, 4  ;;  %s7766_s18 = int_to_ptr.hbm [resolvable:$true] %s7765_s18 }
  0x73   : > { %s7767_s16 = scalar_lea.hbm %s7766_s18, 1  ;;  %p7773_p6 = scmp.lt.s32.totalorder %s7766_s18, %s9572_s9 }
  0x74   : > { %p7768_p2 = scmp.ne.s32.totalorder %s7766_s18, %s7767_s16  ;;  %p7774_p8 = scmp.lt.s32.totalorder %s7772_s23, %s7767_s16 }
  0x76   : > { %p7770_p3 = pnand %p7768_p2, %p8298_p7  ;;  %p7775_p9 = por %p7774_p8, %p7773_p6 }
  0x78   : > { %p7771_p4 = pneg %p7770_p3 }
  0x7a   : > { %p7776_p10 = pnand %p7775_p9, %p7771_p4 }
  0x7c   : > { %7779 = shalt.err (!%p7776_p10)
}
  0x7d   : > { %7559 = dma.hbm_to_vmem [thread:$0]  (!%p8291_p5), %s735_s3, 16, %s737_s15, %s9529_s29  }
  0x7e   : > { %s5545_s1 = sshll.u32 %s8276_s25, 10  ;;  %s7118_s8 = sshll.u32 %s8125_s21, 10 }
  0x7f   : > { %s9573_s11 = sld [smem:[#allocation46_spill]]  ;;  %s764_s18 = scalar_lea.vmem [#allocation17], %s5545_s1 }
  0x80   : > { %s772_s16 = sshll.u32 %s764_s18, 4  ;;  %s9531_s14 = scalar_lea.sflag [#allocation18], %s8273_s24  ;;  %s773_s16 = int_to_ptr.vmem [resolvable:$true] %s772_s16 }
  0x85   : > { %s769_s7 = scalar_lea.hbm %s9573_s11, %s7118_s8  ;;  %s7802_s29 = scalar_lea.hbm %s9573_s11, 2048 }
  0x86   : > { %s770_s23 = sshll.u32 %s769_s7, 4  ;;  %s771_s23 = int_to_ptr.hbm [resolvable:$true] %s770_s23 }
  0x87   : > { %s7795_s2 = sshra.s32 %s771_s23, 4  ;;  %s7796_s2 = int_to_ptr.hbm [resolvable:$true] %s7795_s2 }
  0x88   : > { %s7797_s17 = scalar_lea.hbm %s7796_s2, 1024  ;;  %p7803_p0 = scmp.lt.s32.totalorder %s7796_s2, %s9573_s11 }
  0x89   : > { %p7798_p11 = scmp.ne.s32.totalorder %s7796_s2, %s7797_s17  ;;  %p7804_p1 = scmp.lt.s32.totalorder %s7802_s29, %s7797_s17 }
  0x8b   : > { %p7800_p12 = pnand %p7798_p11, %p8298_p7  ;;  %p7805_p2 = por %p7804_p1, %p7803_p0 }
  0x8d   : > { %p7801_p13 = pneg %p7800_p12 }
  0x8f   : > { %p7806_p3 = pnand %p7805_p2, %p7801_p13 }
  0x91   : > { %7809 = shalt.err (!%p7806_p3)
}
  0x92   : > { %s8129_s22 = smov 1024   ;;  %s9532_s7 = smov 64  }
  0x93   : > { %7565 = dma.hbm_to_vmem [thread:$0]  (!%p8291_p5), %s771_s23, 16384, %s773_s16, %s9531_s14, %s8129_s22, %s8129_s22, %s9532_s7  }
  0x94   : > { %s9574_s13 = sld [smem:[#allocation48_spill]]  ;;  %s793_s2 = scalar_lea.vmem [#allocation19], %s5545_s1 }
  0x95   : > { %s801_s15 = sshll.u32 %s793_s2, 4  ;;  %s8408_s3 = sadd.s32 4294967295, %s8125_s21   ;;  %s8405_s15 = int_to_ptr.vmem [resolvable:$true] %s801_s15 }
  0x96   : > { %s9575_s28 = sld [smem:[#allocation34_spill]]  ;;  %p91_p4 = scmp.eq.s32.totalorder %s8408_s3, 0 }
  0x97   : > { %p90_p6 = scmp.ne.s32.totalorder %s8117_s30, %s8113_s0  ;;  %p5526_p8 = scmp.ge.s32.totalorder %s8125_s21, 1 }
  0x98   : > { %p554_p9 = scmp.lt.s32.totalorder %s8125_s21, 3  ;;  %p5527_p10 = scmp.ne.s32.totalorder %s8408_s3, 0 }
  0x99   : > { %p8418_p11 = por %p91_p4, %p90_p6  ;;  %s9578_s23 = sld [smem:[#allocation35_spill]] }
  0x9a   : > { %s798_s17 = scalar_lea.hbm %s9574_s13, %s7118_s8  ;;  %p8425_p12 = pnand %p5526_p8, %p554_p9 }
  0x9b   : > { %s799_s29 = sshll.u32 %s798_s17, 4  ;;  %s8131_s0 = smov [#allocation2]   ;;  %s8403_s29 = int_to_ptr.hbm [resolvable:$true] %s799_s29 }
  0x9c   : > { %s9576_s1 = scalar_select %p8418_p11, 1, 0 }
  0x9d   : > { %p7534_p13 = pneg %p8425_p12  ;;  %s567_s4 = sshll.u32 %s8131_s0, 4  ;;  %s568_s4 = int_to_ptr.vmem [resolvable:$true] %s567_s4 }
  0x9e   : > { %9577 = sst [smem:[#allocation34_spill]] %s9576_s1  ;;  %s613_s8 = scalar_lea.vmem [#allocation7], %s9575_s28 }
  0x9f   : > { %s565_s22 = sshll.u32 %s9578_s23, 4  ;;  %p7535_p0 = pnand %p7534_p13, %p91_p4  ;;  %s566_s22 = int_to_ptr.hbm [resolvable:$true] %s565_s22 }
  0xa0   : > { %s9580_s14 = sld [smem:[#allocation37_spill]]  ;;  %s621_s16 = sshll.u32 %s613_s8, 4  ;;  %s622_s16 = int_to_ptr.vmem [resolvable:$true] %s621_s16 }
  0xa1   : > { %s8132_s19 = smov 128   ;;  %s8133_s12 = smov 8  }
  0xa2   : > { %7537 = dma.hbm_to_vmem [thread:$0]  (!%p7535_p0), %s566_s22, 256, %s568_s4, [#allocation3], %s8132_s19, %s8132_s19, %s8133_s12  }
  0xa6   : > { %s618_s7 = scalar_lea.hbm %s9580_s14, %s8282_s26  ;;  %s7862_s17 = scalar_lea.hbm %s9580_s14, 512 }
  0xa7   : > { %s619_s23 = sshll.u32 %s618_s7, 4  ;;  %s620_s23 = int_to_ptr.hbm [resolvable:$true] %s619_s23 }
  0xa8   : > { %s7855_s6 = sshra.s32 %s620_s23, 4  ;;  %s7856_s6 = int_to_ptr.hbm [resolvable:$true] %s7855_s6 }
  0xa9   : > { %s7857_s9 = scalar_lea.hbm %s7856_s6, 256  ;;  %p7863_p6 = scmp.lt.s32.totalorder %s7856_s6, %s9580_s14 }
  0xaa   : > { %p7858_p1 = scmp.ne.s32.totalorder %s7856_s6, %s7857_s9  ;;  %p7864_p8 = scmp.lt.s32.totalorder %s7862_s17, %s7857_s9 }
  0xac   : > { %p7860_p2 = pnand %p7858_p1, %p8298_p7  ;;  %p7865_p9 = por %p7864_p8, %p7863_p6 }
  0xae   : > { %p7861_p3 = pneg %p7860_p2 }
  0xb0   : > { %p7866_p13 = pnand %p7865_p9, %p7861_p3 }
  0xb2   : > { %7869 = shalt.err (!%p7866_p13)
}
  0xb3   : > { %s9581_s12 = smov 16   ;;  %s9582_s19 = smov 256  }
  0xb4   : > { %s9583_s7 = scalar_lea.sflag [#allocation6], %s8273_s24  ;;  %s670_s11 = sshll.u32 %s8343_s10, 4  ;;  %s671_s11 = int_to_ptr.hbm [resolvable:$true] %s670_s11 }
  0xb5   : > { %7544 = dma.hbm_to_vmem [thread:$0]  (!%p8291_p5), %s620_s23, 4096, %s622_s16, %s9583_s7, %s9582_s19, %s9582_s19, %s9581_s12  }
  0xb6   : > { %s9584_s22 = sshll.u32 %s8276_s25, 2  ;;  %s7885_s6 = sshra.s32 %s671_s11, 4  ;;  %s7886_s6 = int_to_ptr.hbm [resolvable:$true] %s7885_s6 }
  0xb7   : > { %s664_s4 = scalar_lea.vmem [#allocation10], %s9584_s22  ;;  %s7887_s9 = scalar_lea.hbm %s7886_s6, 4 }
  0xb8   : > { %s672_s1 = sshll.u32 %s664_s4, 4  ;;  %p7888_p0 = scmp.ne.s32.totalorder %s7886_s6, %s7887_s9  ;;  %s673_s1 = int_to_ptr.vmem [resolvable:$true] %s672_s1 }
  0xb9   : > { %s7892_s17 = scalar_lea.hbm %s9570_s5, 8  ;;  %p7893_p3 = scmp.lt.s32.totalorder %s7886_s6, %s9570_s5 }
  0xba   : > { %p7890_p1 = pnand %p7888_p0, %p8298_p7  ;;  %p7894_p6 = scmp.lt.s32.totalorder %s7892_s17, %s7887_s9 }
  0xbc   : > { %p7891_p2 = pneg %p7890_p1  ;;  %p7895_p8 = por %p7894_p6, %p7893_p3 }
  0xbe   : > { %p7896_p9 = pnand %p7895_p8, %p7891_p2 }
  0xc0   : > { %7899 = shalt.err (!%p7896_p9)
}
  0xc1   : > { %s9585_s10 = scalar_lea.sflag [#allocation9], %s8273_s24  ;;  %s9586_s12 = sld [smem:[#allocation42_spill]] }
  0xc2   : > { %7550 = dma.hbm_to_vmem [thread:$0]  (!%p8291_p5), %s671_s11, 64, %s673_s1, %s9585_s10  }
  0xc3   : > { %s702_s22 = scalar_lea.vmem [#allocation13], %s9575_s28 }
  0xc4   : > { %s710_s14 = sshll.u32 %s702_s22, 4  ;;  %s711_s14 = int_to_ptr.vmem [resolvable:$true] %s710_s14 }
  0xc7   : > { %s707_s19 = scalar_lea.hbm %s9586_s12, %s8282_s26  ;;  %s7922_s11 = scalar_lea.hbm %s9586_s12, 512 }
  0xc8   : > { %s708_s7 = sshll.u32 %s707_s19, 4  ;;  %s709_s7 = int_to_ptr.hbm [resolvable:$true] %s708_s7 }
  0xc9   : > { %s7915_s4 = sshra.s32 %s709_s7, 4  ;;  %s7916_s4 = int_to_ptr.hbm [resolvable:$true] %s7915_s4 }
  0xca   : > { %s7917_s6 = scalar_lea.hbm %s7916_s4, 256  ;;  %p7923_p2 = scmp.lt.s32.totalorder %s7916_s4, %s9586_s12 }
  0xcb   : > { %p7918_p13 = scmp.ne.s32.totalorder %s7916_s4, %s7917_s6  ;;  %p7924_p3 = scmp.lt.s32.totalorder %s7922_s11, %s7917_s6 }
  0xcd   : > { %p7920_p0 = pnand %p7918_p13, %p8298_p7  ;;  %p7925_p6 = por %p7924_p3, %p7923_p2 }
  0xcf   : > { %p7921_p1 = pneg %p7920_p0 }
  0xd1   : > { %p7926_p8 = pnand %p7925_p6, %p7921_p1 }
  0xd3   : > { %7929 = shalt.err (!%p7926_p8)
}
  0xd4   : > { %s8134_s26 = smov 4   ;;  %s9587_s28 = smov 64  }
  0xd5   : > { %s9588_s17 = scalar_lea.sflag [#allocation12], %s8273_s24  ;;  %s9589_s16 = sld [smem:[#allocation45_spill]] }
  0xd6   : > { %7556 = dma.hbm_to_vmem [thread:$0]  (!%p8291_p5), %s709_s7, 4096, %s711_s14, %s9588_s17, %s9587_s28, %s9587_s28, %s8134_s26  }
  0xd7   : > { %s746_s19 = scalar_lea.vmem [#allocation16], %s8276_s25 }
  0xd8   : > { %s753_s22 = sshll.u32 %s746_s19, 4  ;;  %s754_s22 = int_to_ptr.vmem [resolvable:$true] %s753_s22 }
  0xdb   : > { %s749_s23 = scalar_lea.hbm %s9589_s16, %s8125_s21  ;;  %s7952_s7 = scalar_lea.hbm %s9589_s16, 2 }
  0xdc   : > { %s751_s4 = sshll.u32 %s749_s23, 4  ;;  %s752_s4 = int_to_ptr.hbm [resolvable:$true] %s751_s4 }
  0xdd   : > { %s7945_s6 = sshra.s32 %s752_s4, 4  ;;  %s7946_s6 = int_to_ptr.hbm [resolvable:$true] %s7945_s6 }
  0xde   : > { %s7947_s9 = scalar_lea.hbm %s7946_s6, 1  ;;  %p7953_p1 = scmp.lt.s32.totalorder %s7946_s6, %s9589_s16 }
  0xdf   : > { %p7948_p9 = scmp.ne.s32.totalorder %s7946_s6, %s7947_s9  ;;  %p7954_p2 = scmp.lt.s32.totalorder %s7952_s7, %s7947_s9 }
  0xe1   : > { %p7950_p13 = pnand %p7948_p9, %p8298_p7  ;;  %p7955_p3 = por %p7954_p2, %p7953_p1 }
  0xe3   : > { %p7951_p0 = pneg %p7950_p13 }
  0xe5   : > { %p7956_p6 = pnand %p7955_p3, %p7951_p0 }
  0xe7   : > { %7959 = shalt.err (!%p7956_p6)
}
  0xe8   : > { %s9590_s0 = scalar_lea.sflag [#allocation15], %s8273_s24  ;;  %s7975_s17 = sshra.s32 %s8403_s29, 4  ;;  %s7976_s17 = int_to_ptr.hbm [resolvable:$true] %s7975_s17 }
  0xe9   : > { %7562 = dma.hbm_to_vmem [thread:$0]  (!%p8291_p5), %s752_s4, 16, %s754_s22, %s9590_s0  }
  0xea   : > { %s7977_s2 = scalar_lea.hbm %s7976_s17, 1024  ;;  %s7982_s19 = scalar_lea.hbm %s9574_s13, 2048 }
  0xeb   : > { %p7978_p8 = scmp.ne.s32.totalorder %s7976_s17, %s7977_s2  ;;  %p7983_p0 = scmp.lt.s32.totalorder %s7976_s17, %s9574_s13 }
  0xec   : > { %p7984_p1 = scmp.lt.s32.totalorder %s7982_s19, %s7977_s2 }
  0xed   : > { %p7980_p9 = pnand %p7978_p8, %p8298_p7 }
  0xee   : > { %p7985_p2 = por %p7984_p1, %p7983_p0 }
  0xef   : > { %p7981_p13 = pneg %p7980_p9 }
  0xf1   : > { %p7986_p3 = pnand %p7985_p2, %p7981_p13 }
  0xf3   : > { %7989 = shalt.err (!%p7986_p3)
}
  0xf4   : > { %s9591_s22 = scalar_lea.sflag [#allocation18], %s8273_s24  ;;  %s9592_s11 = sld [smem:[#allocation51_spill]] }
  0xf5   : > { %7568 = dma.hbm_to_vmem [thread:$0]  (!%p8291_p5), %s8403_s29, 16384, %s8405_s15, %s9591_s22, %s9587_s28, %s9587_s28, %s8134_s26  }
  0xf6   : > { %s826_s1 = scalar_lea.vmem [#allocation20], %s8276_s25  ;;  %s824_s17 = scalar_lea.sflag [#allocation21], %s8276_s25 }
  0xf7   : > { %s833_s0 = sshll.u32 %s826_s1, 4  ;;  %s834_s0 = int_to_ptr.vmem [resolvable:$true] %s833_s0 }
  0xfa   : > { %s829_s7 = scalar_lea.hbm %s9592_s11, %s8125_s21  ;;  %s8012_s29 = scalar_lea.hbm %s9592_s11, 2 }
  0xfb   : > { %s831_s14 = sshll.u32 %s829_s7, 4  ;;  %s832_s14 = int_to_ptr.hbm [resolvable:$true] %s831_s14 }
  0xfc   : > { %s8005_s2 = sshra.s32 %s832_s14, 4  ;;  %s8006_s2 = int_to_ptr.hbm [resolvable:$true] %s8005_s2 }
  0xfd   : > { %s8007_s24 = scalar_lea.hbm %s8006_s2, 1  ;;  %p8013_p13 = scmp.lt.s32.totalorder %s8006_s2, %s9592_s11 }
  0xfe   : > { %p8008_p6 = scmp.ne.s32.totalorder %s8006_s2, %s8007_s24  ;;  %p8014_p0 = scmp.lt.s32.totalorder %s8012_s29, %s8007_s24 }
 0x100   : > { %p8010_p8 = pnand %p8008_p6, %p8298_p7  ;;  %p8015_p1 = por %p8014_p0, %p8013_p13 }
 0x102   : > { %p8011_p9 = pneg %p8010_p8 }
 0x104   : > { %p8016_p2 = pnand %p8015_p1, %p8011_p9 }
 0x106   : > { %8019 = shalt.err (!%p8016_p2)
}
 0x107   : > { %7571 = dma.hbm_to_vmem [thread:$0]  (!%p8291_p5), %s832_s14, 16, %s834_s0, %s824_s17  }
 0x108   : > { %842 = sbr.rel (%p8425_p12) target bundleno = 2809 (0xaf9), region = 96 }
 0x10d   : > { %8080 = dma.done.wait (%p91_p4), [#allocation3], 256  }
 0x10e   : > { %8082 = vsyncadd (%p91_p4), [#allocation3], 4294967040  ;;  %s849_s25 = sand.u32 1, %s8408_s3   ;;  %s8547_s27 = sand.u32 1, %s8117_s30  }
 0x10f   : > { %s5553_s28 = sshll.u32 %s8547_s27, 8  ;;  %s850_s19 = scalar_lea.sflag [#allocation6], %s849_s25 }
 0x110   : > { %s8550_s20 = scalar_lea.vmem [#allocation5], %s5553_s28 }
 0x111   : > { %8084 = dma.done.wait (%p8418_p11), %s850_s19, 8192  }
 0x112   : > { %8086 = vsyncadd (%p8418_p11), %s850_s19, 4294959104  ;;  %s8556_s18 = scalar_lea.vmem [#allocation7], %s5553_s28  ;;  %s870_s6 = scalar_lea.sflag [#allocation9], %s849_s25 }
 0x113   : > { %s8558_s9 = scalar_lea.vmem [#allocation8], %s5553_s28 }
 0x114   : > { %8088 = dma.done.wait (%p8418_p11), %s870_s6, 4160  }
 0x115   : > { %8090 = vsyncadd (%p8418_p11), %s870_s6, 4294963136  ;;  %s5556_s22 = sshll.u32 %s8547_s27, 2  ;;  %s890_s8 = scalar_lea.sflag [#allocation12], %s849_s25 }
 0x116   : > { %s8565_s4 = scalar_lea.vmem [#allocation10], %s5556_s22  ;;  %s8567_s7 = scalar_lea.vmem [#allocation11], %s5556_s22 }
 0x117   : > { %8092 = dma.done.wait (%p8418_p11), %s890_s8, 4160  }
 0x118   : > { %8094 = vsyncadd (%p8418_p11), %s890_s8, 4294963136  ;;  %s8573_s14 = scalar_lea.vmem [#allocation13], %s5553_s28  ;;  %s910_s1 = scalar_lea.sflag [#allocation15], %s849_s25 }
 0x119   : > { %8096 = dma.done.wait (%p8418_p11), %s910_s1, 32  }
 0x11a   : > { %8098 = vsyncadd (%p8418_p11), %s910_s1, 4294967264  ;;  %s5559_s17 = sshll.u32 %s8547_s27, 10  ;;  %s928_s24 = scalar_lea.sflag [#allocation18], %s849_s25 }
 0x11b   : > { %s8582_s10 = scalar_lea.vmem [#allocation17], %s5559_s17 }
 0x11c   : > { %8100 = dma.done.wait (%p8418_p11), %s928_s24, 32768  }
 0x11d   : > { %8102 = vsyncadd (%p8418_p11), %s928_s24, 4294934528  ;;  %s8588_s23 = scalar_lea.vmem [#allocation19], %s5559_s17  ;;  %s948_s29 = scalar_lea.sflag [#allocation21], %s8547_s27 }
 0x11e   : > { %8104 = dma.done.wait (%p8418_p11), %s948_s29, 16  }
 0x11f   : > { %8106 = vsyncadd (%p8418_p11), %s948_s29, 4294967280  ;;  %p1065_p5 = scmp.lt.s32.totalorder %s8408_s3, 1  ;;  %v1083_v0 = vlaneseq  ;;  %s9595_s1 = sld [smem:[#allocation39_spill]]  ;;  %v8135_v2 = vmov 0.0  }
 0x120   : > { %s9596_s2 = sld [smem:[#allocation47_spill]] }
 0x121   : > { %s8598_s26 = scalar_select %p1065_p5, %s8408_s3, 1  ;;  %v1084_v1 = vand.u32 127, %v1083_v0 }
 0x122   : > { %s9597_s12 = sld [smem:[#allocation49_spill]] }
 0x123   : > { %s5561_s25 = sshll.u32 %s8598_s26, 2  ;;  %vm1085_vm0 = vcmp.lt.s32.totalorder %v1084_v1, 32  ;;  %s5562_s24 = sshll.u32 %s8598_s26, 4 }
 0x124   : > { %v8611_v3 = vsel %vm1085_vm0, 1.0, %v8135_v2  ;;  %s9598_s22 = sld [smem:[#allocation50_spill]] }
 0x125   : > { %s8608_s17 = scalar_lea.vmem %s9595_s1, %s5561_s25 }
 0x126   : > { %s8616_s0 = scalar_lea.vmem %s9596_s2, %s5562_s24  ;;  %1091 = sbr.rel (%p5527_p10) target bundleno = 302 (0x12e), region = 148 }
 0x128   : > { %s1078_s28 = scalar_lea.vmem %s9597_s12, %s8598_s26 }
 0x12a   : > { %s1081_s13 = scalar_lea.vmem %s9598_s22, %s8598_s26 }
 0x12b   : > { %v1092_v4 = vld [vmem:[#allocation2] sm:$0xff]  ;;  %v1093_v5 = vld [vmem:[#allocation2 + $0x8] sm:$0xff] }
 0x12c   : > { %1094 = vst [vmem:[#allocation22] sm:$0xff] %v1092_v4 }
 0x12d   : > { %1095 = vst [vmem:[#allocation22 + $0x8] sm:$0xff] %v1093_v5 }
 0x12e PF: > { %v5679_v6 = vld [vmem:[%s8550_s20 + $0xe0] sm:$0xf]  ;;  %v7150_v7 = vld [vmem:[%s8550_s20 + $0xec] sm:$0xf0]  ;;  %v7148_v11 = vld [vmem:[%s8550_s20 + $0xe4] sm:$0xf] }
 0x12f   : > { %v5663_v8 = vld [vmem:[%s8550_s20 + $0xc0] sm:$0xf]  ;;  %v5680_v9 = vor.u32 %v7150_v7, %v5679_v6  ;;  %v7146_v10 = vld [vmem:[%s8550_s20 + $0xcc] sm:$0xf0]  ;;  %v5681_v12 = vld [vmem:[%s8550_s20 + $0xf0] sm:$0xf0] }
 0x130   : > { %v5664_v13 = vor.u32 %v7146_v10, %v5663_v8  ;;  %v5684_v14 = vor.u32 %v7148_v11, %v5681_v12  ;;  %v7144_v15 = vld [vmem:[%s8550_s20 + $0xc4] sm:$0xf]  ;;  %v5665_v16 = vld [vmem:[%s8550_s20 + $0xd0] sm:$0xf0]  ;;  %v5647_v17 = vld [vmem:[%s8550_s20 + $0xa0] sm:$0xf] }
 0x131   : > { %1301 = vmatpush.bf16.msra.mxu0 %v5680_v9  ;;  %v7142_v18 = vld [vmem:[%s8550_s20 + $0xac] sm:$0xf0]  ;;  %v5668_v19 = vor.u32 %v7144_v15, %v5665_v16  ;;  %v7140_v20 = vld [vmem:[%s8550_s20 + $0xa4] sm:$0xf]  ;;  %v5649_v21 = vld [vmem:[%s8550_s20 + $0xb0] sm:$0xf0] }
 0x132   : > { %1315 = vmatpush.bf16.msra.mxu1 %v5684_v14  ;;  %v5648_v22 = vor.u32 %v7142_v18, %v5647_v17  ;;  %v5631_v23 = vld [vmem:[%s8550_s20 + $0x80] sm:$0xf]  ;;  %v7138_v24 = vld [vmem:[%s8550_s20 + $0x8c] sm:$0xf0]  ;;  %v5652_v25 = vor.u32 %v7140_v20, %v5649_v21  ;;  %v7136_v26 = vld [vmem:[%s8550_s20 + $0x84] sm:$0xf] }
 0x133   : > { %v5633_v27 = vld [vmem:[%s8550_s20 + $0x90] sm:$0xf0]  ;;  %v5632_v28 = vor.u32 %v7138_v24, %v5631_v23  ;;  %v5615_v29 = vld [vmem:[%s8550_s20 + $0x60] sm:$0xf]  ;;  %v7134_v30 = vld [vmem:[%s8550_s20 + $0x6c] sm:$0xf0] }
 0x134   : > { %v5636_v31 = vor.u32 %v7136_v26, %v5633_v27  ;;  %v7132_v32 = vld [vmem:[%s8550_s20 + $0x64] sm:$0xf]  ;;  %v5617_v33 = vld [vmem:[%s8550_s20 + $0x70] sm:$0xf0]  ;;  %v5616_v34 = vor.u32 %v7134_v30, %v5615_v29  ;;  %v5599_v35 = vld [vmem:[%s8550_s20 + $0x40] sm:$0xf] }
 0x135   : > { %1302 = vmatpush.bf16.msra.mxu0 %v5664_v13  ;;  %v7130_v36 = vld [vmem:[%s8550_s20 + $0x4c] sm:$0xf0]  ;;  %v5620_v37 = vor.u32 %v7132_v32, %v5617_v33  ;;  %v7128_v38 = vld [vmem:[%s8550_s20 + $0x44] sm:$0xf]  ;;  %v5601_v39 = vld [vmem:[%s8550_s20 + $0x50] sm:$0xf0] }
 0x136   : > { %1316 = vmatpush.bf16.msra.mxu1 %v5668_v19  ;;  %v5600_v40 = vor.u32 %v7130_v36, %v5599_v35  ;;  %v5583_v41 = vld [vmem:[%s8550_s20 + $0x20] sm:$0xf]  ;;  %v7126_v42 = vld [vmem:[%s8550_s20 + $0x2c] sm:$0xf0]  ;;  %v5604_v43 = vor.u32 %v7128_v38, %v5601_v39  ;;  %v7124_v44 = vld [vmem:[%s8550_s20 + $0x24] sm:$0xf] }
 0x137   : > { %v5585_v45 = vld [vmem:[%s8550_s20 + $0x30] sm:$0xf0]  ;;  %v5584_v46 = vor.u32 %v7126_v42, %v5583_v41  ;;  %v5567_v47 = vld [vmem:[%s8550_s20] sm:$0xf]  ;;  %v7122_v48 = vld [vmem:[%s8550_s20 + $0xc] sm:$0xf0] }
 0x138   : > { %v5807_v49 = vld [vmem:[%s8556_s18 + $0xe0] sm:$0xf]  ;;  %v7182_v50 = vld [vmem:[%s8556_s18 + $0xec] sm:$0xf0]  ;;  %v5588_v51 = vor.u32 %v7124_v44, %v5585_v45  ;;  %v1096_v52 = vld [vmem:[#allocation22] sm:$0xff]  ;;  %v5568_v55 = vor.u32 %v7122_v48, %v5567_v47  ;;  %vm1965_vm1 = vcmask 1043456  }
 0x139   : > { %1303 = vmatpush.bf16.msra.mxu0 %v5648_v22  ;;  %v7120_v53 = vld [vmem:[%s8550_s20 + $0x4] sm:$0xf]  ;;  %v5569_v54 = vld [vmem:[%s8550_s20 + $0x10] sm:$0xf0]  ;;  %v5808_v59 = vor.u32 %v7182_v50, %v5807_v49  ;;  %v5791_v60 = vld [vmem:[%s8556_s18 + $0xc0] sm:$0xf] }
 0x13a   : > { %1317 = vmatpush.bf16.msra.mxu1 %v5652_v25  ;;  %v1097_v56 = vld [vmem:[#allocation22 + $0x8] sm:$0xff]  ;;  %v5809_v58 = vld [vmem:[%s8556_s18 + $0xf0] sm:$0xf0]  ;;  %v7178_v61 = vld [vmem:[%s8556_s18 + $0xcc] sm:$0xf0]  ;;  %v5572_v62 = vor.u32 %v7120_v53, %v5569_v54  ;;  %vm1913_vm2 = vcmask 64512  }
 0x13b   : > { %v7180_v57 = vld [vmem:[%s8556_s18 + $0xe4] sm:$0xf]  ;;  %v8666_v63 = vpack.c.bf16 %v1097_v56, %v1096_v52  ;;  %v5793_v2 = vld [vmem:[%s8556_s18 + $0xd0] sm:$0xf0]  ;;  %v5792_v4 = vor.u32 %v7178_v61, %v5791_v60  ;;  %v5775_v5 = vld [vmem:[%s8556_s18 + $0xa0] sm:$0xf] }
 0x13c   : > { %v5812_v0 = vor.u32 %v7180_v57, %v5809_v58  ;;  %v7176_v1 = vld [vmem:[%s8556_s18 + $0xc4] sm:$0xf]  ;;  %v7174_v6 = vld [vmem:[%s8556_s18 + $0xac] sm:$0xf0]  ;;  %v5777_v9 = vld [vmem:[%s8556_s18 + $0xb0] sm:$0xf0] }
 0x13d   : > { %1304 = vmatpush.bf16.msra.mxu0 %v5632_v28  ;;  %v5796_v7 = vor.u32 %v7176_v1, %v5793_v2  ;;  %v7172_v8 = vld [vmem:[%s8556_s18 + $0xa4] sm:$0xf]  ;;  %v5776_v10 = vor.u32 %v7174_v6, %v5775_v5  ;;  %v5759_v11 = vld [vmem:[%s8556_s18 + $0x80] sm:$0xf]  ;;  %v7170_v12 = vld [vmem:[%s8556_s18 + $0x8c] sm:$0xf0] }
 0x13e   : > { %1318 = vmatpush.bf16.msra.mxu1 %v5636_v31  ;;  %v5780_v13 = vor.u32 %v7172_v8, %v5777_v9  ;;  %v7168_v14 = vld [vmem:[%s8556_s18 + $0x84] sm:$0xf]  ;;  %v5761_v15 = vld [vmem:[%s8556_s18 + $0x90] sm:$0xf0]  ;;  %v5760_v16 = vor.u32 %v7170_v12, %v5759_v11  ;;  %v5743_v17 = vld [vmem:[%s8556_s18 + $0x60] sm:$0xf] }
 0x13f   : > { %v7166_v18 = vld [vmem:[%s8556_s18 + $0x6c] sm:$0xf0]  ;;  %v5764_v19 = vor.u32 %v7168_v14, %v5761_v15  ;;  %v7164_v20 = vld [vmem:[%s8556_s18 + $0x64] sm:$0xf]  ;;  %v5745_v21 = vld [vmem:[%s8556_s18 + $0x70] sm:$0xf0] }
 0x140   : > { %v5744_v22 = vor.u32 %v7166_v18, %v5743_v17  ;;  %v5727_v23 = vld [vmem:[%s8556_s18 + $0x40] sm:$0xf]  ;;  %v7162_v24 = vld [vmem:[%s8556_s18 + $0x4c] sm:$0xf0]  ;;  %v5748_v25 = vor.u32 %v7164_v20, %v5745_v21  ;;  %v7160_v26 = vld [vmem:[%s8556_s18 + $0x44] sm:$0xf] }
 0x141   : > { %1305 = vmatpush.bf16.msra.mxu0 %v5616_v34  ;;  %v5729_v27 = vld [vmem:[%s8556_s18 + $0x50] sm:$0xf0]  ;;  %v5728_v28 = vor.u32 %v7162_v24, %v5727_v23  ;;  %v5711_v29 = vld [vmem:[%s8556_s18 + $0x20] sm:$0xf]  ;;  %v7158_v30 = vld [vmem:[%s8556_s18 + $0x2c] sm:$0xf0] }
 0x142   : > { %1319 = vmatpush.bf16.msra.mxu1 %v5620_v37  ;;  %v5732_v31 = vor.u32 %v7160_v26, %v5729_v27  ;;  %v7156_v32 = vld [vmem:[%s8556_s18 + $0x24] sm:$0xf]  ;;  %v5713_v33 = vld [vmem:[%s8556_s18 + $0x30] sm:$0xf0]  ;;  %v5712_v34 = vor.u32 %v7158_v30, %v5711_v29  ;;  %v5695_v35 = vld [vmem:[%s8556_s18] sm:$0xf] }
 0x143   : > { %v7154_v36 = vld [vmem:[%s8556_s18 + $0xc] sm:$0xf0]  ;;  %v5716_v37 = vor.u32 %v7156_v32, %v5713_v33  ;;  %v5935_v38 = vld [vmem:[%s8558_s9 + $0xe0] sm:$0xf]  ;;  %v5697_v41 = vld [vmem:[%s8556_s18 + $0x10] sm:$0xf0] }
 0x144   : > { %v7214_v39 = vld [vmem:[%s8558_s9 + $0xec] sm:$0xf0]  ;;  %v5696_v42 = vor.u32 %v7154_v36, %v5695_v35  ;;  %v5937_v44 = vld [vmem:[%s8558_s9 + $0xf0] sm:$0xf0]  ;;  %v5919_v47 = vld [vmem:[%s8558_s9 + $0xc0] sm:$0xf] }
 0x145   : > { %1306 = vmatpush.bf16.msra.mxu0 %v5600_v40  ;;  %v7152_v40 = vld [vmem:[%s8556_s18 + $0x4] sm:$0xf]  ;;  %v5936_v45 = vor.u32 %v7214_v39, %v5935_v38  ;;  %v7210_v48 = vld [vmem:[%s8558_s9 + $0xcc] sm:$0xf0]  ;;  %v5887_v54 = vld [vmem:[%s8558_s9 + $0x80] sm:$0xf] }
 0x146   : > { %1320 = vmatpush.bf16.msra.mxu1 %v5604_v43  ;;  %v7212_v43 = vld [vmem:[%s8558_s9 + $0xe4] sm:$0xf]  ;;  %v5920_v50 = vor.u32 %v7210_v48, %v5919_v47  ;;  %v7206_v52 = vld [vmem:[%s8558_s9 + $0xac] sm:$0xf0]  ;;  %v5871_v57 = vld [vmem:[%s8558_s9 + $0x60] sm:$0xf] }
 0x147   : > { %v5940_v49 = vor.u32 %v7212_v43, %v5937_v44  ;;  %v7198_v58 = vld [vmem:[%s8558_s9 + $0x6c] sm:$0xf0]  ;;  %v5855_v60 = vld [vmem:[%s8558_s9 + $0x40] sm:$0xf]  ;;  %v5921_v1 = vld [vmem:[%s8558_s9 + $0xd0] sm:$0xf0] }
 0x148   : > { %v7194_v61 = vld [vmem:[%s8558_s9 + $0x4c] sm:$0xf0]  ;;  %v7204_v6 = vld [vmem:[%s8558_s9 + $0xa4] sm:$0xf]  ;;  %v5905_v8 = vld [vmem:[%s8558_s9 + $0xb0] sm:$0xf0] }
 0x149   : > { %1307 = vmatpush.bf16.msra.mxu0 %v5584_v46  ;;  %v5700_v46 = vor.u32 %v7152_v40, %v5697_v41  ;;  %v7190_v5 = vld [vmem:[%s8558_s9 + $0x2c] sm:$0xf0]  ;;  %v5908_v9 = vor.u32 %v7204_v6, %v5905_v8  ;;  %v7200_v12 = vld [vmem:[%s8558_s9 + $0x84] sm:$0xf]  ;;  %v5889_v14 = vld [vmem:[%s8558_s9 + $0x90] sm:$0xf0] }
 0x14a   : > { %1321 = vmatpush.bf16.msra.mxu1 %v5588_v51  ;;  %v5903_v51 = vld [vmem:[%s8558_s9 + $0xa0] sm:$0xf]  ;;  %v7186_v11 = vld [vmem:[%s8558_s9 + $0xc] sm:$0xf0]  ;;  %v5892_v15 = vor.u32 %v7200_v12, %v5889_v14  ;;  %v5873_v17 = vld [vmem:[%s8558_s9 + $0x70] sm:$0xf0] }
 0x14b   : > { %v5904_v53 = vor.u32 %v7206_v52, %v5903_v51  ;;  %v5857_v20 = vld [vmem:[%s8558_s9 + $0x50] sm:$0xf0]  ;;  %v8735_v32 = vld [vmem:[%s8565_s4] sm:$0xf]  ;;  %v8738_v33 = vld [vmem:[%s8608_s17] sm:$0xf] }
 0x14c   : > { %v5841_v23 = vld [vmem:[%s8558_s9 + $0x30] sm:$0xf0]  ;;  %v1133_v35 = vperm.slane %v8738_v33, 0  ;;  %v1392_v36 = vperm.slane %v8735_v32, 1  ;;  %v7149_v41 = vld [vmem:[%s8550_s20 + $0xec] sm:$0xf] }
 0x14d   : > { %1308 = vmatpush.bf16.msra.mxu0 %v5568_v55  ;;  %v7202_v55 = vld [vmem:[%s8558_s9 + $0x8c] sm:$0xf0]  ;;  %v5825_v26 = vld [vmem:[%s8558_s9 + $0x10] sm:$0xf0]  ;;  %v5673_v47 = vld [vmem:[%s8550_s20 + $0xd8] sm:$0xf0] }
 0x14e   : > { %1322 = vmatpush.bf16.msra.mxu1 %v5572_v62  ;;  %v5888_v56 = vor.u32 %v7202_v55, %v5887_v54  ;;  %v7208_v62 = vld [vmem:[%s8558_s9 + $0xc4] sm:$0xf]  ;;  %v7141_v51 = vld [vmem:[%s8550_s20 + $0xac] sm:$0xf]  ;;  %v5657_v52 = vld [vmem:[%s8550_s20 + $0xb8] sm:$0xf0] }
 0x14f   : > { %v5924_v2 = vor.u32 %v7208_v62, %v5921_v1  ;;  %v5660_v55 = vor.u32 %v7141_v51, %v5657_v52  ;;  %v5625_v6 = vld [vmem:[%s8550_s20 + $0x78] sm:$0xf0]  ;;  %v7125_v14 = vld [vmem:[%s8550_s20 + $0x2c] sm:$0xf]  ;;  %s9599_s11 = sld [smem:[#allocation43_spill]]  ;;  %p7109_p7 = scmp.ne.s32.totalorder %s8408_s3, 1 }
 0x150   : > { %1309 = vmatmul.bf16.vlgmr.msra.gmra.mxu0 %v8666_v63  ;;  %s9606_s15 = sld [smem:[#allocation52_spill]] (!%p7109_p7) }
 0x151   : > { %1559 = vmatpush.bf16.msrb.mxu0 %v5808_v59  ;;  %1323 = vmatmul.bf16.vlgmr.msra.gmra.mxu1 %v8666_v63  ;;  %v5872_v59 = vor.u32 %v7198_v58, %v5871_v57  ;;  %s9607_s22 = sld [smem:[#allocation53_spill]] (!%p7109_p7) }
 0x152   : > { %1573 = vmatpush.bf16.msrb.mxu1 %v5812_v0  ;;  %v5856_v0 = vor.u32 %v7194_v61, %v5855_v60  ;;  %v5641_v60 = vld [vmem:[%s8550_s20 + $0x98] sm:$0xf0] }
 0x155   : > { %1560 = vmatpush.bf16.msrb.mxu0 %v5792_v4  ;;  %v5839_v4 = vld [vmem:[%s8558_s9 + $0x20] sm:$0xf] }
 0x156   : > { %1574 = vmatpush.bf16.msrb.mxu1 %v5796_v7  ;;  %v5840_v7 = vor.u32 %v7190_v5, %v5839_v4  ;;  %v7133_v5 = vld [vmem:[%s8550_s20 + $0x6c] sm:$0xf] }
 0x157   : > { %v5628_v8 = vor.u32 %v7133_v5, %v5625_v6  ;;  %v7153_v6 = vld [vmem:[%s8556_s18 + $0xc] sm:$0xf] }
 0x159   : > { %1561 = vmatpush.bf16.msrb.mxu0 %v5776_v10  ;;  %v5823_v10 = vld [vmem:[%s8558_s9] sm:$0xf] }
 0x15a   : > { %1575 = vmatpush.bf16.msrb.mxu1 %v5780_v13  ;;  %v5824_v13 = vor.u32 %v7186_v11, %v5823_v10  ;;  %v7129_v10 = vld [vmem:[%s8550_s20 + $0x4c] sm:$0xf]  ;;  %v5609_v11 = vld [vmem:[%s8550_s20 + $0x58] sm:$0xf0] }
 0x15d   : > { %1562 = vmatpush.bf16.msrb.mxu0 %v5760_v16  ;;  %v7196_v16 = vld [vmem:[%s8558_s9 + $0x64] sm:$0xf] }
 0x15e   : > { %1576 = vmatpush.bf16.msrb.mxu1 %v5764_v19  ;;  %v5876_v18 = vor.u32 %v7196_v16, %v5873_v17  ;;  %v7192_v19 = vld [vmem:[%s8558_s9 + $0x44] sm:$0xf]  ;;  %v5687_v16 = vld [vmem:[%s8550_s20 + $0xe8] sm:$0xf]  ;;  %v7151_v17 = vld [vmem:[%s8550_s20 + $0xf4] sm:$0xf0] }
 0x15f   : > { %v5860_v21 = vor.u32 %v7192_v19, %v5857_v20  ;;  %v7121_v20 = vld [vmem:[%s8550_s20 + $0xc] sm:$0xf] }
 0x161   : > { %1563 = vmatpush.bf16.msrb.mxu0 %v5744_v22  ;;  %v7188_v22 = vld [vmem:[%s8558_s9 + $0x24] sm:$0xf] }
 0x162   : > { %1577 = vmatpush.bf16.msrb.mxu1 %v5748_v25  ;;  %v5844_v24 = vor.u32 %v7188_v22, %v5841_v23  ;;  %v7184_v25 = vld [vmem:[%s8558_s9 + $0x4] sm:$0xf]  ;;  %v5577_v23 = vld [vmem:[%s8550_s20 + $0x18] sm:$0xf0] }
 0x163   : > { %v5828_v27 = vor.u32 %v7184_v25, %v5825_v26  ;;  %v7147_v25 = vld [vmem:[%s8550_s20 + $0xd4] sm:$0xf0]  ;;  %v7181_v26 = vld [vmem:[%s8556_s18 + $0xec] sm:$0xf] }
 0x165   : > { %1564 = vmatpush.bf16.msrb.mxu0 %v5728_v28 }
 0x166   : > { %1578 = vmatpush.bf16.msrb.mxu1 %v5732_v31 }
 0x169   : > { %1565 = vmatpush.bf16.msrb.mxu0 %v5712_v34  ;;  %v1391_v34 = vperm.slane %v8735_v32, 0 }
 0x16a   : > { %1579 = vmatpush.bf16.msrb.mxu1 %v5716_v37 }
 0x16d   : > { %1566 = vmatpush.bf16.msrb.mxu0 %v5696_v42  ;;  %v5689_v42 = vld [vmem:[%s8550_s20 + $0xf8] sm:$0xf0] }
 0x16e   : > { %1580 = vmatpush.bf16.msrb.mxu1 %v5700_v46  ;;  %v7145_v46 = vld [vmem:[%s8550_s20 + $0xcc] sm:$0xf] }
 0x170   : > { %1567 = vmatmul.bf16.vlgmr.msrb.gmra.mxu0 %v8666_v63 }
 0x171   : > { %1817 = vmatpush.bf16.msra.mxu0 %v5936_v45  ;;  %1581 = vmatmul.bf16.vlgmr.msrb.gmra.mxu1 %v8666_v63  ;;  %v5692_v45 = vor.u32 %v7149_v41, %v5689_v42  ;;  %v7173_v41 = vld [vmem:[%s8556_s18 + $0xac] sm:$0xf]  ;;  %v5785_v42 = vld [vmem:[%s8556_s18 + $0xb8] sm:$0xf0] }
 0x172   : > { %1831 = vmatpush.bf16.msra.mxu1 %v5940_v49  ;;  %v5676_v49 = vor.u32 %v7145_v46, %v5673_v47  ;;  %v5788_v46 = vor.u32 %v7173_v41, %v5785_v42  ;;  %v7169_v47 = vld [vmem:[%s8556_s18 + $0x8c] sm:$0xf]  ;;  %v7167_v41 = vld [vmem:[%s8556_s18 + $0x74] sm:$0xf0] }
 0x173   : > { %1343 = vmatpush.bf16.msra.mxu3 %v5692_v45 }
 0x175   : > { %1818 = vmatpush.bf16.msra.mxu0 %v5920_v50 }
 0x176   : > { %1832 = vmatpush.bf16.msra.mxu1 %v5924_v2 }
 0x177   : > { %1344 = vmatpush.bf16.msra.mxu3 %v5676_v49  ;;  %v5623_v49 = vld [vmem:[%s8550_s20 + $0x68] sm:$0xf] }
 0x179   : > { %1819 = vmatpush.bf16.msra.mxu0 %v5904_v53 }
 0x17a   : > { %1833 = vmatpush.bf16.msra.mxu1 %v5908_v9 }
 0x17b   : > { %1345 = vmatpush.bf16.msra.mxu3 %v5660_v55  ;;  %v5607_v55 = vld [vmem:[%s8550_s20 + $0x48] sm:$0xf] }
 0x17d   : > { %1820 = vmatpush.bf16.msra.mxu0 %v5888_v56 }
 0x17e   : > { %1834 = vmatpush.bf16.msra.mxu1 %v5892_v15  ;;  %v5593_v15 = vld [vmem:[%s8550_s20 + $0x38] sm:$0xf0] }
 0x17f   : > { %v5596_v19 = vor.u32 %v7125_v14, %v5593_v15 }
 0x181   : > { %1821 = vmatpush.bf16.msra.mxu0 %v5872_v59  ;;  %v7137_v59 = vld [vmem:[%s8550_s20 + $0x8c] sm:$0xf] }
 0x182   : > { %1835 = vmatpush.bf16.msra.mxu1 %v5876_v18  ;;  %v5644_v2 = vor.u32 %v7137_v59, %v5641_v60  ;;  %v5688_v18 = vor.u32 %v7151_v17, %v5687_v16  ;;  %v7161_v59 = vld [vmem:[%s8556_s18 + $0x4c] sm:$0xf]  ;;  %v5737_v60 = vld [vmem:[%s8556_s18 + $0x58] sm:$0xf0] }
 0x184   : > { %1346 = vmatpush.bf16.msra.mxu3 %v5644_v2  ;;  %1329 = vmatpush.bf16.msra.mxu2 %v5688_v18  ;;  %v7157_v2 = vld [vmem:[%s8556_s18 + $0x2c] sm:$0xf] }
 0x185   : > { %1822 = vmatpush.bf16.msra.mxu0 %v5856_v0  ;;  %v1134_v0 = vperm.slane %v8738_v33, 1  ;;  %v7209_v18 = vld [vmem:[%s8558_s9 + $0xcc] sm:$0xf] }
 0x186   : > { %1836 = vmatpush.bf16.msra.mxu1 %v5860_v21 }
 0x188   : > { %1347 = vmatpush.bf16.msra.mxu3 %v5628_v8  ;;  %v5575_v8 = vld [vmem:[%s8550_s20 + $0x8] sm:$0xf] }
 0x189   : > { %1823 = vmatpush.bf16.msra.mxu0 %v5840_v7 }
 0x18a   : > { %1837 = vmatpush.bf16.msra.mxu1 %v5844_v24  ;;  %v5671_v24 = vld [vmem:[%s8550_s20 + $0xc8] sm:$0xf] }
 0x18d   : > { %1824 = vmatpush.bf16.msra.mxu0 %v5824_v13  ;;  %v5612_v13 = vor.u32 %v7129_v10, %v5609_v11  ;;  %v5815_v10 = vld [vmem:[%s8556_s18 + $0xe8] sm:$0xf]  ;;  %v7183_v11 = vld [vmem:[%s8556_s18 + $0xf4] sm:$0xf0] }
 0x18e   : > { %1838 = vmatpush.bf16.msra.mxu1 %v5828_v27  ;;  %v5817_v27 = vld [vmem:[%s8556_s18 + $0xf8] sm:$0xf0]  ;;  %v5816_v15 = vor.u32 %v7183_v11, %v5815_v10 }
 0x18f   : > { %1348 = vmatpush.bf16.msra.mxu3 %v5612_v13  ;;  %v5945_v13 = vld [vmem:[%s8558_s9 + $0xf8] sm:$0xf0] }
 0x190   : > { %1825 = vmatmul.bf16.vlgmr.msra.gmra.mxu0 %v8666_v63 }
 0x191   : > { %1839 = vmatmul.bf16.vlgmr.msra.gmra.mxu1 %v8666_v63 }
 0x193   : > { %1349 = vmatpush.bf16.msra.mxu3 %v5596_v19  ;;  %v5929_v19 = vld [vmem:[%s8558_s9 + $0xd8] sm:$0xf0] }
 0x1cd   : > { %v1310_v28 = vpop.f32.mrf.mxu0 }
 0x1ce   : > { %v1324_v29 = vpop.f32.mrf.mxu1  ;;  %v1311_v39 = vadd.f32 %v1310_v28, %v1133_v35  ;;  %v5672_v28 = vor.u32 %v7147_v25, %v5671_v24  ;;  %v7175_v24 = vld [vmem:[%s8556_s18 + $0xb4] sm:$0xf0]  ;;  %v5932_v25 = vor.u32 %v7209_v18, %v5929_v19  ;;  %v5911_v19 = vld [vmem:[%s8558_s9 + $0xa8] sm:$0xf] }
 0x1cf   : > { %v1325_v7 = vadd.f32 %v1324_v29, %v1134_v0  ;;  %v5580_v29 = vor.u32 %v7121_v20, %v5577_v23  ;;  %v5799_v20 = vld [vmem:[%s8556_s18 + $0xc8] sm:$0xf] }
 0x1d0   : > { %v1873_v50 = vmul.f32 0.35355338, %v1311_v39  ;;  %1330 = vmatpush.bf16.msra.mxu2 %v5672_v28  ;;  %v5783_v23 = vld [vmem:[%s8556_s18 + $0xa8] sm:$0xf]  ;;  %v5913_v28 = vld [vmem:[%s8558_s9 + $0xb8] sm:$0xf0] }
 0x1d1   : > { %v1874_v12 = vmul.f32 0.35355338, %v1325_v7  ;;  %1350 = vmatpush.bf16.msra.mxu3 %v5580_v29  ;;  %v5705_v7 = vld [vmem:[%s8556_s18 + $0x18] sm:$0xf0] }
 0x1d2   : > { %v1881_v56 = vpack.c.bf16 %v1873_v50, %v1873_v50  ;;  %v7135_v50 = vld [vmem:[%s8550_s20 + $0x74] sm:$0xf0]  ;;  %v5708_v16 = vor.u32 %v7153_v6, %v5705_v7  ;;  %v5703_v7 = vld [vmem:[%s8556_s18 + $0x8] sm:$0xf] }
 0x1d3   : > { %v2020_v21 = vpack.c.bf16 %v1874_v12, %v1874_v12  ;;  %v5624_v51 = vor.u32 %v7135_v50, %v5623_v49  ;;  %v7213_v12 = vld [vmem:[%s8558_s9 + $0xec] sm:$0xf]  ;;  %v5849_v50 = vld [vmem:[%s8558_s9 + $0x38] sm:$0xf0] }
 0x1d4   : > { %1351 = vmatmul.bf16.vlgmr.msra.gmra.mxu3 %v8666_v63  ;;  %v5948_v17 = vor.u32 %v7213_v12, %v5945_v13  ;;  %v7189_v49 = vld [vmem:[%s8558_s9 + $0x2c] sm:$0xf]  ;;  %v5943_v13 = vld [vmem:[%s8558_s9 + $0xe8] sm:$0xf] }
 0x1d5   : > { %v1312_v30 = vpop.f32.mrf.mxu0 }
 0x1d6   : > { %v8732_v31 = vpop.f32.mrf.mxu1  ;;  %v1313_v57 = vadd.f32 %v1312_v30, %v1133_v35  ;;  %v7177_v35 = vld [vmem:[%s8556_s18 + $0xcc] sm:$0xf] }
 0x1d7   : > { %v1327_v22 = vadd.f32 %v8732_v31, %v1134_v0  ;;  %v5655_v31 = vld [vmem:[%s8550_s20 + $0xa8] sm:$0xf] }
 0x1d8   : > { %v1877_v4 = vmul.f32 0.35355338, %v1313_v57 }
 0x1d9   : > { %v1878_v30 = vmul.f32 0.35355338, %v1327_v22 }
 0x1da   : > { %v1882_v9 = vpack.c.bf16 %v1877_v4, %v1877_v4  ;;  %v5721_v4 = vld [vmem:[%s8556_s18 + $0x38] sm:$0xf0] }
 0x1db   : > { %v2021_v39 = vpack.c.bf16 %v1878_v30, %v1878_v30  ;;  %v5724_v5 = vor.u32 %v7157_v2, %v5721_v4  ;;  %v7201_v30 = vld [vmem:[%s8558_s9 + $0x8c] sm:$0xf]  ;;  %v5719_v4 = vld [vmem:[%s8556_s18 + $0x28] sm:$0xf] }
 0x1ed   : > { %v1568_v37 = vpop.f32.mrf.mxu0 }
 0x1ee   : > { %v1569_v38 = vadd.f32 %v1568_v37, %v1391_v34  ;;  %v1582_v40 = vpop.f32.mrf.mxu1  ;;  %v7143_v37 = vld [vmem:[%s8550_s20 + $0xb4] sm:$0xf0] }
 0x1ef   : > { %v1583_v44 = vadd.f32 %v1582_v40, %v1392_v36 }
 0x1f0   : > { %v1883_v43 = vpack.c.bf16 %v1569_v38, %v1569_v38  ;;  %v5656_v38 = vor.u32 %v7143_v37, %v5655_v31  ;;  %v7171_v31 = vld [vmem:[%s8556_s18 + $0x94] sm:$0xf0]  ;;  %v5751_v37 = vld [vmem:[%s8556_s18 + $0x68] sm:$0xf] }
 0x1f1   : > { %v2022_v48 = vpack.c.bf16 %v1583_v44, %v1583_v44  ;;  %v7139_v44 = vld [vmem:[%s8550_s20 + $0x94] sm:$0xf0]  ;;  %v5752_v42 = vor.u32 %v7167_v41, %v5751_v37 }
 0x1f2   : > { %1894 = vmatpush.bf16.xpose.msrb.mxu0 %v1883_v43  ;;  %1331 = vmatpush.bf16.msra.mxu2 %v5656_v38  ;;  %v5639_v43 = vld [vmem:[%s8550_s20 + $0x88] sm:$0xf]  ;;  %v7197_v38 = vld [vmem:[%s8558_s9 + $0x6c] sm:$0xf]  ;;  %v7191_v41 = vld [vmem:[%s8558_s9 + $0x34] sm:$0xf0] }
 0x1f3   : > { %v5640_v45 = vor.u32 %v7139_v44, %v5639_v43  ;;  %v8817_v44 = vld [vmem:[%s8567_s7] sm:$0xf] }
 0x1f4   : > { %v1650_v37 = vperm.slane %v8817_v44, 1 }
 0x1f5   : > { %v1570_v53 = vpop.f32.mrf.mxu0 }
 0x1f6   : > { %v1571_v54 = vadd.f32 %v1570_v53, %v1391_v34  ;;  %v1584_v58 = vpop.f32.mrf.mxu1  ;;  %v5820_v34 = vor.u32 %v7181_v26, %v5817_v27  ;;  %1332 = vmatpush.bf16.msra.mxu2 %v5640_v45  ;;  %v7165_v53 = vld [vmem:[%s8556_s18 + $0x6c] sm:$0xf]  ;;  %v5784_v26 = vor.u32 %v7175_v24, %v5783_v23  ;;  %v5895_v24 = vld [vmem:[%s8558_s9 + $0x88] sm:$0xf] }
 0x1f7   : > { %v1585_v62 = vadd.f32 %v1584_v58, %v1392_v36  ;;  %v5801_v36 = vld [vmem:[%s8556_s18 + $0xd8] sm:$0xf0]  ;;  %v7205_v27 = vld [vmem:[%s8558_s9 + $0xac] sm:$0xf] }
 0x1f8   : > { %v1884_v61 = vpack.c.bf16 %v1571_v54, %v1571_v54  ;;  %1601 = vmatpush.bf16.msrb.mxu3 %v5820_v34  ;;  %v5804_v40 = vor.u32 %v7177_v35, %v5801_v36  ;;  %v5753_v54 = vld [vmem:[%s8556_s18 + $0x78] sm:$0xf0]  ;;  %v5916_v29 = vor.u32 %v7205_v27, %v5913_v28  ;;  %v5767_v36 = vld [vmem:[%s8556_s18 + $0x88] sm:$0xf]  ;;  %v7193_v45 = vld [vmem:[%s8558_s9 + $0x4c] sm:$0xf] }
 0x1f9   : > { %1895 = vmatmul.bf16.vlgmr.msrb.gmra.mxu0 %v1881_v56  ;;  %v2023_v1 = vpack.c.bf16 %v1585_v62, %v1585_v62  ;;  %v7131_v56 = vld [vmem:[%s8550_s20 + $0x54] sm:$0xf0]  ;;  %v5756_v58 = vor.u32 %v7165_v53, %v5753_v54  ;;  %v5897_v34 = vld [vmem:[%s8558_s9 + $0x98] sm:$0xf0]  ;;  %v5852_v53 = vor.u32 %v7189_v49, %v5849_v50  ;;  %v7185_v54 = vld [vmem:[%s8558_s9 + $0xc] sm:$0xf] }
 0x1fa   : > { %2033 = vmatpush.bf16.xpose.msra.mxu0 %v2022_v48  ;;  %1907 = vmatpush.bf16.xpose.msrb.mxu1 %v1884_v61  ;;  %v5769_v48 = vld [vmem:[%s8556_s18 + $0x98] sm:$0xf0]  ;;  %v5608_v57 = vor.u32 %v7131_v56, %v5607_v55  ;;  %v5591_v61 = vld [vmem:[%s8550_s20 + $0x28] sm:$0xf]  ;;  %v7127_v62 = vld [vmem:[%s8550_s20 + $0x34] sm:$0xf0]  ;;  %v5900_v35 = vor.u32 %v7201_v30, %v5897_v34 }
 0x1fb   : > { %v5772_v52 = vor.u32 %v7169_v47, %v5769_v48  ;;  %1333 = vmatpush.bf16.msra.mxu2 %v5624_v51  ;;  %v5592_v0 = vor.u32 %v7127_v62, %v5591_v61  ;;  %v1649_v47 = vperm.slane %v8817_v44, 0  ;;  %v5833_v55 = vld [vmem:[%s8558_s9 + $0x18] sm:$0xf0]  ;;  %v5879_v28 = vld [vmem:[%s8558_s9 + $0x68] sm:$0xf] }
 0x1fc   : > { %1602 = vmatpush.bf16.msrb.mxu3 %v5804_v40  ;;  %v5768_v40 = vor.u32 %v7171_v31, %v5767_v36  ;;  %v5863_v36 = vld [vmem:[%s8558_s9 + $0x48] sm:$0xf]  ;;  %v7195_v31 = vld [vmem:[%s8558_s9 + $0x54] sm:$0xf0] }
 0x1ff   : > { %1334 = vmatpush.bf16.msra.mxu2 %v5608_v57  ;;  %v5836_v57 = vor.u32 %v7185_v54, %v5833_v55 }
 0x200   : > { %1603 = vmatpush.bf16.msrb.mxu3 %v5788_v46  ;;  %v5865_v46 = vld [vmem:[%s8558_s9 + $0x58] sm:$0xf0] }
 0x201   : > { %1908 = vmatmul.bf16.vlgmr.msrb.gmra.mxu1 %v1882_v9  ;;  %v7123_v9 = vld [vmem:[%s8550_s20 + $0x14] sm:$0xf0]  ;;  %v5868_v48 = vor.u32 %v7193_v45, %v5865_v46  ;;  %s9600_s20 = scalar_lea.vmem %s9599_s11, %s8598_s26 }
 0x202   : > { %2046 = vmatpush.bf16.xpose.msra.mxu1 %v2023_v1  ;;  %v5740_v1 = vor.u32 %v7161_v59, %v5737_v60  ;;  %v5576_v14 = vor.u32 %v7123_v9, %v5575_v8  ;;  %v7155_v8 = vld [vmem:[%s8556_s18 + $0x14] sm:$0xf0] }
 0x203   : > { %1335 = vmatpush.bf16.msra.mxu2 %v5592_v0  ;;  %v5735_v0 = vld [vmem:[%s8556_s18 + $0x48] sm:$0xf]  ;;  %v5704_v9 = vor.u32 %v7155_v8, %v5703_v7 }
 0x204   : > { %1604 = vmatpush.bf16.msrb.mxu3 %v5772_v52 }
 0x207   : > { %1336 = vmatpush.bf16.msra.mxu2 %v5576_v14  ;;  %v7215_v14 = vld [vmem:[%s8558_s9 + $0xf4] sm:$0xf0] }
 0x208   : > { %1605 = vmatpush.bf16.msrb.mxu3 %v5756_v58 }
 0x209   : > { %2034 = vmatmul.bf16.vlgmr.msra.gmra.mxu0 %v2020_v21  ;;  %v7179_v21 = vld [vmem:[%s8556_s18 + $0xd4] sm:$0xf0] }
 0x20a   : > { %v5800_v22 = vor.u32 %v7179_v21, %v5799_v20  ;;  %1337 = vmatmul.bf16.vlgmr.msra.gmra.mxu2 %v8666_v63  ;;  %v7207_v20 = vld [vmem:[%s8558_s9 + $0xb4] sm:$0xf0] }
 0x20b   : > { %1587 = vmatpush.bf16.msrb.mxu2 %v5816_v15  ;;  %v5927_v15 = vld [vmem:[%s8558_s9 + $0xc8] sm:$0xf]  ;;  %v5912_v21 = vor.u32 %v7207_v20, %v5911_v19 }
 0x20c   : > { %1606 = vmatpush.bf16.msrb.mxu3 %v5740_v1  ;;  %v7163_v1 = vld [vmem:[%s8556_s18 + $0x54] sm:$0xf0] }
 0x20d   : > { %v1826_v51 = vpop.f32.mrf.mxu0  ;;  %v5736_v2 = vor.u32 %v7163_v1, %v5735_v0 }
 0x20e   : > { %v1827_v52 = vadd.f32 %v1826_v51, %v1649_v47  ;;  %v1840_v10 = vpop.f32.mrf.mxu1 }
 0x20f   : > { %1588 = vmatpush.bf16.msrb.mxu2 %v5800_v22 }
 0x210   : > { %1607 = vmatpush.bf16.msrb.mxu3 %v5724_v5  ;;  %v1885_v56 = vpack.c.bf16 %v1827_v52, %v1827_v52  ;;  %v7159_v5 = vld [vmem:[%s8556_s18 + $0x34] sm:$0xf0]  ;;  %s9601_s18 = scalar_lea.vmem [#allocation14], %s8547_s27 }
 0x211   : > { %2047 = vmatmul.bf16.vlgmr.msra.gmra.mxu1 %v2021_v39  ;;  %v5881_v39 = vld [vmem:[%s8558_s9 + $0x78] sm:$0xf0]  ;;  %v5720_v6 = vor.u32 %v7159_v5, %v5719_v4 }
 0x212   : > { %v5884_v43 = vor.u32 %v7197_v38, %v5881_v39  ;;  %v1967_v58 = vsel %vm1965_vm1, %v1885_v56, 0  ;;  %v5864_v39 = vor.u32 %v7195_v31, %v5863_v36 }
 0x213   : > { %1589 = vmatpush.bf16.msrb.mxu2 %v5784_v26 }
 0x214   : > { %1608 = vmatpush.bf16.msrb.mxu3 %v5708_v16  ;;  %v5944_v16 = vor.u32 %v7215_v14, %v5943_v13 }
 0x215   : > { %v1828_v59 = vpop.f32.mrf.mxu0 }
 0x216   : > { %v1829_v60 = vadd.f32 %v1828_v59, %v1649_v47  ;;  %v8836_v11 = vpop.f32.mrf.mxu1  ;;  %v5831_v47 = vld [vmem:[%s8558_s9 + $0x8] sm:$0xf] }
 0x217   : > { %1609 = vmatmul.bf16.vlgmr.msrb.gmra.mxu3 %v8666_v63  ;;  %1590 = vmatpush.bf16.msrb.mxu2 %v5768_v40  ;;  %v5847_v40 = vld [vmem:[%s8558_s9 + $0x28] sm:$0xf]  ;;  %v1843_v8 = vadd.f32 %v8836_v11, %v1650_v37 }
 0x218   : > { %1859 = vmatpush.bf16.msra.mxu3 %v5948_v17  ;;  %v1886_v61 = vpack.c.bf16 %v1829_v60, %v1829_v60  ;;  %v7211_v17 = vld [vmem:[%s8558_s9 + $0xd4] sm:$0xf0] }
 0x219   : > { %v5928_v18 = vor.u32 %v7211_v17, %v5927_v15  ;;  %v2025_v13 = vpack.c.bf16 %v1843_v8, %v1843_v8 }
 0x21a   : > { %v1986_v62 = vsel %vm1965_vm1, %v1886_v61, 0 }
 0x21b   : > { %1591 = vmatpush.bf16.msrb.mxu2 %v5752_v42  ;;  %v1841_v42 = vadd.f32 %v1840_v10, %v1650_v37  ;;  %v1135_v10 = vperm.slane %v8738_v33, 2  ;;  %v2123_v17 = vsel %vm1965_vm1, %v2025_v13, 0 }
 0x21c   : > { %1860 = vmatpush.bf16.msra.mxu3 %v5932_v25  ;;  %v7203_v25 = vld [vmem:[%s8558_s9 + $0x94] sm:$0xf0] }
 0x21d   : > { %v5896_v27 = vor.u32 %v7203_v25, %v5895_v24  ;;  %v2024_v49 = vpack.c.bf16 %v1841_v42, %v1841_v42 }
 0x21f   : > { %1592 = vmatpush.bf16.msrb.mxu2 %v5736_v2 }
 0x220   : > { %1861 = vmatpush.bf16.msra.mxu3 %v5916_v29  ;;  %v7199_v29 = vld [vmem:[%s8558_s9 + $0x74] sm:$0xf0] }
 0x221   : > { %v5880_v30 = vor.u32 %v7199_v29, %v5879_v28  ;;  %v1651_v28 = vperm.slane %v8817_v44, 2 }
 0x223   : > { %1593 = vmatpush.bf16.msrb.mxu2 %v5720_v6 }
 0x224   : > { %1862 = vmatpush.bf16.msra.mxu3 %v5900_v35 }
 0x227   : > { %1594 = vmatpush.bf16.msrb.mxu2 %v5704_v9 }
 0x228   : > { %1863 = vmatpush.bf16.msra.mxu3 %v5884_v43  ;;  %v5848_v43 = vor.u32 %v7191_v41, %v5847_v40  ;;  %v1394_v41 = vperm.slane %v8735_v32, 3 }
 0x22a   : > { %1595 = vmatmul.bf16.vlgmr.msrb.gmra.mxu2 %v8666_v63 }
 0x22b   : > { %1845 = vmatpush.bf16.msra.mxu2 %v5944_v16 }
 0x22c   : > { %1864 = vmatpush.bf16.msra.mxu3 %v5868_v48  ;;  %v7187_v48 = vld [vmem:[%s8558_s9 + $0x14] sm:$0xf0]  ;;  %s9602_s9 = scalar_lea.vmem [#allocation16], %s8547_s27 }
 0x22d   : > { %v5832_v52 = vor.u32 %v7187_v48, %v5831_v47 }
 0x22f   : > { %1846 = vmatpush.bf16.msra.mxu2 %v5928_v18 }
 0x230   : > { %1865 = vmatpush.bf16.msra.mxu3 %v5852_v53  ;;  %v2104_v53 = vsel %vm1965_vm1, %v2024_v49, 0 }
 0x233   : > { %1847 = vmatpush.bf16.msra.mxu2 %v5912_v21 }
 0x234   : > { %1866 = vmatpush.bf16.msra.mxu3 %v5836_v57  ;;  %v1393_v57 = vperm.slane %v8735_v32, 2 }
 0x237   : > { %1867 = vmatmul.bf16.vlgmr.msra.gmra.mxu3 %v8666_v63  ;;  %1848 = vmatpush.bf16.msra.mxu2 %v5896_v27 }
 0x238   : > { %1976 = vmatpush.bf16.msrb.mxu3 %v1967_v58 }
 0x23b   : > { %1849 = vmatpush.bf16.msra.mxu2 %v5880_v30 }
 0x23c   : > { %1995 = vmatpush.bf16.msra.mxu3 %v1986_v62 }
 0x23f   : > { %1850 = vmatpush.bf16.msra.mxu2 %v5864_v39 }
 0x243   : > { %1851 = vmatpush.bf16.msra.mxu2 %v5848_v43 }
 0x247   : > { %1852 = vmatpush.bf16.msra.mxu2 %v5832_v52  ;;  %v7223_v52 = vld [vmem:[%s8573_s14 + $0x38] sm:$0xff] }
 0x248   : > { %2267 = vmatpush.bf16.msrb.mxu1 %v7223_v52 }
 0x24a   : > { %1853 = vmatmul.bf16.vlgmr.msra.gmra.mxu2 %v8666_v63 }
 0x24b   : > { %2113 = vmatpush.bf16.msrb.mxu2 %v2104_v53  ;;  %v1652_v53 = vperm.slane %v8817_v44, 3 }
 0x257   : > { %v8888_v27 = vpop.f32.mrf.mxu3 }
 0x25f   : > { %v8892_v31 = vpop.f32.mrf.mxu3 }
 0x276   : > { %v8838_v12 = vpop.f32.mrf.mxu0 }
 0x277   : > { %v1914_v51 = vsel %vm1913_vm2, %v8838_v12, -inf }
 0x27e   : > { %v1898_v22 = vpop.f32.mrf.mxu0  ;;  %v8846_v23 = vpop.f32.mrf.mxu1 }
 0x27f   : > { %v1917_v26 = vsel %vm1913_vm2, %v8846_v23, -inf }
 0x280   : > { %1918 = vmax.xlane.f32.xlu1 %v1917_v26 }
 0x286   : > { %v1911_v34 = vpop.f32.mrf.mxu1  ;;  %v2035_v35 = vpop.f32.mrf.mxu0 }
 0x287   : > { %v2052_v38 = vsel %vm1913_vm2, %v2035_v35, -inf }
 0x288   : > { %2053 = vmax.xlane.f32.xlu0 %v2052_v38 }
 0x28d   : > { %v1338_v55 = vpop.f32.mrf.mxu2 }
 0x28e   : > { %v2037_v45 = vpop.f32.mrf.mxu0  ;;  %v8860_v46 = vpop.f32.mrf.mxu1 }
 0x28f   : > { %v2055_v50 = vsel %vm1913_vm2, %v8860_v46, -inf }
 0x290   : > { %2056 = vmax.xlane.f32.xlu1 %v2055_v50  ;;  %1915 = vmax.xlane.f32.xlu0 %v1914_v51 }
 0x295   : > { %v8870_v56 = vpop.f32.mrf.mxu2 }
 0x296   : > { %v2050_v54 = vpop.f32.mrf.mxu1  ;;  %v1341_v47 = vadd.f32 %v8870_v56, %v1135_v10 }
 0x297   : > { %v7222_v54 = vld [vmem:[%s8573_s14 + $0x30] sm:$0xff] }
 0x298   : > { %v1879_v50 = vmul.f32 0.35355338, %v1341_v47  ;;  %2268 = vmatpush.bf16.msrb.mxu1 %v7222_v54 }
 0x29a   : > { %v1610_v45 = vpop.f32.mrf.mxu3  ;;  %v2282_v32 = vpack.c.bf16 %v1879_v50, %v1879_v50 }
 0x2a2   : > { %v1612_v48 = vpop.f32.mrf.mxu3 }
 0x2a3   : > { %v1613_v49 = vadd.f32 %v1612_v48, %v1394_v41 }
 0x2a5   : > { %v2485_v51 = vpack.c.bf16 %v1613_v49, %v1613_v49 }
 0x2ad   : > { %v1596_v58 = vpop.f32.mrf.mxu2 }
 0x2ae   : > { %v1597_v59 = vadd.f32 %v1596_v58, %v1393_v57  ;;  %v7221_v58 = vld [vmem:[%s8573_s14 + $0x28] sm:$0xff] }
 0x2af   : > { %2269 = vmatpush.bf16.msrb.mxu1 %v7221_v58 }
 0x2b0   : > { %v2283_v60 = vpack.c.bf16 %v1597_v59, %v1597_v59 }
 0x2b2   : > { %2294 = vmatpush.bf16.xpose.msra.mxu2 %v2283_v60  ;;  %v7220_v60 = vld [vmem:[%s8573_s14 + $0x20] sm:$0xff] }
 0x2b3   : > { %2270 = vmatpush.bf16.msrb.mxu1 %v7220_v60 }
 0x2b5   : > { %v1598_v21 = vpop.f32.mrf.mxu2 }
 0x2cd   : > { %v1854_v29 = vpop.f32.mrf.mxu2 }
 0x2ce   : > { %v1855_v34 = vadd.f32 %v1854_v29, %v1651_v28 }
 0x2d5   : > { %v1856_v37 = vpop.f32.mrf.mxu2 }
 0x2d6   : > { %v1857_v38 = vadd.f32 %v1856_v37, %v1651_v28 }
 0x2d8   : > { %v2286_v40 = vpack.c.bf16 %v1857_v38, %v1857_v38 }
 0x2da   : > { %v2384_v43 = vsel %vm1965_vm1, %v2286_v40, 0 }
 0x2f3   : > { %v1919_v2 = vpop.xlane.xlu1 %1918 }
 0x2f4   : > { %v1921_v6 = vsub.f32 %v8846_v23, %v1919_v2  ;;  %v1599_v23 = vadd.f32 %v1598_v21, %v1393_v57 }
 0x2f6   : > { %v1924_v9 = vmul.f32 1.442695, %v1921_v6  ;;  %v2284_v26 = vpack.c.bf16 %v1599_v23, %v1599_v23 }
 0x2fb   : > { %v2054_v61 = vpop.xlane.xlu0 %2053 }
 0x2fc   : > { %v2058_v62 = vsub.f32 %v2035_v35, %v2054_v61  ;;  %v2285_v35 = vpack.c.bf16 %v1855_v34, %v1855_v34  ;;  %v7219_v61 = vld [vmem:[%s8573_s14 + $0x18] sm:$0xff] }
 0x2fd   : > { %2271 = vmatpush.bf16.msrb.mxu1 %v7219_v61 }
 0x2fe   : > { %v2060_v0 = vmul.f32 1.442695, %v2058_v62  ;;  %v2365_v36 = vsel %vm1965_vm1, %v2285_v35, 0  ;;  %v7218_v62 = vld [vmem:[%s8573_s14 + $0x10] sm:$0xff] }
 0x300   : > { %7627 = vpow2.f32 %v2060_v0  ;;  %v7217_v0 = vld [vmem:[%s8573_s14 + $0x8] sm:$0xff] }
 0x301   : > { %2272 = vmatpush.bf16.msrb.mxu1 %v7218_v62 }
 0x303   : > { %v1916_v1 = vpop.xlane.xlu0 %1915  ;;  %v2057_v22 = vpop.xlane.xlu1 %2056 }
 0x304   : > { %v1920_v4 = vsub.f32 %v8838_v12, %v1916_v1  ;;  %v1339_v12 = vadd.f32 %v1338_v55, %v1135_v10  ;;  %v2059_v24 = vsub.f32 %v8860_v46, %v2057_v22  ;;  %v1611_v46 = vadd.f32 %v1610_v45, %v1394_v41  ;;  %v1868_v55 = vpop.f32.mrf.mxu3 }
 0x305   : > { %v1869_v56 = vadd.f32 %v1868_v55, %v1652_v53  ;;  %2273 = vmatpush.bf16.msrb.mxu1 %v7217_v0  ;;  %v1136_v45 = vperm.slane %v8738_v33, 3 }
 0x306   : > { %v8874_v5 = vpop.eup %7627  ;;  %v1922_v63 = vmul.f32 1.442695, %v1920_v4  ;;  %v1875_v18 = vmul.f32 0.35355338, %v1339_v12  ;;  %v2062_v30 = vmul.f32 1.442695, %v2059_v24  ;;  %v2484_v2 = vpack.c.bf16 %v1611_v46, %v1611_v46 }
 0x307   : > { %v2098_v7 = vpack.c.bf16 %v8874_v5, %v8874_v5  ;;  %v2486_v57 = vpack.c.bf16 %v1869_v56, %v1869_v56  ;;  %v7216_v4 = vld [vmem:[%s8573_s14] sm:$0xff]  ;;  %v1353_v48 = vadd.f32 %v8888_v27, %v1136_v45  ;;  %v2064_v33 = vsel %vm1913_vm2, %v8874_v5, 0.0 }
 0x308   : > { %7629 = vpow2.f32 %v1922_v63  ;;  %v2281_v20 = vpack.c.bf16 %v1875_v18, %v1875_v18 }
 0x309   : > { %5951 = vmatmul.msk.bf16.vlgmr.msrb.gmra.mxu2 %vm1913_vm2, %v2098_v7  ;;  %7631 = vpow2.f32 %v1924_v9  ;;  %v2566_v59 = vsel %vm1965_vm1, %v2486_v57, 0  ;;  %2274 = vmatpush.bf16.msrb.mxu1 %v7216_v4  ;;  %v1876_v50 = vmul.f32 0.35355338, %v1353_v48 }
 0x30a   : > { %7633 = vpow2.f32 %v2062_v30  ;;  %2374 = vmatpush.bf16.msrb.mxu2 %v2365_v36 }
 0x30c   : > { %v1870_v63 = vpop.f32.mrf.mxu3 }
 0x30d   : > { %2495 = vmatpush.bf16.xpose.msra.mxu1 %v2484_v2 }
 0x30e   : > { %v7630_v14 = vpop.eup %7629 }
 0x30f   : > { %v1960_v15 = vpack.c.bf16 %v7630_v14, %v7630_v14  ;;  %v1926_v16 = vsel %vm1913_vm2, %v7630_v14, 0.0  ;;  %v7632_v19 = vpop.eup %7631 }
 0x310   : > { %1927 = vadd.xlane.f32.xlu2 %v1926_v16  ;;  %v1929_v11 = vsel %vm1913_vm2, %v7632_v19, 0.0  ;;  %v1961_v25 = vpack.c.bf16 %v7632_v19, %v7632_v19  ;;  %v8894_v39 = vpop.eup %7633 }
 0x311   : > { %5949 = vmatmul.msk.bf16.vlgmr.msrb.gmra.mxu3 %vm1913_vm2, %v1960_v15  ;;  %v2099_v42 = vpack.c.bf16 %v8894_v39, %v8894_v39 }
 0x312   : > { %2132 = vmatpush.bf16.msrb.mxu3 %v2123_v17 }
 0x318   : > { %1930 = vadd.xlane.f32.xlu2 %v1929_v11 }
 0x319   : > { %2295 = vmatmul.bf16.vlgmr.msra.gmra.mxu2 %v2281_v20 }
 0x31a   : > { %2508 = vmatpush.bf16.xpose.msra.mxu2 %v2485_v51 }
 0x321   : > { %5950 = vmatmul.msk.bf16.vlgmr.msra.gmra.mxu3 %vm1913_vm2, %v1961_v25 }
 0x322   : > { %2307 = vmatpush.bf16.xpose.msra.mxu3 %v2284_v26 }
 0x331   : > { %5952 = vmatmul.msk.bf16.vlgmr.msrb.gmra.mxu3 %vm1913_vm2, %v2099_v42  ;;  %v1871_v42 = vadd.f32 %v1870_v63, %v1652_v53 }
 0x332   : > { %2393 = vmatpush.bf16.msrb.mxu3 %v2384_v43 }
 0x333   : > { %v2487_v46 = vpack.c.bf16 %v1871_v42, %v1871_v42 }
 0x335   : > { %v2585_v49 = vsel %vm1965_vm1, %v2487_v46, 0 }
 0x341   : > { %2308 = vmatmul.bf16.vlgmr.msra.gmra.mxu3 %v2282_v32  ;;  %v2482_v32 = vpack.c.bf16 %v1876_v50, %v1876_v50 }
 0x342   : > { %2575 = vmatpush.bf16.msra.mxu3 %v2566_v59  ;;  %v1355_v59 = vadd.f32 %v8892_v31, %v1136_v45 }
 0x344   : > { %v1880_v61 = vmul.f32 0.35355338, %v1355_v59 }
 0x346   : > { %v2483_v62 = vpack.c.bf16 %v1880_v61, %v1880_v61  ;;  %v7239_v61 = vld [vmem:[%s8573_s14 + $0xb8] sm:$0xff] }
 0x383   : > { %v1928_v1 = vpop.xlane.xlu2 %1927 }
 0x384   : > { %7635 = vrcp.f32 %v1928_v1  ;;  %v1943_v11 = vand.u32 2147483648, %v1928_v1  ;;  %vm1937_vm4 = vweird.f32 %v1928_v1  ;;  %v1941_v23 = vand.u32 2147483647, %v1928_v1 }
 0x386   : > { %v1944_v29 = vor.u32 1.1754944e-38, %v1943_v11  ;;  %vm1942_vm9 = vcmp.eq.f32.partialorder %v1941_v23, 8.507059e+37 }
 0x38a   : > { %v7636_v8 = vpop.eup %7635 }
 0x38b   : > { %v1931_v6 = vpop.xlane.xlu2 %1930  ;;  %v1933_v9 = vmul.f32 %v7636_v8, %v1928_v1  ;;  %vm1938_vm3 = vweird.f32 %v7636_v8 }
 0x38c   : > { %v8914_v7 = vpop.f32.mrf.mxu2  ;;  %7637 = vrcp.f32 %v1931_v6  ;;  %vm1939_vm6 = vmor %vm1937_vm4, %vm1938_vm3  ;;  %v1957_v25 = vand.u32 2147483648, %v1931_v6  ;;  %vm1951_vm7 = vweird.f32 %v1931_v6  ;;  %v1955_v28 = vand.u32 2147483647, %v1931_v6 }
 0x38d   : > { %v1934_v13 = vsub.f32 1.0, %v1933_v9 }
 0x38e   : > { %v1958_v35 = vor.u32 1.1754944e-38, %v1957_v25  ;;  %vm1956_vm10 = vcmp.eq.f32.partialorder %v1955_v28, 8.507059e+37 }
 0x38f   : > { %v1935_v17 = vmul.f32 %v7636_v8, %v1934_v13  ;;  %v7231_v13 = vld [vmem:[%s8573_s14 + $0x78] sm:$0xff] }
 0x390   : > { %2205 = vmatpush.bf16.msrb.mxu0 %v7231_v13  ;;  %v7247_v13 = vld [vmem:[%s8573_s14 + $0xf8] sm:$0xff] }
 0x391   : > { %v1936_v19 = vadd.f32 %v7636_v8, %v1935_v17 }
 0x392   : > { %v7638_v10 = vpop.eup %7637 }
 0x393   : > { %v1947_v14 = vmul.f32 %v7638_v10, %v1931_v6  ;;  %vm1952_vm5 = vweird.f32 %v7638_v10  ;;  %v1940_v26 = vsel %vm1939_vm6, %v7636_v8, %v1936_v19  ;;  %v2067_v6 = vsel %vm1913_vm2, %v8894_v39, 0.0  ;;  %v7228_v39 = vld [vmem:[%s8573_s14 + $0x60] sm:$0xff] }
 0x394   : > { %v2117_v12 = vpop.f32.mrf.mxu2  ;;  %v1978_v15 = vpop.f32.mrf.mxu3  ;;  %vm1953_vm8 = vmor %vm1951_vm7, %vm1952_vm5  ;;  %v1945_v34 = vsel %vm1942_vm9, %v1944_v29, %v1940_v26 }
 0x395   : > { %v1948_v16 = vsub.f32 1.0, %v1947_v14  ;;  %v2001_v40 = vmul.f32 %v1978_v15, %v1945_v34  ;;  %v7230_v14 = vld [vmem:[%s8573_s14 + $0x70] sm:$0xff]  ;;  %v7229_v12 = vld [vmem:[%s8573_s14 + $0x68] sm:$0xff]  ;;  %v7227_v15 = vld [vmem:[%s8573_s14 + $0x58] sm:$0xff] }
 0x396   : > { %2206 = vmatpush.bf16.msrb.mxu0 %v7230_v14 }
 0x397   : > { %v1949_v18 = vmul.f32 %v7638_v10, %v1948_v16  ;;  %v7226_v16 = vld [vmem:[%s8573_s14 + $0x50] sm:$0xff] }
 0x399   : > { %v1950_v24 = vadd.f32 %v7638_v10, %v1949_v18  ;;  %v7225_v18 = vld [vmem:[%s8573_s14 + $0x48] sm:$0xff] }
 0x39a   : > { %2207 = vmatpush.bf16.msrb.mxu0 %v7229_v12  ;;  %v7246_v12 = vld [vmem:[%s8573_s14 + $0xf0] sm:$0xff] }
 0x39b   : > { %v1954_v30 = vsel %vm1953_vm8, %v7638_v10, %v1950_v24 }
 0x39c   : > { %v2296_v20 = vpop.f32.mrf.mxu2  ;;  %v1980_v21 = vpop.f32.mrf.mxu3  ;;  %v1959_v37 = vsel %vm1956_vm10, %v1958_v35, %v1954_v30 }
 0x39d   : > { %v2313_v22 = vsel %vm1913_vm2, %v2296_v20, -inf }
 0x39e   : > { %2314 = vmax.xlane.f32.xlu0 %v2313_v22  ;;  %2208 = vmatpush.bf16.msrb.mxu0 %v7228_v39 }
 0x3a2   : > { %2209 = vmatpush.bf16.msrb.mxu0 %v7227_v15 }
 0x3a4   : > { %v2298_v36 = vpop.f32.mrf.mxu2  ;;  %v1997_v38 = vpop.f32.mrf.mxu3 }
 0x3a5   : > { %v2002_v41 = vmul.f32 %v1997_v38, %v1959_v37 }
 0x3a6   : > { %2210 = vmatpush.bf16.msrb.mxu0 %v7226_v16 }
 0x3a7   : > { %v2003_v43 = vpack.c.bf16 %v2002_v41, %v2001_v40 }
 0x3a9   : > { %2275 = vmatmul.bf16.vlgmr.msrb.gmra.mxu1 %v2003_v43 }
 0x3aa   : > { %2594 = vmatpush.bf16.msrb.mxu1 %v2585_v49  ;;  %2211 = vmatpush.bf16.msrb.mxu0 %v7225_v18 }
 0x3ac   : > { %v1999_v47 = vpop.f32.mrf.mxu3 }
 0x3b4   : > { %v8922_v51 = vpop.f32.mrf.mxu3 }
 0x3b9   : > { %2496 = vmatmul.bf16.vlgmr.msra.gmra.mxu1 %v2482_v32 }
 0x3bc   : > { %v2136_v52 = vpop.f32.mrf.mxu3 }
 0x3c4   : > { %v2309_v54 = vpop.f32.mrf.mxu3 }
 0x3c5   : > { %v2316_v44 = vsel %vm1913_vm2, %v2309_v54, -inf }
 0x3c6   : > { %2317 = vmax.xlane.f32.xlu1 %v2316_v44 }
 0x3cc   : > { %v2311_v53 = vpop.f32.mrf.mxu3 }
 0x3ce   : > { %2065 = vadd.xlane.f32.xlu1 %v2064_v33 }
 0x411   : > { %v2315_v55 = vpop.xlane.xlu0 %2314 }
 0x412   : > { %v2319_v27 = vsub.f32 %v2296_v20, %v2315_v55  ;;  %v7224_v20 = vld [vmem:[%s8573_s14 + $0x40] sm:$0xff] }
 0x413   : > { %2212 = vmatpush.bf16.msrb.mxu0 %v7224_v20 }
 0x414   : > { %v2321_v56 = vmul.f32 1.442695, %v2319_v27 }
 0x416   : > { %7639 = vpow2.f32 %v2321_v56 }
 0x417   : > { %2466 = vmatpush.bf16.msra.mxu0 %v7239_v61  ;;  %v7241_v61 = vld [vmem:[%s8573_s14 + $0xc8] sm:$0xff] }
 0x41c   : > { %v7640_v57 = vpop.eup %7639 }
 0x41d   : > { %v2359_v58 = vpack.c.bf16 %v7640_v57, %v7640_v57  ;;  %v2325_v10 = vsel %vm1913_vm2, %v7640_v57, 0.0 }
 0x41f   : > { %6017 = vmatmul.msk.bf16.vlgmr.msrb.gmra.mxu2 %vm1913_vm2, %v2359_v58 }
 0x420   : > { %2667 = vmatpush.bf16.msrb.mxu2 %v7247_v13 }
 0x424   : > { %2668 = vmatpush.bf16.msrb.mxu2 %v7246_v12 }
 0x426   : > { %v8929_v60 = vpop.f32.mrf.mxu1 }
 0x42e   : > { %v8931_v0 = vpop.f32.mrf.mxu1 }
 0x42f   : > { %2509 = vmatmul.bf16.vlgmr.msra.gmra.mxu2 %v2483_v62  ;;  %v7238_v62 = vld [vmem:[%s8573_s14 + $0xb0] sm:$0xff] }
 0x430   : > { %2467 = vmatpush.bf16.msra.mxu0 %v7238_v62  ;;  %v7240_v62 = vld [vmem:[%s8573_s14 + $0xc0] sm:$0xff] }
 0x436   : > { %v2497_v5 = vpop.f32.mrf.mxu1 }
 0x437   : > { %v2514_v1 = vsel %vm1913_vm2, %v2497_v5, -inf }
 0x438   : > { %2515 = vmax.xlane.f32.xlu2 %v2514_v1  ;;  %v7236_v1 = vld [vmem:[%s8573_s14 + $0xa0] sm:$0xff] }
 0x439   : > { %v2318_v2 = vpop.xlane.xlu1 %2317 }
 0x43a   : > { %v2320_v4 = vsub.f32 %v2309_v54, %v2318_v2  ;;  %v7235_v2 = vld [vmem:[%s8573_s14 + $0x98] sm:$0xff] }
 0x43c   : > { %v2323_v63 = vmul.f32 1.442695, %v2320_v4 }
 0x43e   : > { %7641 = vpow2.f32 %v2323_v63  ;;  %v2499_v31 = vpop.f32.mrf.mxu1 }
 0x440   : > { %2068 = vadd.xlane.f32.xlu2 %v2067_v6  ;;  %v7232_v6 = vld [vmem:[%s8573_s14 + $0x80] sm:$0xff] }
 0x441   : > { %v2066_v19 = vpop.xlane.xlu1 %2065 }
 0x442   : > { %7643 = vrcp.f32 %v2066_v19  ;;  %v2081_v43 = vand.u32 2147483648, %v2066_v19  ;;  %vm2075_vm12 = vweird.f32 %v2066_v19  ;;  %v2079_v45 = vand.u32 2147483647, %v2066_v19 }
 0x444   : > { %v8936_v8 = vpop.eup %7641  ;;  %v2082_v32 = vor.u32 1.1754944e-38, %v2081_v43  ;;  %vm2080_vm15 = vcmp.eq.f32.partialorder %v2079_v45, 8.507059e+37 }
 0x445   : > { %v2360_v9 = vpack.c.bf16 %v8936_v8, %v8936_v8  ;;  %v2328_v44 = vsel %vm1913_vm2, %v8936_v8, 0.0 }
 0x447   : > { %6018 = vmatmul.msk.bf16.vlgmr.msrb.gmra.mxu3 %vm1913_vm2, %v2360_v9 }
 0x448   : > { %2326 = vadd.xlane.f32.xlu2 %v2325_v10  ;;  %v7644_v22 = vpop.eup %7643 }
 0x449   : > { %v2071_v25 = vmul.f32 %v7644_v22, %v2066_v19  ;;  %vm2076_vm11 = vweird.f32 %v7644_v22  ;;  %v7245_v19 = vld [vmem:[%s8573_s14 + $0xe8] sm:$0xff] }
 0x44a   : > { %vm2077_vm13 = vmor %vm2075_vm12, %vm2076_vm11  ;;  %2669 = vmatpush.bf16.msrb.mxu2 %v7245_v19 }
 0x44b   : > { %v2072_v29 = vsub.f32 1.0, %v2071_v25 }
 0x44d   : > { %v2073_v35 = vmul.f32 %v7644_v22, %v2072_v29 }
 0x44f   : > { %v2074_v41 = vadd.f32 %v7644_v22, %v2073_v35 }
 0x451   : > { %v2078_v48 = vsel %vm2077_vm13, %v7644_v22, %v2074_v41 }
 0x452   : > { %v2083_v53 = vsel %vm2080_vm15, %v2082_v32, %v2078_v48 }
 0x453   : > { %v2138_v27 = vmul.f32 %v8914_v7, %v2083_v53  ;;  %v7234_v7 = vld [vmem:[%s8573_s14 + $0x90] sm:$0xff] }
 0x4a2   : > { %v8948_v17 = vpop.f32.mrf.mxu2 }
 0x4aa   : > { %v2378_v11 = vpop.f32.mrf.mxu2 }
 0x4ab   : > { %v2516_v21 = vpop.xlane.xlu2 %2515 }
 0x4ac   : > { %v2520_v23 = vsub.f32 %v2497_v5, %v2516_v21  ;;  %v7237_v5 = vld [vmem:[%s8573_s14 + $0xa8] sm:$0xff] }
 0x4ad   : > { %2468 = vmatpush.bf16.msra.mxu0 %v7237_v5 }
 0x4ae   : > { %v2522_v24 = vmul.f32 1.442695, %v2520_v23 }
 0x4b0   : > { %7645 = vpow2.f32 %v2522_v24 }
 0x4b1   : > { %2469 = vmatpush.bf16.msra.mxu0 %v7236_v1 }
 0x4b2   : > { %v8952_v26 = vpop.f32.mrf.mxu2 }
 0x4b3   : > { %v2517_v28 = vsel %vm1913_vm2, %v8952_v26, -inf  ;;  %v2069_v30 = vpop.xlane.xlu2 %2068 }
 0x4b4   : > { %2518 = vmax.xlane.f32.xlu0 %v2517_v28  ;;  %7647 = vrcp.f32 %v2069_v30  ;;  %v2095_v47 = vand.u32 2147483648, %v2069_v30  ;;  %v2093_v50 = vand.u32 2147483647, %v2069_v30  ;;  %vm2089_vm0 = vweird.f32 %v2069_v30 }
 0x4b5   : > { %2470 = vmatpush.bf16.msra.mxu0 %v7235_v2 }
 0x4b6   : > { %v7646_v34 = vpop.eup %7645  ;;  %v2096_v54 = vor.u32 1.1754944e-38, %v2095_v47  ;;  %vm2094_vm3 = vcmp.eq.f32.partialorder %v2093_v50, 8.507059e+37 }
 0x4b7   : > { %v2560_v36 = vpack.c.bf16 %v7646_v34, %v7646_v34  ;;  %v2526_v40 = vsel %vm1913_vm2, %v7646_v34, 0.0 }
 0x4b9   : > { %6051 = vmatmul.msk.bf16.vlgmr.msra.gmra.mxu3 %vm1913_vm2, %v2560_v36  ;;  %2471 = vmatpush.bf16.msra.mxu0 %v7234_v7 }
 0x4ba   : > { %v2512_v37 = vpop.f32.mrf.mxu2  ;;  %v7648_v38 = vpop.eup %7647 }
 0x4bb   : > { %v2085_v42 = vmul.f32 %v7648_v38, %v2069_v30  ;;  %vm2090_vm14 = vweird.f32 %v7648_v38  ;;  %v2327_v4 = vpop.xlane.xlu2 %2326 }
 0x4bc   : > { %2527 = vadd.xlane.f32.xlu0 %v2526_v40  ;;  %vm2091_vm1 = vmor %vm2089_vm0, %vm2090_vm14  ;;  %7649 = vrcp.f32 %v2327_v4  ;;  %vm2336_vm8 = vweird.f32 %v2327_v4  ;;  %v2340_v41 = vand.u32 2147483647, %v2327_v4 }
 0x4bd   : > { %v2086_v46 = vsub.f32 1.0, %v2085_v42 }
 0x4be   : > { %vm2341_vm11 = vcmp.eq.f32.partialorder %v2340_v41, 8.507059e+37  ;;  %v6543_v41 = vld [vmem:[%s8582_s10 + $0x388] sm:$0xf] }
 0x4bf   : > { %v2087_v49 = vmul.f32 %v7648_v38, %v2086_v46 }
 0x4c1   : > { %v2088_v52 = vadd.f32 %v7648_v38, %v2087_v49 }
 0x4c2   : > { %v7650_v10 = vpop.eup %7649 }
 0x4c3   : > { %v2092_v33 = vsel %vm2091_vm1, %v7648_v38, %v2088_v52  ;;  %v2332_v39 = vmul.f32 %v7650_v10, %v2327_v4  ;;  %vm2337_vm6 = vweird.f32 %v7650_v10  ;;  %v2342_v38 = vand.u32 2147483648, %v2327_v4 }
 0x4c4   : > { %2329 = vadd.xlane.f32.xlu0 %v2328_v44  ;;  %v2097_v55 = vsel %vm2094_vm3, %v2096_v54, %v2092_v33  ;;  %vm2338_vm9 = vmor %vm2336_vm8, %vm2337_vm6 }
 0x4c5   : > { %v2139_v56 = vmul.f32 %v8922_v51, %v2097_v55  ;;  %v7233_v51 = vld [vmem:[%s8573_s14 + $0x88] sm:$0xff]  ;;  %v2333_v20 = vsub.f32 1.0, %v2332_v39  ;;  %v2343_v49 = vor.u32 1.1754944e-38, %v2342_v38 }
 0x4c6   : > { %2472 = vmatpush.bf16.msra.mxu0 %v7233_v51 }
 0x4c7   : > { %v2140_v57 = vpack.c.bf16 %v2139_v56, %v2138_v27  ;;  %v2334_v24 = vmul.f32 %v7650_v10, %v2333_v20  ;;  %v7244_v56 = vld [vmem:[%s8573_s14 + $0xe0] sm:$0xff] }
 0x4c8   : > { %2670 = vmatpush.bf16.msrb.mxu2 %v7244_v56  ;;  %v6481_v56 = vld [vmem:[%s8582_s10 + $0x348] sm:$0xf0] }
 0x4c9   : > { %2213 = vmatmul.bf16.vlgmr.msrb.gmra.mxu0 %v2140_v57  ;;  %v2335_v35 = vadd.f32 %v7650_v10, %v2334_v24  ;;  %v7243_v57 = vld [vmem:[%s8573_s14 + $0xd8] sm:$0xff] }
 0x4ca   : > { %v8962_v58 = vpop.f32.mrf.mxu3  ;;  %2473 = vmatpush.bf16.msra.mxu0 %v7232_v6 }
 0x4cb   : > { %v2339_v46 = vsel %vm2338_vm9, %v7650_v10, %v2335_v35  ;;  %v6535_v35 = vld [vmem:[%s8582_s10 + $0x380] sm:$0xf] }
 0x4cc   : > { %v2344_v54 = vsel %vm2341_vm11, %v2343_v49, %v2339_v46  ;;  %2671 = vmatpush.bf16.msrb.mxu2 %v7243_v57  ;;  %v7361_v46 = vld [vmem:[%s8582_s10 + $0x38c] sm:$0xf]  ;;  %v6407_v57 = vld [vmem:[%s8582_s10 + $0x280] sm:$0xf] }
 0x4cd   : > { %v2399_v33 = vmul.f32 %v8948_v17, %v2344_v54 }
 0x4d2   : > { %v2397_v59 = vpop.f32.mrf.mxu3 }
 0x4d3   : > { %v7242_v59 = vld [vmem:[%s8573_s14 + $0xd0] sm:$0xff] }
 0x4d4   : > { %2672 = vmatpush.bf16.msrb.mxu2 %v7242_v59  ;;  %v7336_v59 = vld [vmem:[%s8582_s10 + $0x2bc] sm:$0xf0] }
 0x4d8   : > { %2673 = vmatpush.bf16.msrb.mxu2 %v7241_v61 }
 0x4dc   : > { %2674 = vmatpush.bf16.msrb.mxu2 %v7240_v62  ;;  %v7328_v62 = vld [vmem:[%s8582_s10 + $0x284] sm:$0xf] }
 0x527   : > { %v2519_v63 = vpop.xlane.xlu0 %2518 }
 0x528   : > { %v2521_v31 = vsub.f32 %v8952_v26, %v2519_v63 }
 0x52a   : > { %v2524_v8 = vmul.f32 1.442695, %v2521_v31 }
 0x52c   : > { %7651 = vpow2.f32 %v2524_v8 }
 0x52f   : > { %v2528_v9 = vpop.xlane.xlu0 %2527 }
 0x530   : > { %7653 = vrcp.f32 %v2528_v9  ;;  %v2543_v23 = vand.u32 2147483648, %v2528_v9  ;;  %v2541_v26 = vand.u32 2147483647, %v2528_v9  ;;  %vm2537_vm5 = vweird.f32 %v2528_v9 }
 0x532   : > { %v7652_v14 = vpop.eup %7651  ;;  %v2544_v34 = vor.u32 1.1754944e-38, %v2543_v23  ;;  %vm2542_vm7 = vcmp.eq.f32.partialorder %v2541_v26, 8.507059e+37  ;;  %v7667_v23 = vld [vmem:[#allocation22] sm:$0xff] }
 0x533   : > { %v2561_v15 = vpack.c.bf16 %v7652_v14, %v7652_v14  ;;  %v2529_v16 = vsel %vm1913_vm2, %v7652_v14, 0.0 }
 0x534   : > { %2530 = vadd.xlane.f32.xlu1 %v2529_v16 }
 0x535   : > { %6052 = vmatmul.msk.bf16.vlgmr.msrb.gmra.mxu1 %vm1913_vm2, %v2561_v15 }
 0x536   : > { %v7654_v18 = vpop.eup %7653 }
 0x537   : > { %v2533_v11 = vmul.f32 %v7654_v18, %v2528_v9  ;;  %v2330_v21 = vpop.xlane.xlu0 %2329  ;;  %vm2538_vm4 = vweird.f32 %v7654_v18 }
 0x538   : > { %7655 = vrcp.f32 %v2330_v21  ;;  %vm2539_vm2 = vmor %vm2537_vm5, %vm2538_vm4  ;;  %v2356_v45 = vand.u32 2147483648, %v2330_v21  ;;  %v2354_v48 = vand.u32 2147483647, %v2330_v21  ;;  %vm2350_vm12 = vweird.f32 %v2330_v21 }
 0x539   : > { %v2534_v22 = vsub.f32 1.0, %v2533_v11 }
 0x53a   : > { %v2357_v52 = vor.u32 1.1754944e-38, %v2356_v45  ;;  %vm2355_vm14 = vcmp.eq.f32.partialorder %v2354_v48, 8.507059e+37  ;;  %v6471_v48 = vld [vmem:[%s8582_s10 + $0x300] sm:$0xf] }
 0x53b   : > { %v2535_v25 = vmul.f32 %v7654_v18, %v2534_v22 }
 0x53c   : > { %v2577_v29 = vpop.f32.mrf.mxu3 }
 0x53d   : > { %v2536_v28 = vadd.f32 %v7654_v18, %v2535_v25 }
 0x53e   : > { %v7656_v30 = vpop.eup %7655 }
 0x53f   : > { %v2346_v36 = vmul.f32 %v7656_v30, %v2330_v21  ;;  %v2540_v37 = vsel %vm2539_vm2, %v7654_v18, %v2536_v28  ;;  %vm2351_vm10 = vweird.f32 %v7656_v30  ;;  %v7621_v18 = vld [vmem:[%s9600_s20] ss:$0 sm:$0xff] }
 0x540   : > { %v2545_v40 = vsel %vm2542_vm7, %v2544_v34, %v2540_v37  ;;  %vm2352_vm13 = vmor %vm2350_vm12, %vm2351_vm10  ;;  %v7360_v37 = vld [vmem:[%s8582_s10 + $0x384] sm:$0xf] }
 0x541   : > { %v2347_v42 = vsub.f32 1.0, %v2346_v36  ;;  %v2600_v43 = vmul.f32 %v2577_v29, %v2545_v40  ;;  %v7368_v36 = vld [vmem:[%s8582_s10 + $0x3bc] sm:$0xf0]  ;;  %v6537_v40 = vld [vmem:[%s8582_s10 + $0x3c0] sm:$0xf0] }
 0x542   : > { %v6536_v38 = vor.u32 %v7368_v36, %v6535_v35 }
 0x543   : > { %v2348_v47 = vmul.f32 %v7656_v30, %v2347_v42  ;;  %v7369_v42 = vld [vmem:[%s8582_s10 + $0x3c4] sm:$0xf0] }
 0x544   : > { %v2579_v32 = vpop.f32.mrf.mxu3  ;;  %v6544_v45 = vor.u32 %v7369_v42, %v6543_v41  ;;  %3552 = vmatpush.bf16.msrb.mxu3 %v6536_v38 }
 0x545   : > { %v2349_v50 = vadd.f32 %v7656_v30, %v2348_v47  ;;  %v6545_v47 = vld [vmem:[%s8582_s10 + $0x3c8] sm:$0xf0]  ;;  %v7344_v32 = vld [vmem:[%s8582_s10 + $0x304] sm:$0xf] }
 0x546   : > { %v2214_v14 = vpop.f32.mrf.mxu0  ;;  %v6548_v49 = vor.u32 %v7361_v46, %v6545_v47  ;;  %3580 = vmatpush.bf16.msra.mxu1 %v6544_v45  ;;  %v6215_v45 = vld [vmem:[%s8582_s10 + $0x100] sm:$0xf]  ;;  %v7280_v47 = vld [vmem:[%s8582_s10 + $0x104] sm:$0xf] }
 0x547   : > { %v2353_v44 = vsel %vm2352_vm13, %v7656_v30, %v2349_v50  ;;  %v2277_v15 = vadd.f32 %v8929_v60, %v2214_v14  ;;  %v7668_v30 = vld [vmem:[#allocation22 + $0x8] sm:$0xff]  ;;  %v7352_v50 = vld [vmem:[%s8582_s10 + $0x33c] sm:$0xf0] }
 0x548   : > { %v2358_v53 = vsel %vm2355_vm14, %v2357_v52, %v2353_v44  ;;  %v6473_v52 = vld [vmem:[%s8582_s10 + $0x340] sm:$0xf0]  ;;  %v6472_v54 = vor.u32 %v7352_v50, %v6471_v48  ;;  %3594 = vmatpush.bf16.msra.mxu2 %v6548_v49  ;;  %v7313_v14 = vld [vmem:[%s8582_s10 + $0x20c] sm:$0xf]  ;;  %v7288_v46 = vld [vmem:[%s8582_s10 + $0x13c] sm:$0xf0] }
 0x549   : > { %v2400_v55 = vmul.f32 %v8962_v58, %v2358_v53  ;;  %v6476_v44 = vor.u32 %v7344_v32, %v6473_v52  ;;  %v6479_v53 = vld [vmem:[%s8582_s10 + $0x308] sm:$0xf]  ;;  %v6216_v48 = vor.u32 %v7288_v46, %v6215_v45  ;;  %v6217_v49 = vld [vmem:[%s8582_s10 + $0x140] sm:$0xf0]  ;;  %v7338_v45 = vld [vmem:[%s8582_s10 + $0x2cc] sm:$0xf0] }
 0x54a   : > { %3553 = vmatpush.bf16.msrb.mxu3 %v6472_v54  ;;  %v6223_v50 = vld [vmem:[%s8582_s10 + $0x108] sm:$0xf]  ;;  %v7281_v54 = vld [vmem:[%s8582_s10 + $0x10c] sm:$0xf]  ;;  %v7330_v46 = vld [vmem:[%s8582_s10 + $0x294] sm:$0xf] }
 0x54b   : > { %v2401_v27 = vpack.c.bf16 %v2400_v55, %v2399_v33  ;;  %v7353_v33 = vld [vmem:[%s8582_s10 + $0x344] sm:$0xf0]  ;;  %v7345_v55 = vld [vmem:[%s8582_s10 + $0x30c] sm:$0xf] }
 0x54c   : > { %v6484_v61 = vor.u32 %v7345_v55, %v6481_v56  ;;  %v7289_v32 = vld [vmem:[%s8582_s10 + $0x144] sm:$0xf0]  ;;  %v7272_v55 = vld [vmem:[%s8582_s10 + $0xbc] sm:$0xf0] }
 0x54d   : > { %2474 = vmatmul.bf16.vlgmr.msra.gmra.mxu0 %v2401_v27  ;;  %v6480_v27 = vor.u32 %v7353_v33, %v6479_v53  ;;  %v6224_v52 = vor.u32 %v7289_v32, %v6223_v50  ;;  %v6151_v33 = vld [vmem:[%s8582_s10 + $0x80] sm:$0xf]  ;;  %v7339_v50 = vld [vmem:[%s8582_s10 + $0x2d4] sm:$0xf0] }
 0x54e   : > { %v2216_v12 = vpop.f32.mrf.mxu0  ;;  %3595 = vmatpush.bf16.msra.mxu2 %v6484_v61  ;;  %v6152_v56 = vor.u32 %v7272_v55, %v6151_v33  ;;  %v7273_v61 = vld [vmem:[%s8582_s10 + $0xc4] sm:$0xf0]  ;;  %v7322_v33 = vld [vmem:[%s8582_s10 + $0x24c] sm:$0xf0]  ;;  %v7314_v55 = vld [vmem:[%s8582_s10 + $0x214] sm:$0xf] }
 0x54f   : > { %v2279_v22 = vadd.f32 %v8931_v0, %v2216_v12  ;;  %3581 = vmatpush.bf16.msra.mxu1 %v6480_v27  ;;  %v6353_v12 = vld [vmem:[%s8582_s10 + $0x248] sm:$0xf0]  ;;  %v7264_v27 = vld [vmem:[%s8582_s10 + $0x84] sm:$0xf] }
 0x5a7   : > { %v2531_v5 = vpop.xlane.xlu1 %2530 }
 0x5a8   : > { %7657 = vrcp.f32 %v2531_v5  ;;  %v2557_v17 = vand.u32 2147483648, %v2531_v5  ;;  %v2555_v4 = vand.u32 2147483647, %v2531_v5  ;;  %vm2551_vm0 = vweird.f32 %v2531_v5 }
 0x5aa   : > { %v2558_v31 = vor.u32 1.1754944e-38, %v2557_v17  ;;  %vm2556_vm3 = vcmp.eq.f32.partialorder %v2555_v4, 8.507059e+37  ;;  %v7329_v17 = vld [vmem:[%s8582_s10 + $0x28c] sm:$0xf] }
 0x5ae   : > { %v7658_v1 = vpop.eup %7657 }
 0x5af   : > { %v2547_v2 = vmul.f32 %v7658_v1, %v2531_v5  ;;  %vm2552_vm15 = vweird.f32 %v7658_v1  ;;  %v6409_v5 = vld [vmem:[%s8582_s10 + $0x2c0] sm:$0xf0] }
 0x5b0   : > { %vm2553_vm1 = vmor %vm2551_vm0, %vm2552_vm15 }
 0x5b1   : > { %v2548_v7 = vsub.f32 1.0, %v2547_v2  ;;  %v6408_v2 = vor.u32 %v7336_v59, %v6407_v57  ;;  %v6153_v57 = vld [vmem:[%s8582_s10 + $0xc0] sm:$0xf0]  ;;  %v6159_v59 = vld [vmem:[%s8582_s10 + $0x88] sm:$0xf] }
 0x5b2   : > { %v2596_v51 = vpop.f32.mrf.mxu1 }
 0x5b3   : > { %v2549_v58 = vmul.f32 %v7658_v1, %v2548_v7  ;;  %v7337_v7 = vld [vmem:[%s8582_s10 + $0x2c4] sm:$0xf0]  ;;  %3554 = vmatpush.bf16.msrb.mxu3 %v6408_v2  ;;  %v6161_v2 = vld [vmem:[%s8582_s10 + $0xc8] sm:$0xf0] }
 0x5b5   : > { %v2550_v63 = vadd.f32 %v7658_v1, %v2549_v58  ;;  %v6412_v58 = vor.u32 %v7328_v62, %v6409_v5  ;;  %v6156_v62 = vor.u32 %v7264_v27, %v6153_v57  ;;  %v6160_v5 = vor.u32 %v7273_v61, %v6159_v59  ;;  %v6367_v57 = vld [vmem:[%s8582_s10 + $0x218] sm:$0xf] }
 0x5b6   : > { %v7323_v59 = vld [vmem:[%s8582_s10 + $0x254] sm:$0xf0] }
 0x5b7   : > { %v2554_v6 = vsel %vm2553_vm1, %v7658_v1, %v2550_v63  ;;  %v6415_v1 = vld [vmem:[%s8582_s10 + $0x288] sm:$0xf]  ;;  %v6343_v63 = vld [vmem:[%s8582_s10 + $0x200] sm:$0xf] }
 0x5b8   : > { %v2559_v8 = vsel %vm2556_vm3, %v2558_v31, %v2554_v6  ;;  %v6416_v4 = vor.u32 %v7337_v7, %v6415_v1  ;;  %v7320_v31 = vld [vmem:[%s8582_s10 + $0x23c] sm:$0xf0]  ;;  %v7312_v6 = vld [vmem:[%s8582_s10 + $0x204] sm:$0xf]  ;;  %v7265_v1 = vld [vmem:[%s8582_s10 + $0x8c] sm:$0xf] }
 0x5b9   : > { %v2601_v9 = vmul.f32 %v2596_v51, %v2559_v8  ;;  %v6417_v51 = vld [vmem:[%s8582_s10 + $0x2c8] sm:$0xf0]  ;;  %v6164_v7 = vor.u32 %v7265_v1, %v6161_v2  ;;  %v6369_v1 = vld [vmem:[%s8582_s10 + $0x258] sm:$0xf0] }
 0x5ba   : > { %v2598_v10 = vpop.f32.mrf.mxu1  ;;  %v6420_v8 = vor.u32 %v7329_v17, %v6417_v51  ;;  %3582 = vmatpush.bf16.msra.mxu1 %v6416_v4  ;;  %v6087_v17 = vld [vmem:[%s8582_s10] sm:$0xf] }
 0x5bb   : > { %v2602_v13 = vpack.c.bf16 %v2601_v9, %v2600_v43  ;;  %v6540_v43 = vor.u32 %v7360_v37, %v6537_v40  ;;  %v6345_v9 = vld [vmem:[%s8582_s10 + $0x240] sm:$0xf0]  ;;  %v6351_v10 = vld [vmem:[%s8582_s10 + $0x208] sm:$0xf]  ;;  %v7256_v51 = vld [vmem:[%s8582_s10 + $0x3c] sm:$0xf0] }
 0x5bc   : > { %3596 = vmatpush.bf16.msra.mxu2 %v6420_v8  ;;  %v6088_v4 = vor.u32 %v7256_v51, %v6087_v17  ;;  %v7306_v17 = vld [vmem:[%s8582_s10 + $0x1cc] sm:$0xf0]  ;;  %v7298_v51 = vld [vmem:[%s8582_s10 + $0x194] sm:$0xf] }
 0x5bd   : > { %2675 = vmatmul.bf16.vlgmr.msrb.gmra.mxu2 %v2602_v13  ;;  %3566 = vmatpush.bf16.msrb.mxu0 %v6540_v43  ;;  %v7321_v13 = vld [vmem:[%s8582_s10 + $0x244] sm:$0xf0] }
 0x5c1   : > { %3567 = vmatpush.bf16.msrb.mxu0 %v6476_v44  ;;  %v6225_v44 = vld [vmem:[%s8582_s10 + $0x148] sm:$0xf0] }
 0x5c2   : > { %v6228_v53 = vor.u32 %v7281_v54, %v6225_v44  ;;  %v6433_v54 = vld [vmem:[%s8582_s10 + $0x2d8] sm:$0xf0] }
 0x5c5   : > { %3568 = vmatpush.bf16.msrb.mxu0 %v6412_v58  ;;  %v7248_v58 = vld [vmem:[%s8582_s10 + $0x4] sm:$0xf] }
 0x5ca   : > { %v2475_v39 = vpop.f32.mrf.mxu0 }
 0x5cb   : > { %v2480_v16 = vadd.f32 %v2475_v39, %v2277_v15  ;;  %v6344_v39 = vor.u32 %v7320_v31, %v6343_v63  ;;  %v6348_v15 = vor.u32 %v7312_v6, %v6345_v9  ;;  %v6089_v63 = vld [vmem:[%s8582_s10 + $0x40] sm:$0xf0]  ;;  %v6095_v31 = vld [vmem:[%s8582_s10 + $0x8] sm:$0xf] }
 0x5cc   : > { %v7257_v6 = vld [vmem:[%s8582_s10 + $0x44] sm:$0xf0]  ;;  %v6092_v8 = vor.u32 %v7248_v58, %v6089_v63  ;;  %v6303_v63 = vld [vmem:[%s8582_s10 + $0x198] sm:$0xf] }
 0x5cd   : > { %3555 = vmatpush.bf16.msrb.mxu3 %v6344_v39  ;;  %3569 = vmatpush.bf16.msrb.mxu0 %v6348_v15  ;;  %v6096_v9 = vor.u32 %v7257_v6, %v6095_v31  ;;  %v7370_v39 = vld [vmem:[%s8582_s10 + $0x3cc] sm:$0xf0]  ;;  %v7362_v15 = vld [vmem:[%s8582_s10 + $0x394] sm:$0xf]  ;;  %v7307_v31 = vld [vmem:[%s8582_s10 + $0x1d4] sm:$0xf0] }
 0x5d2   : > { %v2477_v21 = vpop.f32.mrf.mxu0 }
 0x5d3   : > { %v2481_v60 = vadd.f32 %v2477_v21, %v2279_v22  ;;  %v6281_v21 = vld [vmem:[%s8582_s10 + $0x1c0] sm:$0xf0]  ;;  %v6287_v22 = vld [vmem:[%s8582_s10 + $0x188] sm:$0xf] }
 0x640   : > { %v2676_v19 = vpop.f32.mrf.mxu2 }
 0x641   : > { %v2681_v20 = vadd.f32 %v2676_v19, %v2480_v16  ;;  %v6352_v16 = vor.u32 %v7321_v13, %v6351_v10  ;;  %v7304_v19 = vld [vmem:[%s8582_s10 + $0x1bc] sm:$0xf0]  ;;  %v7249_v10 = vld [vmem:[%s8582_s10 + $0xc] sm:$0xf] }
 0x642   : > { %v6097_v13 = vld [vmem:[%s8582_s10 + $0x48] sm:$0xf0] }
 0x643   : > { %v2687_v11 = vadd.f32 %v7621_v18, %v2681_v20  ;;  %v7296_v20 = vld [vmem:[%s8582_s10 + $0x184] sm:$0xf]  ;;  %3583 = vmatpush.bf16.msra.mxu1 %v6352_v16  ;;  %v6553_v16 = vld [vmem:[%s8582_s10 + $0x3d0] sm:$0xf0] }
 0x645   : > { %v8992_v24 = vadd.f32 %v7667_v23, %v2687_v11  ;;  %v6356_v11 = vor.u32 %v7313_v14, %v6353_v12  ;;  %v7305_v23 = vld [vmem:[%s8582_s10 + $0x1c4] sm:$0xf0]  ;;  %v6551_v14 = vld [vmem:[%s8582_s10 + $0x390] sm:$0xf]  ;;  %v6100_v12 = vor.u32 %v7249_v10, %v6097_v13  ;;  %v6305_v10 = vld [vmem:[%s8582_s10 + $0x1d8] sm:$0xf0] }
 0x647   : > { %v2693_v25 = vmul.f32 %v8611_v3, %v8992_v24  ;;  %3597 = vmatpush.bf16.msra.mxu2 %v6356_v11  ;;  %v7371_v11 = vld [vmem:[%s8582_s10 + $0x3d4] sm:$0xf0] }
 0x648   : > { %v2678_v26 = vpop.f32.mrf.mxu2 }
 0x649   : > { %v2682_v28 = vadd.f32 %v2678_v26, %v2481_v60  ;;  %2695 = vadd.xlane.f32.xlu1 %v2693_v25  ;;  %v7297_v60 = vld [vmem:[%s8582_s10 + $0x18c] sm:$0xf] }
 0x64a   : > { %v6289_v25 = vld [vmem:[%s8582_s10 + $0x1c8] sm:$0xf0] }
 0x64b   : > { %v2688_v29 = vadd.f32 %v7621_v18, %v2682_v28  ;;  %v6279_v18 = vld [vmem:[%s8582_s10 + $0x180] sm:$0xf]  ;;  %v6292_v35 = vor.u32 %v7297_v60, %v6289_v25  ;;  %v6487_v60 = vld [vmem:[%s8582_s10 + $0x310] sm:$0xf] }
 0x64c   : > { %v6280_v28 = vor.u32 %v7304_v19, %v6279_v18  ;;  %v6552_v18 = vor.u32 %v7370_v39, %v6551_v14  ;;  %v6556_v19 = vor.u32 %v7362_v15, %v6553_v16  ;;  %v7354_v25 = vld [vmem:[%s8582_s10 + $0x34c] sm:$0xf0]  ;;  %v7282_v39 = vld [vmem:[%s8582_s10 + $0x114] sm:$0xf] }
 0x64d   : > { %v8996_v34 = vadd.f32 %v7668_v30, %v2688_v29  ;;  %v6284_v30 = vor.u32 %v7296_v20, %v6281_v21  ;;  %3598 = vmatpush.bf16.msra.mxu2 %v6292_v35  ;;  %v6559_v20 = vld [vmem:[%s8582_s10 + $0x398] sm:$0xf]  ;;  %v7363_v21 = vld [vmem:[%s8582_s10 + $0x39c] sm:$0xf]  ;;  %v6231_v14 = vld [vmem:[%s8582_s10 + $0x110] sm:$0xf] }
 0x64e   : > { %3556 = vmatpush.bf16.msrb.mxu3 %v6280_v28  ;;  %v6488_v28 = vor.u32 %v7354_v25, %v6487_v60  ;;  %v6233_v16 = vld [vmem:[%s8582_s10 + $0x150] sm:$0xf0] }
 0x64f   : > { %v2694_v0 = vmul.f32 %v8611_v3, %v8996_v34  ;;  %3570 = vmatpush.bf16.msrb.mxu0 %v6284_v30  ;;  %v6489_v30 = vld [vmem:[%s8582_s10 + $0x350] sm:$0xf0] }
 0x651   : > { %2697 = vadd.xlane.f32.xlu2 %v2694_v0  ;;  %v6288_v0 = vor.u32 %v7305_v23, %v6287_v22  ;;  %3599 = vmatpush.bf16.msra.mxu2 %v6228_v53  ;;  %v6560_v22 = vor.u32 %v7371_v11, %v6559_v20  ;;  %v6561_v23 = vld [vmem:[%s8582_s10 + $0x3d8] sm:$0xf0]  ;;  %v6359_v53 = vld [vmem:[%s8582_s10 + $0x210] sm:$0xf]  ;;  %v6236_v20 = vor.u32 %v7282_v39, %v6233_v16  ;;  %v7372_v39 = vld [vmem:[%s8582_s10 + $0x3dc] sm:$0xf0] }
 0x652   : > { %3557 = vmatpush.bf16.msrb.mxu3 %v6216_v48  ;;  %v6425_v48 = vld [vmem:[%s8582_s10 + $0x2d0] sm:$0xf0]  ;;  %v6360_v27 = vor.u32 %v7322_v33, %v6359_v53  ;;  %v6113_v53 = vld [vmem:[%s8582_s10 + $0x58] sm:$0xf0]  ;;  %v6575_v16 = vld [vmem:[%s8582_s10 + $0x3a8] sm:$0xf] }
 0x653   : > { %3584 = vmatpush.bf16.msra.mxu1 %v6288_v0  ;;  %v6495_v0 = vld [vmem:[%s8582_s10 + $0x318] sm:$0xf]  ;;  %v6428_v32 = vor.u32 %v7330_v46, %v6425_v48  ;;  %v6103_v46 = vld [vmem:[%s8582_s10 + $0x10] sm:$0xf]  ;;  %v7250_v48 = vld [vmem:[%s8582_s10 + $0x14] sm:$0xf] }
 0x655   : > { %3600 = vmatpush.bf16.msra.mxu2 %v6164_v7  ;;  %v6295_v7 = vld [vmem:[%s8582_s10 + $0x190] sm:$0xf] }
 0x656   : > { %3558 = vmatpush.bf16.msrb.mxu3 %v6152_v56  ;;  %v6361_v56 = vld [vmem:[%s8582_s10 + $0x250] sm:$0xf0]  ;;  %v6296_v58 = vor.u32 %v7306_v17, %v6295_v7 }
 0x657   : > { %3585 = vmatpush.bf16.msra.mxu1 %v6224_v52  ;;  %v7331_v52 = vld [vmem:[%s8582_s10 + $0x29c] sm:$0xf]  ;;  %v6364_v61 = vor.u32 %v7314_v55, %v6361_v56 }
 0x658   : > { %v6436_v44 = vor.u32 %v7331_v52, %v6433_v54 }
 0x659   : > { %3601 = vmatpush.bf16.msra.mxu2 %v6100_v12  ;;  %v7290_v12 = vld [vmem:[%s8582_s10 + $0x14c] sm:$0xf0] }
 0x65a   : > { %3559 = vmatpush.bf16.msrb.mxu3 %v6088_v4  ;;  %v6297_v4 = vld [vmem:[%s8582_s10 + $0x1d0] sm:$0xf0]  ;;  %v6232_v15 = vor.u32 %v7290_v12, %v6231_v14  ;;  %v6567_v12 = vld [vmem:[%s8582_s10 + $0x3a0] sm:$0xf] }
 0x65b   : > { %3586 = vmatpush.bf16.msra.mxu1 %v6160_v5  ;;  %v7315_v5 = vld [vmem:[%s8582_s10 + $0x21c] sm:$0xf]  ;;  %v6300_v6 = vor.u32 %v7298_v51, %v6297_v4 }
 0x65c   : > { %v6372_v2 = vor.u32 %v7315_v5, %v6369_v1 }
 0x65e   : > { %3608 = vmatpush.bf16.msra.mxu3 %v6552_v18  ;;  %v6239_v18 = vld [vmem:[%s8582_s10 + $0x118] sm:$0xf] }
 0x65f   : > { %3587 = vmatpush.bf16.msra.mxu1 %v6096_v9  ;;  %v7299_v9 = vld [vmem:[%s8582_s10 + $0x19c] sm:$0xf] }
 0x660   : > { %v6308_v13 = vor.u32 %v7299_v9, %v6305_v10  ;;  %v7623_v9 = vld [vmem:[%s9602_s9] ss:$0 sm:$0xff] }
 0x662   : > { %3609 = vmatpush.bf16.msra.mxu3 %v6488_v28  ;;  %v7274_v28 = vld [vmem:[%s8582_s10 + $0xcc] sm:$0xf0] }
 0x663   : > { %3636 = vmatpush.bf16.msrb.mxu1 %v6560_v22  ;;  %v6241_v22 = vld [vmem:[%s8582_s10 + $0x158] sm:$0xf0] }
 0x6bc   : > { %v2696_v26 = vpop.xlane.xlu1 %2695 }
 0x6bd   : > { %v2699_v29 = vmul.f32 0.03125, %v2696_v26  ;;  %v6564_v26 = vor.u32 %v7363_v21, %v6561_v23  ;;  %v7283_v21 = vld [vmem:[%s8582_s10 + $0x11c] sm:$0xf] }
 0x6be   : > { %v6244_v60 = vor.u32 %v7283_v21, %v6241_v22  ;;  %v6568_v22 = vor.u32 %v7372_v39, %v6567_v12 }
 0x6bf   : > { %v2701_v36 = vsub.f32 %v8992_v24, %v2699_v29  ;;  %v7346_v29 = vld [vmem:[%s8582_s10 + $0x314] sm:$0xf]  ;;  %3650 = vmatpush.bf16.msrb.mxu2 %v6564_v26  ;;  %v6167_v26 = vld [vmem:[%s8582_s10 + $0x90] sm:$0xf] }
 0x6c0   : > { %v6492_v35 = vor.u32 %v7346_v29, %v6489_v30  ;;  %v6168_v29 = vor.u32 %v7274_v28, %v6167_v26  ;;  %v7266_v30 = vld [vmem:[%s8582_s10 + $0x94] sm:$0xf] }
 0x6c1   : > { %v9042_v37 = vmul.f32 %v8611_v3, %v2701_v36  ;;  %v7355_v36 = vld [vmem:[%s8582_s10 + $0x354] sm:$0xf0] }
 0x6c3   : > { %v2705_v38 = vmul.f32 %v9042_v37, %v9042_v37 }
 0x6c4   : > { %v2698_v40 = vpop.xlane.xlu2 %2697 }
 0x6c5   : > { %v2700_v41 = vmul.f32 0.03125, %v2698_v40  ;;  %2707 = vadd.xlane.f32.xlu0 %v2705_v38  ;;  %v7347_v38 = vld [vmem:[%s8582_s10 + $0x31c] sm:$0xf] }
 0x6c6   : > { %v6497_v40 = vld [vmem:[%s8582_s10 + $0x358] sm:$0xf0] }
 0x6c7   : > { %v2702_v24 = vsub.f32 %v8996_v34, %v2700_v41  ;;  %v6220_v34 = vor.u32 %v7280_v47, %v6217_v49  ;;  %v6496_v41 = vor.u32 %v7355_v36, %v6495_v0  ;;  %v6431_v49 = vld [vmem:[%s8582_s10 + $0x298] sm:$0xf]  ;;  %v6169_v0 = vld [vmem:[%s8582_s10 + $0xd0] sm:$0xf0] }
 0x6c9   : > { %v9048_v42 = vmul.f32 %v8611_v3, %v2702_v24  ;;  %3571 = vmatpush.bf16.msrb.mxu0 %v6220_v34  ;;  %v6500_v24 = vor.u32 %v7347_v38, %v6497_v40  ;;  %3637 = vmatpush.bf16.msrb.mxu1 %v6496_v41  ;;  %v6432_v34 = vor.u32 %v7339_v50, %v6431_v49  ;;  %v7275_v40 = vld [vmem:[%s8582_s10 + $0xd4] sm:$0xf0]  ;;  %v7267_v41 = vld [vmem:[%s8582_s10 + $0x9c] sm:$0xf]  ;;  %v6105_v50 = vld [vmem:[%s8582_s10 + $0x50] sm:$0xf0] }
 0x6ca   : > { %v6172_v38 = vor.u32 %v7266_v30, %v6169_v0  ;;  %v6108_v52 = vor.u32 %v7250_v48, %v6105_v50  ;;  %v6505_v30 = vld [vmem:[%s8582_s10 + $0x360] sm:$0xf0]  ;;  %v6511_v0 = vld [vmem:[%s8582_s10 + $0x328] sm:$0xf] }
 0x6cb   : > { %v2706_v43 = vmul.f32 %v9048_v42, %v9048_v42  ;;  %3651 = vmatpush.bf16.msrb.mxu2 %v6500_v24  ;;  %v6441_v48 = vld [vmem:[%s8582_s10 + $0x2e0] sm:$0xf0]  ;;  %v7341_v50 = vld [vmem:[%s8582_s10 + $0x2e4] sm:$0xf0] }
 0x6cd   : > { %2709 = vadd.xlane.f32.xlu1 %v2706_v43  ;;  %3572 = vmatpush.bf16.msrb.mxu0 %v6156_v62  ;;  %v6423_v43 = vld [vmem:[%s8582_s10 + $0x290] sm:$0xf]  ;;  %v6368_v62 = vor.u32 %v7323_v59, %v6367_v57 }
 0x6ce   : > { %v6424_v47 = vor.u32 %v7338_v45, %v6423_v43  ;;  %3638 = vmatpush.bf16.msrb.mxu1 %v6432_v34  ;;  %v6177_v43 = vld [vmem:[%s8582_s10 + $0xd8] sm:$0xf0]  ;;  %v7259_v34 = vld [vmem:[%s8582_s10 + $0x54] sm:$0xf0] }
 0x6cf   : > { %3652 = vmatpush.bf16.msrb.mxu2 %v6436_v44  ;;  %v6180_v45 = vor.u32 %v7267_v41, %v6177_v43  ;;  %v7251_v44 = vld [vmem:[%s8582_s10 + $0x1c] sm:$0xf]  ;;  %v7340_v43 = vld [vmem:[%s8582_s10 + $0x2dc] sm:$0xf0] }
 0x6d0   : > { %3610 = vmatpush.bf16.msra.mxu3 %v6424_v47  ;;  %v7258_v47 = vld [vmem:[%s8582_s10 + $0x4c] sm:$0xf0]  ;;  %v6116_v55 = vor.u32 %v7251_v44, %v6113_v53  ;;  %v6375_v44 = vld [vmem:[%s8582_s10 + $0x220] sm:$0xf] }
 0x6d1   : > { %3573 = vmatpush.bf16.msrb.mxu0 %v6092_v8  ;;  %v6304_v8 = vor.u32 %v7307_v31, %v6303_v63  ;;  %v6104_v49 = vor.u32 %v7258_v47, %v6103_v46  ;;  %v7622_v63 = vld [vmem:[%s9601_s18] ss:$0 sm:$0xff]  ;;  %v7332_v47 = vld [vmem:[%s8582_s10 + $0x2a4] sm:$0xf]  ;;  %v7324_v53 = vld [vmem:[%s8582_s10 + $0x25c] sm:$0xf0] }
 0x6d2   : > { %3639 = vmatpush.bf16.msrb.mxu1 %v6368_v62 }
 0x6d3   : > { %3653 = vmatpush.bf16.msrb.mxu2 %v6372_v2 }
 0x6d4   : > { %3611 = vmatpush.bf16.msra.mxu3 %v6360_v27 }
 0x6d5   : > { %3622 = vmatpush.bf16.msra.mxu0 %v6556_v19  ;;  %v7291_v19 = vld [vmem:[%s8582_s10 + $0x154] sm:$0xf0] }
 0x6d6   : > { %3640 = vmatpush.bf16.msrb.mxu1 %v6304_v8  ;;  %v6240_v11 = vor.u32 %v7291_v19, %v6239_v18 }
 0x6d7   : > { %3654 = vmatpush.bf16.msrb.mxu2 %v6308_v13 }
 0x6d8   : > { %3612 = vmatpush.bf16.msra.mxu3 %v6296_v58 }
 0x6d9   : > { %3623 = vmatpush.bf16.msra.mxu0 %v6492_v35  ;;  %v6175_v35 = vld [vmem:[%s8582_s10 + $0x98] sm:$0xf] }
 0x6da   : > { %3641 = vmatpush.bf16.msrb.mxu1 %v6240_v11  ;;  %v6176_v24 = vor.u32 %v7275_v40, %v6175_v35  ;;  %v7365_v11 = vld [vmem:[%s8582_s10 + $0x3ac] sm:$0xf]  ;;  %v7357_v35 = vld [vmem:[%s8582_s10 + $0x364] sm:$0xf0] }
 0x6db   : > { %3655 = vmatpush.bf16.msrb.mxu2 %v6244_v60  ;;  %v6503_v60 = vld [vmem:[%s8582_s10 + $0x320] sm:$0xf] }
 0x6dc   : > { %3613 = vmatpush.bf16.msra.mxu3 %v6232_v15  ;;  %v7364_v15 = vld [vmem:[%s8582_s10 + $0x3a4] sm:$0xf] }
 0x6dd   : > { %3624 = vmatpush.bf16.msra.mxu0 %v6428_v32  ;;  %v6111_v32 = vld [vmem:[%s8582_s10 + $0x18] sm:$0xf] }
 0x6de   : > { %3642 = vmatpush.bf16.msrb.mxu1 %v6176_v24  ;;  %v6112_v54 = vor.u32 %v7259_v34, %v6111_v32  ;;  %v6439_v24 = vld [vmem:[%s8582_s10 + $0x2a0] sm:$0xf]  ;;  %v7333_v32 = vld [vmem:[%s8582_s10 + $0x2ac] sm:$0xf] }
 0x6df   : > { %3656 = vmatpush.bf16.msrb.mxu2 %v6180_v45  ;;  %v6512_v45 = vor.u32 %v7357_v35, %v6511_v0  ;;  %v6449_v34 = vld [vmem:[%s8582_s10 + $0x2e8] sm:$0xf0]  ;;  %v6191_v0 = vld [vmem:[%s8582_s10 + $0xa8] sm:$0xf] }
 0x6e0   : > { %3614 = vmatpush.bf16.msra.mxu3 %v6168_v29  ;;  %v7348_v29 = vld [vmem:[%s8582_s10 + $0x324] sm:$0xf]  ;;  %v7277_v35 = vld [vmem:[%s8582_s10 + $0xe4] sm:$0xf0] }
 0x6e1   : > { %3625 = vmatpush.bf16.msra.mxu0 %v6364_v61  ;;  %v6508_v41 = vor.u32 %v7348_v29, %v6505_v30  ;;  %v7268_v29 = vld [vmem:[%s8582_s10 + $0xa4] sm:$0xf] }
 0x6e2   : > { %3643 = vmatpush.bf16.msrb.mxu1 %v6112_v54  ;;  %v6444_v54 = vor.u32 %v7332_v47, %v6441_v48  ;;  %v6185_v30 = vld [vmem:[%s8582_s10 + $0xe0] sm:$0xf0]  ;;  %v6192_v47 = vor.u32 %v7277_v35, %v6191_v0  ;;  %v6399_v0 = vld [vmem:[%s8582_s10 + $0x238] sm:$0xf] }
 0x6e3   : > { %3657 = vmatpush.bf16.msrb.mxu2 %v6116_v55  ;;  %v6452_v55 = vor.u32 %v7333_v32, %v6449_v34  ;;  %v7253_v32 = vld [vmem:[%s8582_s10 + $0x2c] sm:$0xf]  ;;  %v7327_v35 = vld [vmem:[%s8582_s10 + $0x274] sm:$0xf0] }
 0x6e4   : > { %3615 = vmatpush.bf16.msra.mxu3 %v6104_v49  ;;  %v6447_v49 = vld [vmem:[%s8582_s10 + $0x2a8] sm:$0xf]  ;;  %v6129_v34 = vld [vmem:[%s8582_s10 + $0x68] sm:$0xf0] }
 0x6e5   : > { %3626 = vmatpush.bf16.msra.mxu0 %v6300_v6 }
 0x6e9   : > { %3627 = vmatpush.bf16.msra.mxu0 %v6236_v20  ;;  %v7373_v20 = vld [vmem:[%s8582_s10 + $0x3e4] sm:$0xf0] }
 0x6ea   : > { %v6576_v26 = vor.u32 %v7373_v20, %v6575_v16  ;;  %v6255_v16 = vld [vmem:[%s8582_s10 + $0x128] sm:$0xf] }
 0x6eb   : > { %v7293_v20 = vld [vmem:[%s8582_s10 + $0x164] sm:$0xf0] }
 0x6ed   : > { %3628 = vmatpush.bf16.msra.mxu0 %v6172_v38  ;;  %v6513_v38 = vld [vmem:[%s8582_s10 + $0x368] sm:$0xf0] }
 0x6f1   : > { %3629 = vmatpush.bf16.msra.mxu0 %v6108_v52  ;;  %v6440_v52 = vor.u32 %v7340_v43, %v6439_v24  ;;  %v6188_v24 = vor.u32 %v7268_v29, %v6185_v30  ;;  %v7260_v43 = vld [vmem:[%s8582_s10 + $0x5c] sm:$0xf0]  ;;  %v7318_v29 = vld [vmem:[%s8582_s10 + $0x234] sm:$0xf] }
 0x6f2   : > { %v6393_v30 = vld [vmem:[%s8582_s10 + $0x270] sm:$0xf0] }
 0x738   : > { %v2708_v23 = vpop.xlane.xlu0 %2707 }
 0x739   : > { %v2711_v25 = vmul.f32 0.03125, %v2708_v23 }
 0x73b   : > { %v2713_v36 = vadd.f32 1e-05, %v2711_v25  ;;  %v7356_v25 = vld [vmem:[%s8582_s10 + $0x35c] sm:$0xf0] }
 0x73c   : > { %v6504_v40 = vor.u32 %v7356_v25, %v6503_v60  ;;  %v6183_v60 = vld [vmem:[%s8582_s10 + $0xa0] sm:$0xf] }
 0x73d   : > { %7659 = vrsqrt.f32 %v2713_v36  ;;  %vm2721_vm5 = vweird.f32 %v2713_v36  ;;  %v7276_v25 = vld [vmem:[%s8582_s10 + $0xdc] sm:$0xf0] }
 0x740   : > { %v2710_v33 = vpop.xlane.xlu1 %2709 }
 0x741   : > { %v2712_v27 = vmul.f32 0.03125, %v2710_v33  ;;  %v6448_v33 = vor.u32 %v7341_v50, %v6447_v49  ;;  %v6127_v49 = vld [vmem:[%s8582_s10 + $0x28] sm:$0xf] }
 0x742   : > { %v7261_v50 = vld [vmem:[%s8582_s10 + $0x64] sm:$0xf0] }
 0x743   : > { %v7660_v56 = vpop.eup %7659  ;;  %v2714_v57 = vadd.f32 1e-05, %v2712_v27  ;;  %v7316_v27 = vld [vmem:[%s8582_s10 + $0x224] sm:$0xf] }
 0x744   : > { %v2716_v59 = vmul.f32 %v7660_v56, %v2713_v36  ;;  %vm2722_vm4 = vweird.f32 %v7660_v56  ;;  %v7349_v36 = vld [vmem:[%s8582_s10 + $0x32c] sm:$0xf] }
 0x745   : > { %7661 = vrsqrt.f32 %v2714_v57  ;;  %vm2723_vm6 = vmor %vm2721_vm5, %vm2722_vm4  ;;  %vm2731_vm7 = vweird.f32 %v2714_v57  ;;  %v6516_v46 = vor.u32 %v7349_v36, %v6513_v38  ;;  %v7269_v36 = vld [vmem:[%s8582_s10 + $0xac] sm:$0xf] }
 0x746   : > { %v2717_v61 = vmul.f32 %v7660_v56, %v2716_v59  ;;  %v7325_v59 = vld [vmem:[%s8582_s10 + $0x264] sm:$0xf0]  ;;  %v6193_v38 = vld [vmem:[%s8582_s10 + $0xe8] sm:$0xf0] }
 0x747   : > { %v6196_v48 = vor.u32 %v7269_v36, %v6193_v38  ;;  %v7319_v36 = vld [vmem:[%s8582_s10 + $0x23c] sm:$0xf] }
 0x748   : > { %v2718_v62 = vmul.f32 0.5, %v2717_v61  ;;  %v7317_v61 = vld [vmem:[%s8582_s10 + $0x22c] sm:$0xf]  ;;  %v6401_v38 = vld [vmem:[%s8582_s10 + $0x278] sm:$0xf0] }
 0x74a   : > { %v2719_v5 = vsub.f32 1.5, %v2718_v62  ;;  %v6385_v62 = vld [vmem:[%s8582_s10 + $0x268] sm:$0xf0] }
 0x74b   : > { %v7662_v1 = vpop.eup %7661 }
 0x74c   : > { %v2720_v2 = vmul.f32 %v7660_v56, %v2719_v5  ;;  %v2726_v7 = vmul.f32 %v7662_v1, %v2714_v57  ;;  %vm2732_vm2 = vweird.f32 %v7662_v1  ;;  %v6383_v57 = vld [vmem:[%s8582_s10 + $0x228] sm:$0xf]  ;;  %v6376_v5 = vor.u32 %v7324_v53, %v6375_v44  ;;  %v7366_v44 = vld [vmem:[%s8582_s10 + $0x3b4] sm:$0xf] }
 0x74d   : > { %vm2733_vm8 = vmor %vm2731_vm7, %vm2732_vm2  ;;  %v6585_v53 = vld [vmem:[%s8582_s10 + $0x3f0] sm:$0xf0] }
 0x74e   : > { %v2727_v17 = vmul.f32 %v7662_v1, %v2726_v7  ;;  %v2724_v51 = vsel %vm2723_vm6, %v7660_v56, %v2720_v2  ;;  %v6377_v56 = vld [vmem:[%s8582_s10 + $0x260] sm:$0xf0]  ;;  %v6311_v2 = vld [vmem:[%s8582_s10 + $0x1a0] sm:$0xf] }
 0x74f   : > { %v2735_v31 = vmul.f32 %v2724_v51, %v9042_v37  ;;  %v6569_v37 = vld [vmem:[%s8582_s10 + $0x3e0] sm:$0xf0]  ;;  %v7308_v7 = vld [vmem:[%s8582_s10 + $0x1dc] sm:$0xf0]  ;;  %v6388_v51 = vor.u32 %v7317_v61, %v6385_v62  ;;  %v6128_v61 = vor.u32 %v7261_v50, %v6127_v49  ;;  %v6132_v62 = vor.u32 %v7253_v32, %v6129_v34  ;;  %v6335_v49 = vld [vmem:[%s8582_s10 + $0x1b8] sm:$0xf] }
 0x750   : > { %v2728_v58 = vmul.f32 0.5, %v2727_v17  ;;  %v6572_v23 = vor.u32 %v7364_v15, %v6569_v37  ;;  %v6384_v17 = vor.u32 %v7325_v59, %v6383_v57  ;;  %v7284_v15 = vld [vmem:[%s8582_s10 + $0x124] sm:$0xf]  ;;  %v7367_v57 = vld [vmem:[%s8582_s10 + $0x3bc] sm:$0xf] }
 0x751   : > { %v2740_v10 = vmul.f32 %v7622_v63, %v2735_v31  ;;  %v7309_v31 = vld [vmem:[%s8582_s10 + $0x1e4] sm:$0xf0]  ;;  %v6249_v37 = vld [vmem:[%s8582_s10 + $0x160] sm:$0xf0]  ;;  %v6593_v59 = vld [vmem:[%s8582_s10 + $0x3f8] sm:$0xf0] }
 0x752   : > { %v2729_v4 = vsub.f32 1.5, %v2728_v58  ;;  %v7300_v58 = vld [vmem:[%s8582_s10 + $0x1a4] sm:$0xf]  ;;  %v7311_v50 = vld [vmem:[%s8582_s10 + $0x1f4] sm:$0xf0] }
 0x753   : > { %v9151_v18 = vadd.f32 %v7623_v9, %v2740_v10  ;;  %v7303_v32 = vld [vmem:[%s8582_s10 + $0x1bc] sm:$0xf] }
 0x754   : > { %v2730_v6 = vmul.f32 %v7662_v1, %v2729_v4  ;;  %v6313_v4 = vld [vmem:[%s8582_s10 + $0x1e0] sm:$0xf0]  ;;  %v6337_v34 = vld [vmem:[%s8582_s10 + $0x1f8] sm:$0xf0] }
 0x755   : > { %v6316_v10 = vor.u32 %v7300_v58, %v6313_v4  ;;  %v7350_v58 = vld [vmem:[%s8582_s10 + $0x334] sm:$0xf] }
 0x756   : > { %v2734_v8 = vsel %vm2733_vm8, %v7662_v1, %v2730_v6  ;;  %v6380_v1 = vor.u32 %v7316_v27, %v6377_v56  ;;  %v7301_v6 = vld [vmem:[%s8582_s10 + $0x1ac] sm:$0xf]  ;;  %v7375_v56 = vld [vmem:[%s8582_s10 + $0x3f4] sm:$0xf0]  ;;  %v6521_v4 = vld [vmem:[%s8582_s10 + $0x370] sm:$0xf0] }
 0x757   : > { %v2736_v13 = vmul.f32 %v2734_v8, %v9048_v42  ;;  %v6577_v42 = vld [vmem:[%s8582_s10 + $0x3e8] sm:$0xf0] }
 0x758   : > { %v6580_v28 = vor.u32 %v7365_v11, %v6577_v42  ;;  %v6321_v8 = vld [vmem:[%s8582_s10 + $0x1e8] sm:$0xf0] }
 0x759   : > { %v2741_v14 = vmul.f32 %v7622_v63, %v2736_v13  ;;  %v6319_v63 = vld [vmem:[%s8582_s10 + $0x1a8] sm:$0xf]  ;;  %v6247_v13 = vld [vmem:[%s8582_s10 + $0x120] sm:$0xf]  ;;  %v6324_v39 = vor.u32 %v7301_v6, %v6321_v8  ;;  %v7285_v11 = vld [vmem:[%s8582_s10 + $0x12c] sm:$0xf] }
 0x75a   : > { %v6320_v12 = vor.u32 %v7309_v31, %v6319_v63  ;;  %v6257_v42 = vld [vmem:[%s8582_s10 + $0x168] sm:$0xf0]  ;;  %v6527_v63 = vld [vmem:[%s8582_s10 + $0x338] sm:$0xf]  ;;  %v7351_v6 = vld [vmem:[%s8582_s10 + $0x33c] sm:$0xf] }
 0x75b   : > { %v9153_v19 = vadd.f32 %v7623_v9, %v2741_v14  ;;  %v6312_v9 = vor.u32 %v7308_v7, %v6311_v2  ;;  %v7292_v14 = vld [vmem:[%s8582_s10 + $0x15c] sm:$0xf0]  ;;  %v6519_v2 = vld [vmem:[%s8582_s10 + $0x330] sm:$0xf]  ;;  %v7359_v31 = vld [vmem:[%s8582_s10 + $0x374] sm:$0xf0] }
 0x75c   : > { %v7358_v7 = vld [vmem:[%s8582_s10 + $0x36c] sm:$0xf0]  ;;  %v6529_v8 = vld [vmem:[%s8582_s10 + $0x378] sm:$0xf0] }
 0x75d   : > { %v9160_v21 = vpack.c.bf16 %v9153_v19, %v9151_v18 }
 0x75f   : > { %3560 = vmatmul.bf16.vlgmr.msrb.gmra.mxu3 %v9160_v21  ;;  %3574 = vmatmul.bf16.vlgmr.msrb.gmra.mxu0 %v9160_v21 }
 0x760   : > { %3588 = vmatmul.bf16.vlgmr.msra.gmra.mxu1 %v9160_v21  ;;  %3602 = vmatmul.bf16.vlgmr.msra.gmra.mxu2 %v9160_v21 }
 0x761   : > { %3664 = vmatpush.bf16.msrb.mxu3 %v6568_v22  ;;  %3678 = vmatpush.bf16.msrb.mxu0 %v6572_v23  ;;  %v6248_v22 = vor.u32 %v7292_v14, %v6247_v13  ;;  %v6252_v23 = vor.u32 %v7284_v15, %v6249_v37  ;;  %v6455_v13 = vld [vmem:[%s8582_s10 + $0x2b0] sm:$0xf]  ;;  %v7334_v15 = vld [vmem:[%s8582_s10 + $0x2b4] sm:$0xf] }
 0x762   : > { %3692 = vmatpush.bf16.msra.mxu1 %v6576_v26  ;;  %3706 = vmatpush.bf16.msra.mxu2 %v6580_v28  ;;  %v6256_v26 = vor.u32 %v7293_v20, %v6255_v16  ;;  %v6260_v28 = vor.u32 %v7285_v11, %v6257_v42  ;;  %v7342_v14 = vld [vmem:[%s8582_s10 + $0x2ec] sm:$0xf0]  ;;  %v6457_v37 = vld [vmem:[%s8582_s10 + $0x2f0] sm:$0xf0]  ;;  %v6463_v16 = vld [vmem:[%s8582_s10 + $0x2b8] sm:$0xf] }
 0x763   : > { %v7343_v20 = vld [vmem:[%s8582_s10 + $0x2f4] sm:$0xf0]  ;;  %v7335_v11 = vld [vmem:[%s8582_s10 + $0x2bc] sm:$0xf] }
 0x764   : > { %v6465_v42 = vld [vmem:[%s8582_s10 + $0x2f8] sm:$0xf0] }
 0x765   : > { %3665 = vmatpush.bf16.msrb.mxu3 %v6504_v40  ;;  %3679 = vmatpush.bf16.msrb.mxu0 %v6508_v41  ;;  %v6119_v40 = vld [vmem:[%s8582_s10 + $0x20] sm:$0xf]  ;;  %v6184_v41 = vor.u32 %v7276_v25, %v6183_v60  ;;  %v6391_v60 = vld [vmem:[%s8582_s10 + $0x230] sm:$0xf] }
 0x766   : > { %3693 = vmatpush.bf16.msra.mxu1 %v6512_v45  ;;  %3707 = vmatpush.bf16.msra.mxu2 %v6516_v46  ;;  %v7252_v45 = vld [vmem:[%s8582_s10 + $0x24] sm:$0xf]  ;;  %v7326_v25 = vld [vmem:[%s8582_s10 + $0x26c] sm:$0xf0] }
 0x767   : > { %v6121_v46 = vld [vmem:[%s8582_s10 + $0x60] sm:$0xf0] }
 0x768   : > { %v6124_v27 = vor.u32 %v7252_v45, %v6121_v46  ;;  %v6400_v45 = vor.u32 %v7327_v35, %v6399_v0  ;;  %v6404_v46 = vor.u32 %v7319_v36, %v6401_v38  ;;  %v7390_v0 = vld [vmem:[%s8588_s23 + $0x70] sm:$0xff] }
 0x769   : > { %3666 = vmatpush.bf16.msrb.mxu3 %v6440_v52  ;;  %3680 = vmatpush.bf16.msrb.mxu0 %v6444_v54  ;;  %v6583_v52 = vld [vmem:[%s8582_s10 + $0x3b0] sm:$0xf] }
 0x76a   : > { %3694 = vmatpush.bf16.msra.mxu1 %v6448_v33  ;;  %3708 = vmatpush.bf16.msra.mxu2 %v6452_v55  ;;  %v7374_v54 = vld [vmem:[%s8582_s10 + $0x3ec] sm:$0xf0]  ;;  %v6591_v33 = vld [vmem:[%s8582_s10 + $0x3b8] sm:$0xf]  ;;  %v6120_v55 = vor.u32 %v7260_v43, %v6119_v40  ;;  %v6392_v40 = vor.u32 %v7326_v25, %v6391_v60 }
 0x76b   : > { %v7310_v43 = vld [vmem:[%s8582_s10 + $0x1ec] sm:$0xf0] }
 0x76c   : > { %v7398_v35 = vld [vmem:[%s8588_s23 + $0xb0] sm:$0xff] }
 0x76d   : > { %3667 = vmatpush.bf16.msrb.mxu3 %v6376_v5  ;;  %3681 = vmatpush.bf16.msrb.mxu0 %v6380_v1  ;;  %v6584_v5 = vor.u32 %v7374_v54, %v6583_v52  ;;  %v6588_v1 = vor.u32 %v7366_v44, %v6585_v53  ;;  %v6263_v44 = vld [vmem:[%s8582_s10 + $0x130] sm:$0xf] }
 0x76e   : > { %3695 = vmatpush.bf16.msra.mxu1 %v6384_v17  ;;  %3709 = vmatpush.bf16.msra.mxu2 %v6388_v51  ;;  %v6592_v17 = vor.u32 %v7375_v56, %v6591_v33  ;;  %v6596_v51 = vor.u32 %v7367_v57, %v6593_v59  ;;  %v7294_v53 = vld [vmem:[%s8582_s10 + $0x16c] sm:$0xf0]  ;;  %v6336_v33 = vor.u32 %v7311_v50, %v6335_v49  ;;  %v6265_v56 = vld [vmem:[%s8582_s10 + $0x170] sm:$0xf0]  ;;  %v6271_v57 = vld [vmem:[%s8582_s10 + $0x138] sm:$0xf] }
 0x76f   : > { %3616 = vmatmul.bf16.vlgmr.msra.gmra.mxu3 %v9160_v21  ;;  %3630 = vmatmul.bf16.vlgmr.msra.gmra.mxu0 %v9160_v21  ;;  %v7295_v59 = vld [vmem:[%s8582_s10 + $0x174] sm:$0xf0]  ;;  %v7382_v36 = vld [vmem:[%s8588_s23 + $0x30] sm:$0xff] }
 0x770   : > { %3644 = vmatmul.bf16.vlgmr.msrb.gmra.mxu1 %v9160_v21  ;;  %3658 = vmatmul.bf16.vlgmr.msrb.gmra.mxu2 %v9160_v21  ;;  %v7406_v38 = vld [vmem:[%s8588_s23 + $0xf0] sm:$0xff]  ;;  %v7395_v49 = vld [vmem:[%s8588_s23 + $0x98] sm:$0xff] }
 0x771   : > { %3668 = vmatpush.bf16.msrb.mxu3 %v6312_v9  ;;  %3682 = vmatpush.bf16.msrb.mxu0 %v6316_v10  ;;  %v6520_v9 = vor.u32 %v7358_v7, %v6519_v2  ;;  %v6524_v10 = vor.u32 %v7350_v58, %v6521_v4  ;;  %v6199_v2 = vld [vmem:[%s8582_s10 + $0xb0] sm:$0xf]  ;;  %v7270_v58 = vld [vmem:[%s8582_s10 + $0xb4] sm:$0xf]  ;;  %v7379_v50 = vld [vmem:[%s8588_s23 + $0x18] sm:$0xff] }
 0x772   : > { %3696 = vmatpush.bf16.msra.mxu1 %v6320_v12  ;;  %3710 = vmatpush.bf16.msra.mxu2 %v6324_v39  ;;  %v6528_v12 = vor.u32 %v7359_v31, %v6527_v63  ;;  %v6532_v39 = vor.u32 %v7351_v6, %v6529_v8  ;;  %v7278_v7 = vld [vmem:[%s8582_s10 + $0xec] sm:$0xf0]  ;;  %v6201_v4 = vld [vmem:[%s8582_s10 + $0xf0] sm:$0xf0]  ;;  %v6207_v63 = vld [vmem:[%s8582_s10 + $0xb8] sm:$0xf] }
 0x773   : > { %v7279_v31 = vld [vmem:[%s8582_s10 + $0xf4] sm:$0xf0]  ;;  %v7271_v6 = vld [vmem:[%s8582_s10 + $0xbc] sm:$0xf] }
 0x774   : > { %v6209_v8 = vld [vmem:[%s8582_s10 + $0xf8] sm:$0xf0] }
 0x775   : > { %3669 = vmatpush.bf16.msrb.mxu3 %v6248_v22  ;;  %3683 = vmatpush.bf16.msrb.mxu0 %v6252_v23  ;;  %v6456_v22 = vor.u32 %v7342_v14, %v6455_v13  ;;  %v6460_v23 = vor.u32 %v7334_v15, %v6457_v37  ;;  %v6135_v13 = vld [vmem:[%s8582_s10 + $0x30] sm:$0xf]  ;;  %v7254_v15 = vld [vmem:[%s8582_s10 + $0x34] sm:$0xf] }
 0x776   : > { %3697 = vmatpush.bf16.msra.mxu1 %v6256_v26  ;;  %3711 = vmatpush.bf16.msra.mxu2 %v6260_v28  ;;  %v6464_v26 = vor.u32 %v7343_v20, %v6463_v16  ;;  %v6468_v28 = vor.u32 %v7335_v11, %v6465_v42  ;;  %v7262_v14 = vld [vmem:[%s8582_s10 + $0x6c] sm:$0xf0]  ;;  %v6137_v37 = vld [vmem:[%s8582_s10 + $0x70] sm:$0xf0]  ;;  %v6143_v16 = vld [vmem:[%s8582_s10 + $0x38] sm:$0xf] }
 0x777   : > { %v7263_v20 = vld [vmem:[%s8582_s10 + $0x74] sm:$0xf0]  ;;  %v7255_v11 = vld [vmem:[%s8582_s10 + $0x3c] sm:$0xf] }
 0x778   : > { %v6145_v42 = vld [vmem:[%s8582_s10 + $0x78] sm:$0xf0]  ;;  %v6144_v60 = vor.u32 %v7263_v20, %v6143_v16  ;;  %v7426_v16 = vld [vmem:[%s8588_s23 + $0x190] sm:$0xff] }
 0x779   : > { %3670 = vmatpush.bf16.msrb.mxu3 %v6184_v41  ;;  %3684 = vmatpush.bf16.msrb.mxu0 %v6188_v24  ;;  %v6396_v41 = vor.u32 %v7318_v29, %v6393_v30  ;;  %v6327_v24 = vld [vmem:[%s8582_s10 + $0x1b0] sm:$0xf]  ;;  %v6148_v25 = vor.u32 %v7255_v11, %v6145_v42  ;;  %v7383_v29 = vld [vmem:[%s8588_s23 + $0x38] sm:$0xff]  ;;  %v7417_v42 = vld [vmem:[%s8588_s23 + $0x148] sm:$0xff] }
 0x77a   : > { %3698 = vmatpush.bf16.msra.mxu1 %v6192_v47  ;;  %3712 = vmatpush.bf16.msra.mxu2 %v6196_v48  ;;  %v7302_v47 = vld [vmem:[%s8582_s10 + $0x1b4] sm:$0xf]  ;;  %v6328_v52 = vor.u32 %v7310_v43, %v6327_v24  ;;  %v7407_v30 = vld [vmem:[%s8588_s23 + $0xf8] sm:$0xff]  ;;  %v7381_v24 = vld [vmem:[%s8588_s23 + $0x28] sm:$0xff] }
 0x77b   : > { %v6329_v48 = vld [vmem:[%s8582_s10 + $0x1f0] sm:$0xf0]  ;;  %v7405_v43 = vld [vmem:[%s8588_s23 + $0xe8] sm:$0xff] }
 0x77c   : > { %v6332_v54 = vor.u32 %v7302_v47, %v6329_v48  ;;  %v7404_v47 = vld [vmem:[%s8588_s23 + $0xe0] sm:$0xff]  ;;  %v7387_v48 = vld [vmem:[%s8588_s23 + $0x58] sm:$0xff]  ;;  %v7410_v20 = vld [vmem:[%s8588_s23 + $0x110] sm:$0xff] }
 0x77d   : > { %3671 = vmatpush.bf16.msrb.mxu3 %v6120_v55  ;;  %3685 = vmatpush.bf16.msrb.mxu0 %v6124_v27  ;;  %v6340_v55 = vor.u32 %v7303_v32, %v6337_v34  ;;  %v7286_v27 = vld [vmem:[%s8582_s10 + $0x134] sm:$0xf]  ;;  %v7403_v32 = vld [vmem:[%s8588_s23 + $0xd8] sm:$0xff] }
 0x77e   : > { %3699 = vmatpush.bf16.msra.mxu1 %v6128_v61  ;;  %3713 = vmatpush.bf16.msra.mxu2 %v6132_v62  ;;  %v7287_v61 = vld [vmem:[%s8582_s10 + $0x13c] sm:$0xf]  ;;  %v7386_v34 = vld [vmem:[%s8588_s23 + $0x50] sm:$0xff] }
 0x77f   : > { %v6273_v62 = vld [vmem:[%s8582_s10 + $0x178] sm:$0xf0]  ;;  %v7434_v11 = vld [vmem:[%s8588_s23 + $0x1d0] sm:$0xff] }
 0x780   : > { %3672 = vmatmul.bf16.vlgmr.msrb.gmra.mxu3 %v9160_v21  ;;  %3686 = vmatmul.bf16.vlgmr.msrb.gmra.mxu0 %v9160_v21 }
 0x781   : > { %3720 = vmatpush.bf16.msra.mxu3 %v6584_v5  ;;  %3734 = vmatpush.bf16.msra.mxu0 %v6588_v1  ;;  %v6264_v5 = vor.u32 %v7294_v53, %v6263_v44  ;;  %v6268_v1 = vor.u32 %v7286_v27, %v6265_v56  ;;  %v7402_v44 = vld [vmem:[%s8588_s23 + $0xd0] sm:$0xff]  ;;  %v7385_v53 = vld [vmem:[%s8588_s23 + $0x48] sm:$0xff]  ;;  %v7384_v56 = vld [vmem:[%s8588_s23 + $0x40] sm:$0xff] }
 0x782   : > { %3748 = vmatpush.bf16.msrb.mxu1 %v6592_v17  ;;  %3762 = vmatpush.bf16.msrb.mxu2 %v6596_v51  ;;  %v6272_v17 = vor.u32 %v7295_v59, %v6271_v57  ;;  %v6276_v51 = vor.u32 %v7287_v61, %v6273_v62  ;;  %v7401_v27 = vld [vmem:[%s8588_s23 + $0xc8] sm:$0xff]  ;;  %v7392_v57 = vld [vmem:[%s8588_s23 + $0x80] sm:$0xff]  ;;  %v7423_v59 = vld [vmem:[%s8588_s23 + $0x178] sm:$0xff] }
 0x783   : > { %3700 = vmatmul.bf16.vlgmr.msra.gmra.mxu1 %v9160_v21  ;;  %3714 = vmatmul.bf16.vlgmr.msra.gmra.mxu2 %v9160_v21  ;;  %v7431_v61 = vld [vmem:[%s8588_s23 + $0x1b8] sm:$0xff]  ;;  %v7376_v62 = vld [vmem:[%s8588_s23] sm:$0xff] }
 0x785   : > { %3721 = vmatpush.bf16.msra.mxu3 %v6520_v9  ;;  %3735 = vmatpush.bf16.msra.mxu0 %v6524_v10  ;;  %v6200_v9 = vor.u32 %v7278_v7, %v6199_v2  ;;  %v6204_v10 = vor.u32 %v7270_v58, %v6201_v4  ;;  %v7439_v2 = vld [vmem:[%s8588_s23 + $0x1f8] sm:$0xff]  ;;  %v7422_v7 = vld [vmem:[%s8588_s23 + $0x170] sm:$0xff]  ;;  %v7421_v4 = vld [vmem:[%s8588_s23 + $0x168] sm:$0xff] }
 0x786   : > { %3749 = vmatpush.bf16.msrb.mxu1 %v6528_v12  ;;  %3763 = vmatpush.bf16.msrb.mxu2 %v6532_v39  ;;  %v6208_v12 = vor.u32 %v7279_v31, %v6207_v63  ;;  %v6212_v39 = vor.u32 %v7271_v6, %v6209_v8  ;;  %v7438_v58 = vld [vmem:[%s8588_s23 + $0x1f0] sm:$0xff]  ;;  %v7429_v63 = vld [vmem:[%s8588_s23 + $0x1a8] sm:$0xff]  ;;  %v7420_v8 = vld [vmem:[%s8588_s23 + $0x160] sm:$0xff] }
 0x787   : > { %v7413_v31 = vld [vmem:[%s8588_s23 + $0x128] sm:$0xff] }
 0x788   : > { %v7437_v6 = vld [vmem:[%s8588_s23 + $0x1e8] sm:$0xff] }
 0x789   : > { %3722 = vmatpush.bf16.msra.mxu3 %v6456_v22  ;;  %3736 = vmatpush.bf16.msra.mxu0 %v6460_v23  ;;  %v6136_v22 = vor.u32 %v7262_v14, %v6135_v13  ;;  %v6140_v23 = vor.u32 %v7254_v15, %v6137_v37  ;;  %v7436_v13 = vld [vmem:[%s8588_s23 + $0x1e0] sm:$0xff]  ;;  %v7419_v14 = vld [vmem:[%s8588_s23 + $0x158] sm:$0xff]  ;;  %v7418_v37 = vld [vmem:[%s8588_s23 + $0x150] sm:$0xff] }
 0x78a   : > { %3750 = vmatpush.bf16.msrb.mxu1 %v6464_v26  ;;  %3764 = vmatpush.bf16.msrb.mxu2 %v6468_v28  ;;  %v7391_v26 = vld [vmem:[%s8588_s23 + $0x78] sm:$0xff] }
 0x78b   : > { %v7399_v28 = vld [vmem:[%s8588_s23 + $0xb8] sm:$0xff] }
 0x78c   : > { %v7435_v15 = vld [vmem:[%s8588_s23 + $0x1d8] sm:$0xff] }
 0x78d   : > { %3723 = vmatpush.bf16.msra.mxu3 %v6392_v40  ;;  %3737 = vmatpush.bf16.msra.mxu0 %v6396_v41  ;;  %v7389_v40 = vld [vmem:[%s8588_s23 + $0x68] sm:$0xff] }
 0x78e   : > { %3751 = vmatpush.bf16.msrb.mxu1 %v6400_v45  ;;  %3765 = vmatpush.bf16.msrb.mxu2 %v6404_v46  ;;  %v7397_v41 = vld [vmem:[%s8588_s23 + $0xa8] sm:$0xff]  ;;  %v7396_v45 = vld [vmem:[%s8588_s23 + $0xa0] sm:$0xff] }
 0x78f   : > { %v7380_v46 = vld [vmem:[%s8588_s23 + $0x20] sm:$0xff] }
 0x791   : > { %3724 = vmatpush.bf16.msra.mxu3 %v6328_v52  ;;  %3738 = vmatpush.bf16.msra.mxu0 %v6332_v54  ;;  %v7394_v52 = vld [vmem:[%s8588_s23 + $0x90] sm:$0xff] }
 0x792   : > { %3752 = vmatpush.bf16.msrb.mxu1 %v6336_v33  ;;  %3766 = vmatpush.bf16.msrb.mxu2 %v6340_v55  ;;  %v7378_v54 = vld [vmem:[%s8588_s23 + $0x10] sm:$0xff]  ;;  %v7393_v33 = vld [vmem:[%s8588_s23 + $0x88] sm:$0xff] }
 0x793   : > { %v7377_v55 = vld [vmem:[%s8588_s23 + $0x8] sm:$0xff] }
 0x795   : > { %3725 = vmatpush.bf16.msra.mxu3 %v6264_v5  ;;  %3739 = vmatpush.bf16.msra.mxu0 %v6268_v1  ;;  %v7400_v5 = vld [vmem:[%s8588_s23 + $0xc0] sm:$0xff]  ;;  %v7415_v1 = vld [vmem:[%s8588_s23 + $0x138] sm:$0xff] }
 0x796   : > { %3753 = vmatpush.bf16.msrb.mxu1 %v6272_v17  ;;  %3767 = vmatpush.bf16.msrb.mxu2 %v6276_v51  ;;  %v7430_v17 = vld [vmem:[%s8588_s23 + $0x1b0] sm:$0xff] }
 0x797   : > { %v7414_v51 = vld [vmem:[%s8588_s23 + $0x130] sm:$0xff] }
 0x799   : > { %3726 = vmatpush.bf16.msra.mxu3 %v6200_v9  ;;  %3740 = vmatpush.bf16.msra.mxu0 %v6204_v10  ;;  %v7428_v9 = vld [vmem:[%s8588_s23 + $0x1a0] sm:$0xff] }
 0x79a   : > { %3754 = vmatpush.bf16.msrb.mxu1 %v6208_v12  ;;  %3768 = vmatpush.bf16.msrb.mxu2 %v6212_v39  ;;  %v7412_v10 = vld [vmem:[%s8588_s23 + $0x120] sm:$0xff]  ;;  %v7427_v12 = vld [vmem:[%s8588_s23 + $0x198] sm:$0xff] }
 0x79b   : > { %v7411_v39 = vld [vmem:[%s8588_s23 + $0x118] sm:$0xff] }
 0x79d   : > { %3727 = vmatpush.bf16.msra.mxu3 %v6136_v22  ;;  %3741 = vmatpush.bf16.msra.mxu0 %v6140_v23  ;;  %v7425_v22 = vld [vmem:[%s8588_s23 + $0x188] sm:$0xff] }
 0x79e   : > { %3755 = vmatpush.bf16.msrb.mxu1 %v6144_v60  ;;  %3769 = vmatpush.bf16.msrb.mxu2 %v6148_v25  ;;  %v7409_v23 = vld [vmem:[%s8588_s23 + $0x108] sm:$0xff]  ;;  %v7416_v25 = vld [vmem:[%s8588_s23 + $0x140] sm:$0xff] }
 0x79f   : > { %v7433_v60 = vld [vmem:[%s8588_s23 + $0x1c8] sm:$0xff] }
 0x7a0   : > { %3728 = vmatmul.bf16.vlgmr.msra.gmra.mxu3 %v9160_v21  ;;  %3742 = vmatmul.bf16.vlgmr.msra.gmra.mxu0 %v9160_v21 }
 0x7a1   : > { %4866 = vmatpush.bf16.msrb.mxu0 %v7391_v26  ;;  %3756 = vmatmul.bf16.vlgmr.msrb.gmra.mxu1 %v9160_v21  ;;  %v7424_v26 = vld [vmem:[%s8588_s23 + $0x180] sm:$0xff] }
 0x7a2   : > { %4880 = vmatpush.bf16.msra.mxu1 %v7399_v28  ;;  %3770 = vmatmul.bf16.vlgmr.msrb.gmra.mxu2 %v9160_v21  ;;  %v7388_v21 = vld [vmem:[%s8588_s23 + $0x60] sm:$0xff] }
 0x7a3   : > { %4852 = vmatpush.bf16.msrb.mxu3 %v7383_v29  ;;  %4894 = vmatpush.bf16.msra.mxu2 %v7407_v30  ;;  %v7408_v28 = vld [vmem:[%s8588_s23 + $0x100] sm:$0xff] }
 0x7a4   : > { %v7432_v29 = vld [vmem:[%s8588_s23 + $0x1c0] sm:$0xff] }
 0x7a5   : > { %4867 = vmatpush.bf16.msrb.mxu0 %v7390_v0  ;;  %v9363_v30 = vld [vmem:[%s8616_s0] sm:$0xff] }
 0x7a6   : > { %4881 = vmatpush.bf16.msra.mxu1 %v7398_v35 }
 0x7a7   : > { %4853 = vmatpush.bf16.msrb.mxu3 %v7382_v36  ;;  %4895 = vmatpush.bf16.msra.mxu2 %v7406_v38  ;;  %v2881_v36 = vperm.slane %v9363_v30, 1  ;;  %v2882_v38 = vperm.slane %v9363_v30, 2 }
 0x7a9   : > { %4868 = vmatpush.bf16.msrb.mxu0 %v7389_v40 }
 0x7aa   : > { %4882 = vmatpush.bf16.msra.mxu1 %v7397_v41 }
 0x7ab   : > { %4854 = vmatpush.bf16.msrb.mxu3 %v7381_v24  ;;  %4896 = vmatpush.bf16.msra.mxu2 %v7405_v43 }
 0x7ad   : > { %4869 = vmatpush.bf16.msrb.mxu0 %v7388_v21 }
 0x7ae   : > { %4883 = vmatpush.bf16.msra.mxu1 %v7396_v45  ;;  %v2880_v45 = vperm.slane %v9363_v30, 0 }
 0x7af   : > { %4855 = vmatpush.bf16.msrb.mxu3 %v7380_v46  ;;  %4897 = vmatpush.bf16.msra.mxu2 %v7404_v47 }
 0x7b1   : > { %4870 = vmatpush.bf16.msrb.mxu0 %v7387_v48  ;;  %v2883_v48 = vperm.slane %v9363_v30, 3 }
 0x7b2   : > { %4884 = vmatpush.bf16.msra.mxu1 %v7395_v49 }
 0x7b3   : > { %4856 = vmatpush.bf16.msrb.mxu3 %v7379_v50  ;;  %4898 = vmatpush.bf16.msra.mxu2 %v7403_v32 }
 0x7b5   : > { %4871 = vmatpush.bf16.msrb.mxu0 %v7386_v34 }
 0x7b6   : > { %4885 = vmatpush.bf16.msra.mxu1 %v7394_v52 }
 0x7b7   : > { %4857 = vmatpush.bf16.msrb.mxu3 %v7378_v54  ;;  %4899 = vmatpush.bf16.msra.mxu2 %v7402_v44  ;;  %v7455_v54 = vld [vmem:[%s8588_s23 + $0x278] sm:$0xff] }
 0x7b9   : > { %4872 = vmatpush.bf16.msrb.mxu0 %v7385_v53 }
 0x7ba   : > { %4886 = vmatpush.bf16.msra.mxu1 %v7393_v33  ;;  %v7463_v33 = vld [vmem:[%s8588_s23 + $0x2b8] sm:$0xff] }
 0x7bb   : > { %4858 = vmatpush.bf16.msrb.mxu3 %v7377_v55  ;;  %4900 = vmatpush.bf16.msra.mxu2 %v7401_v27 }
 0x7bd   : > { %4873 = vmatpush.bf16.msrb.mxu0 %v7384_v56 }
 0x7be   : > { %4887 = vmatpush.bf16.msra.mxu1 %v7392_v57 }
 0x7bf   : > { %4859 = vmatpush.bf16.msrb.mxu3 %v7376_v62  ;;  %4901 = vmatpush.bf16.msra.mxu2 %v7400_v5  ;;  %v7454_v5 = vld [vmem:[%s8588_s23 + $0x270] sm:$0xff] }
 0x7c1   : > { %4922 = vmatpush.bf16.msra.mxu0 %v7423_v59 }
 0x7c2   : > { %4936 = vmatpush.bf16.msrb.mxu1 %v7431_v61 }
 0x7c3   : > { %4908 = vmatpush.bf16.msra.mxu3 %v7415_v1  ;;  %4950 = vmatpush.bf16.msrb.mxu2 %v7439_v2 }
 0x7c5   : > { %4923 = vmatpush.bf16.msra.mxu0 %v7422_v7 }
 0x7c6   : > { %4937 = vmatpush.bf16.msrb.mxu1 %v7430_v17  ;;  %v7462_v17 = vld [vmem:[%s8588_s23 + $0x2b0] sm:$0xff] }
 0x7c7   : > { %4909 = vmatpush.bf16.msra.mxu3 %v7414_v51  ;;  %4951 = vmatpush.bf16.msrb.mxu2 %v7438_v58 }
 0x7c9   : > { %4924 = vmatpush.bf16.msra.mxu0 %v7421_v4  ;;  %v7447_v4 = vld [vmem:[%s8588_s23 + $0x238] sm:$0xff] }
 0x7ca   : > { %4938 = vmatpush.bf16.msrb.mxu1 %v7429_v63 }
 0x7cb   : > { %4910 = vmatpush.bf16.msra.mxu3 %v7413_v31  ;;  %4952 = vmatpush.bf16.msrb.mxu2 %v7437_v6  ;;  %v2885_v31 = vperm.slane %v9363_v30, 5  ;;  %v7471_v6 = vld [vmem:[%s8588_s23 + $0x2f8] sm:$0xff] }
 0x7cd   : > { %4925 = vmatpush.bf16.msra.mxu0 %v7420_v8 }
 0x7ce   : > { %4939 = vmatpush.bf16.msrb.mxu1 %v7428_v9  ;;  %v2886_v9 = vperm.slane %v9363_v30, 6 }
 0x7cf   : > { %4911 = vmatpush.bf16.msra.mxu3 %v7412_v10  ;;  %4953 = vmatpush.bf16.msrb.mxu2 %v7436_v13  ;;  %v7453_v10 = vld [vmem:[%s8588_s23 + $0x268] sm:$0xff] }
 0x7d0   : > { %v7461_v13 = vld [vmem:[%s8588_s23 + $0x2a8] sm:$0xff] }
 0x7d1   : > { %4926 = vmatpush.bf16.msra.mxu0 %v7419_v14 }
 0x7d2   : > { %4940 = vmatpush.bf16.msrb.mxu1 %v7427_v12  ;;  %v7446_v12 = vld [vmem:[%s8588_s23 + $0x230] sm:$0xff] }
 0x7d3   : > { %4912 = vmatpush.bf16.msra.mxu3 %v7411_v39  ;;  %4954 = vmatpush.bf16.msrb.mxu2 %v7435_v15 }
 0x7d5   : > { %4927 = vmatpush.bf16.msra.mxu0 %v7418_v37  ;;  %v7470_v37 = vld [vmem:[%s8588_s23 + $0x2f0] sm:$0xff] }
 0x7d6   : > { %4941 = vmatpush.bf16.msrb.mxu1 %v7426_v16 }
 0x7d7   : > { %4913 = vmatpush.bf16.msra.mxu3 %v7410_v20  ;;  %4955 = vmatpush.bf16.msrb.mxu2 %v7434_v11  ;;  %v7452_v11 = vld [vmem:[%s8588_s23 + $0x260] sm:$0xff] }
 0x7d9   : > { %4928 = vmatpush.bf16.msra.mxu0 %v7417_v42  ;;  %v2884_v42 = vperm.slane %v9363_v30, 4 }
 0x7da   : > { %4942 = vmatpush.bf16.msrb.mxu1 %v7425_v22 }
 0x7db   : > { %4914 = vmatpush.bf16.msra.mxu3 %v7409_v23  ;;  %4956 = vmatpush.bf16.msrb.mxu2 %v7433_v60  ;;  %v7460_v60 = vld [vmem:[%s8588_s23 + $0x2a0] sm:$0xff] }
 0x7dc   : > { %v3575_v0 = vpop.f32.mrf.mxu0 }
 0x7dd   : > { %4929 = vmatpush.bf16.msra.mxu0 %v7416_v25  ;;  %v3589_v35 = vpop.f32.mrf.mxu1  ;;  %v3576_v41 = vadd.f32 %v3575_v0, %v2881_v36  ;;  %v2887_v25 = vperm.slane %v9363_v30, 7 }
 0x7de   : > { %4943 = vmatpush.bf16.msrb.mxu1 %v7424_v26  ;;  %v3590_v43 = vadd.f32 %v3589_v35, %v2882_v38  ;;  %v7469_v35 = vld [vmem:[%s8588_s23 + $0x2e8] sm:$0xff] }
 0x7df   : > { %4915 = vmatpush.bf16.msra.mxu3 %v7408_v28  ;;  %4957 = vmatpush.bf16.msrb.mxu2 %v7432_v29  ;;  %v3777_v50 = vmax.f32 %v3576_v41, 0.0  ;;  %v7445_v28 = vld [vmem:[%s8588_s23 + $0x228] sm:$0xff] }
 0x7e0   : > { %v3778_v34 = vmax.f32 %v3590_v43, 0.0  ;;  %v7459_v43 = vld [vmem:[%s8588_s23 + $0x298] sm:$0xff] }
 0x7e2   : > { %v3561_v40 = vpop.f32.mrf.mxu3 }
 0x7e3   : > { %v3603_v24 = vpop.f32.mrf.mxu2  ;;  %v3562_v44 = vadd.f32 %v3561_v40, %v2880_v45  ;;  %v7451_v40 = vld [vmem:[%s8588_s23 + $0x258] sm:$0xff] }
 0x7e4   : > { %v3577_v21 = vpop.f32.mrf.mxu0  ;;  %v3604_v55 = vadd.f32 %v3603_v24, %v2883_v48 }
 0x7e5   : > { %v3578_v46 = vadd.f32 %v3577_v21, %v2881_v36  ;;  %v3591_v47 = vpop.f32.mrf.mxu1  ;;  %v3776_v1 = vmax.f32 %v3562_v44, 0.0 }
 0x7e6   : > { %v3592_v49 = vadd.f32 %v3591_v47, %v2882_v38  ;;  %v3779_v51 = vmax.f32 %v3604_v55, 0.0 }
 0x7e7   : > { %v3793_v32 = vmax.f32 %v3578_v46, 0.0  ;;  %v7444_v46 = vld [vmem:[%s8588_s23 + $0x220] sm:$0xff] }
 0x7e8   : > { %v3794_v52 = vmax.f32 %v3592_v49, 0.0  ;;  %v7468_v49 = vld [vmem:[%s8588_s23 + $0x2e0] sm:$0xff] }
 0x7e9   : > { %v3809_v53 = vpack.c.bf16 %v3793_v32, %v3777_v50  ;;  %v7450_v32 = vld [vmem:[%s8588_s23 + $0x250] sm:$0xff] }
 0x7ea   : > { %v3810_v27 = vpack.c.bf16 %v3794_v52, %v3778_v34  ;;  %v3563_v56 = vpop.f32.mrf.mxu3 }
 0x7eb   : > { %v3564_v57 = vadd.f32 %v3563_v56, %v2880_v45  ;;  %v3605_v59 = vpop.f32.mrf.mxu2  ;;  %4874 = vmatmul.bf16.vlgmr.msrb.gmra.mxu0 %v3809_v53 }
 0x7ec   : > { %v3606_v61 = vadd.f32 %v3605_v59, %v2883_v48  ;;  %4888 = vmatmul.bf16.vlgmr.msra.gmra.mxu1 %v3810_v27  ;;  %4978 = vmatpush.bf16.msrb.mxu0 %v7455_v54  ;;  %v3631_v62 = vpop.f32.mrf.mxu0  ;;  %v7458_v54 = vld [vmem:[%s8588_s23 + $0x290] sm:$0xff]  ;;  %v7443_v27 = vld [vmem:[%s8588_s23 + $0x218] sm:$0xff] }
 0x7ed   : > { %v3792_v2 = vmax.f32 %v3564_v57, 0.0  ;;  %4992 = vmatpush.bf16.msra.mxu1 %v7463_v33  ;;  %v3645_v7 = vpop.f32.mrf.mxu1  ;;  %v3632_v39 = vadd.f32 %v3631_v62, %v2885_v31  ;;  %v9394_v33 = vld [vmem:[%s8616_s0 + $0x8] sm:$0xff]  ;;  %v7467_v59 = vld [vmem:[%s8588_s23 + $0x2d8] sm:$0xff] }
 0x7ee   : > { %v3795_v58 = vmax.f32 %v3606_v61, 0.0  ;;  %v3646_v16 = vadd.f32 %v3645_v7, %v2886_v9  ;;  %v7449_v62 = vld [vmem:[%s8588_s23 + $0x248] sm:$0xff]  ;;  %v7442_v7 = vld [vmem:[%s8588_s23 + $0x210] sm:$0xff] }
 0x7ef   : > { %v3808_v63 = vpack.c.bf16 %v3792_v2, %v3776_v1  ;;  %v3781_v29 = vmax.f32 %v3632_v39, 0.0  ;;  %v7457_v1 = vld [vmem:[%s8588_s23 + $0x288] sm:$0xff]  ;;  %v2890_v2 = vperm.slane %v9394_v33, 2 }
 0x7f0   : > { %v3811_v8 = vpack.c.bf16 %v3795_v58, %v3779_v51  ;;  %4979 = vmatpush.bf16.msrb.mxu0 %v7454_v5  ;;  %v3782_v36 = vmax.f32 %v3646_v16, 0.0  ;;  %v2889_v5 = vperm.slane %v9394_v33, 1  ;;  %v7448_v58 = vld [vmem:[%s8588_s23 + $0x240] sm:$0xff] }
 0x7f1   : > { %4993 = vmatpush.bf16.msra.mxu1 %v7462_v17  ;;  %4860 = vmatmul.bf16.vlgmr.msrb.gmra.mxu3 %v3808_v63  ;;  %v7466_v17 = vld [vmem:[%s8588_s23 + $0x2d0] sm:$0xff] }
 0x7f2   : > { %4902 = vmatmul.bf16.vlgmr.msra.gmra.mxu2 %v3811_v8  ;;  %4964 = vmatpush.bf16.msrb.mxu3 %v7447_v4  ;;  %v3617_v14 = vpop.f32.mrf.mxu3 }
 0x7f3   : > { %5006 = vmatpush.bf16.msra.mxu2 %v7471_v6  ;;  %v3659_v15 = vpop.f32.mrf.mxu2  ;;  %v3618_v41 = vadd.f32 %v3617_v14, %v2884_v42  ;;  %v7487_v6 = vld [vmem:[%s8588_s23 + $0x378] sm:$0xff]  ;;  %v2888_v14 = vperm.slane %v9394_v33, 0 }
 0x7f4   : > { %4980 = vmatpush.bf16.msrb.mxu0 %v7453_v10  ;;  %v3633_v20 = vpop.f32.mrf.mxu0  ;;  %v3660_v21 = vadd.f32 %v3659_v15, %v2887_v25  ;;  %v7495_v10 = vld [vmem:[%s8588_s23 + $0x3b8] sm:$0xff]  ;;  %v7465_v15 = vld [vmem:[%s8588_s23 + $0x2c8] sm:$0xff] }
 0x7f5   : > { %4994 = vmatpush.bf16.msra.mxu1 %v7461_v13  ;;  %v3634_v22 = vadd.f32 %v3633_v20, %v2885_v31  ;;  %v3647_v23 = vpop.f32.mrf.mxu1  ;;  %v3780_v34 = vmax.f32 %v3618_v41, 0.0  ;;  %v7456_v31 = vld [vmem:[%s8588_s23 + $0x280] sm:$0xff]  ;;  %v7441_v13 = vld [vmem:[%s8588_s23 + $0x208] sm:$0xff] }
 0x7f6   : > { %v3648_v26 = vadd.f32 %v3647_v23, %v2886_v9  ;;  %4965 = vmatpush.bf16.msrb.mxu3 %v7446_v12  ;;  %v3783_v44 = vmax.f32 %v3660_v21, 0.0  ;;  %v7486_v23 = vld [vmem:[%s8588_s23 + $0x370] sm:$0xff]  ;;  %v7485_v21 = vld [vmem:[%s8588_s23 + $0x368] sm:$0xff] }
 0x7f7   : > { %v3797_v0 = vmax.f32 %v3634_v22, 0.0  ;;  %5007 = vmatpush.bf16.msra.mxu2 %v7470_v37  ;;  %v2891_v37 = vperm.slane %v9394_v33, 3 }
 0x7f8   : > { %v3798_v38 = vmax.f32 %v3648_v26, 0.0  ;;  %4981 = vmatpush.bf16.msrb.mxu0 %v7452_v11  ;;  %v7494_v26 = vld [vmem:[%s8588_s23 + $0x3b0] sm:$0xff] }
 0x7f9   : > { %v3813_v24 = vpack.c.bf16 %v3797_v0, %v3781_v29  ;;  %4995 = vmatpush.bf16.msra.mxu1 %v7460_v60 }
 0x7fa   : > { %v3814_v30 = vpack.c.bf16 %v3798_v38, %v3782_v36  ;;  %4966 = vmatpush.bf16.msrb.mxu3 %v7445_v28  ;;  %v3619_v45 = vpop.f32.mrf.mxu3  ;;  %v7440_v28 = vld [vmem:[%s8588_s23 + $0x200] sm:$0xff]  ;;  %v7479_v38 = vld [vmem:[%s8588_s23 + $0x338] sm:$0xff] }
 0x7fb   : > { %5008 = vmatpush.bf16.msra.mxu2 %v7469_v35  ;;  %v3620_v47 = vadd.f32 %v3619_v45, %v2884_v42  ;;  %v3661_v48 = vpop.f32.mrf.mxu2  ;;  %4930 = vmatmul.bf16.vlgmr.msra.gmra.mxu0 %v3813_v24  ;;  %v7464_v36 = vld [vmem:[%s8588_s23 + $0x2c0] sm:$0xff]  ;;  %v7503_v24 = vld [vmem:[%s8588_s23 + $0x3f8] sm:$0xff] }
 0x7fc   : > { %v3662_v50 = vadd.f32 %v3661_v48, %v2887_v25  ;;  %4944 = vmatmul.bf16.vlgmr.msrb.gmra.mxu1 %v3814_v30  ;;  %4982 = vmatpush.bf16.msrb.mxu0 %v7451_v40 }
 0x7fd   : > { %v3796_v52 = vmax.f32 %v3620_v47, 0.0  ;;  %4996 = vmatpush.bf16.msra.mxu1 %v7459_v43  ;;  %v3687_v55 = vpop.f32.mrf.mxu0 }
 0x7fe   : > { %v3799_v53 = vmax.f32 %v3662_v50, 0.0  ;;  %4967 = vmatpush.bf16.msrb.mxu3 %v7444_v46  ;;  %v3688_v4 = vadd.f32 %v3687_v55, %v2889_v5  ;;  %v7493_v46 = vld [vmem:[%s8588_s23 + $0x3a8] sm:$0xff]  ;;  %v7483_v55 = vld [vmem:[%s8588_s23 + $0x358] sm:$0xff] }
 0x7ff   : > { %v3812_v56 = vpack.c.bf16 %v3796_v52, %v3780_v34  ;;  %5009 = vmatpush.bf16.msra.mxu2 %v7468_v49  ;;  %v7478_v49 = vld [vmem:[%s8588_s23 + $0x330] sm:$0xff]  ;;  %v7484_v52 = vld [vmem:[%s8588_s23 + $0x360] sm:$0xff] }
 0x800   : > { %v3701_v57 = vpop.f32.mrf.mxu1  ;;  %v3815_v61 = vpack.c.bf16 %v3799_v53, %v3783_v44  ;;  %4983 = vmatpush.bf16.msrb.mxu0 %v7450_v32  ;;  %v3785_v20 = vmax.f32 %v3688_v4, 0.0  ;;  %v7502_v32 = vld [vmem:[%s8588_s23 + $0x3f0] sm:$0xff]  ;;  %v7477_v44 = vld [vmem:[%s8588_s23 + $0x328] sm:$0xff] }
 0x801   : > { %4997 = vmatpush.bf16.msra.mxu1 %v7458_v54  ;;  %4916 = vmatmul.bf16.vlgmr.msra.gmra.mxu3 %v3812_v56  ;;  %v3702_v8 = vadd.f32 %v3701_v57, %v2890_v2  ;;  %v7492_v54 = vld [vmem:[%s8588_s23 + $0x3a0] sm:$0xff]  ;;  %v7501_v53 = vld [vmem:[%s8588_s23 + $0x3e8] sm:$0xff]  ;;  %v7474_v4 = vld [vmem:[%s8588_s23 + $0x310] sm:$0xff] }
 0x802   : > { %4958 = vmatmul.bf16.vlgmr.msrb.gmra.mxu2 %v3815_v61  ;;  %4968 = vmatpush.bf16.msrb.mxu3 %v7443_v27  ;;  %v7491_v27 = vld [vmem:[%s8588_s23 + $0x398] sm:$0xff]  ;;  %v7476_v56 = vld [vmem:[%s8588_s23 + $0x320] sm:$0xff] }
 0x803   : > { %5010 = vmatpush.bf16.msra.mxu2 %v7467_v59  ;;  %v3673_v51 = vpop.f32.mrf.mxu3  ;;  %v3786_v42 = vmax.f32 %v3702_v8, 0.0  ;;  %v7500_v57 = vld [vmem:[%s8588_s23 + $0x3e0] sm:$0xff]  ;;  %v7482_v59 = vld [vmem:[%s8588_s23 + $0x350] sm:$0xff] }
 0x804   : > { %4984 = vmatpush.bf16.msrb.mxu0 %v7449_v62  ;;  %v3674_v60 = vadd.f32 %v3673_v51, %v2888_v14  ;;  %v7490_v62 = vld [vmem:[%s8588_s23 + $0x390] sm:$0xff]  ;;  %v2894_v51 = vperm.slane %v9394_v33, 6 }
 0x805   : > { %4998 = vmatpush.bf16.msra.mxu1 %v7457_v1  ;;  %v3689_v9 = vpop.f32.mrf.mxu0  ;;  %v7475_v1 = vld [vmem:[%s8588_s23 + $0x318] sm:$0xff] }
 0x806   : > { %v3715_v63 = vpop.f32.mrf.mxu2  ;;  %4969 = vmatpush.bf16.msrb.mxu3 %v7442_v7  ;;  %v3690_v12 = vadd.f32 %v3689_v9, %v2889_v5  ;;  %v3784_v30 = vmax.f32 %v3674_v60, 0.0  ;;  %v2893_v7 = vperm.slane %v9394_v33, 5  ;;  %v7480_v9 = vld [vmem:[%s8588_s23 + $0x340] sm:$0xff] }
 0x807   : > { %5011 = vmatpush.bf16.msra.mxu2 %v7466_v17  ;;  %v3716_v29 = vadd.f32 %v3715_v63, %v2891_v37  ;;  %v7481_v17 = vld [vmem:[%s8588_s23 + $0x348] sm:$0xff] }
 0x808   : > { %v3703_v39 = vpop.f32.mrf.mxu1  ;;  %4985 = vmatpush.bf16.msrb.mxu0 %v7448_v58  ;;  %v3801_v11 = vmax.f32 %v3690_v12, 0.0  ;;  %v7489_v58 = vld [vmem:[%s8588_s23 + $0x388] sm:$0xff]  ;;  %v2892_v12 = vperm.slane %v9394_v33, 4 }
 0x809   : > { %v3704_v16 = vadd.f32 %v3703_v39, %v2890_v2  ;;  %4999 = vmatpush.bf16.msra.mxu1 %v7456_v31  ;;  %v3787_v47 = vmax.f32 %v3716_v29, 0.0  ;;  %v7499_v2 = vld [vmem:[%s8588_s23 + $0x3d8] sm:$0xff]  ;;  %v7498_v31 = vld [vmem:[%s8588_s23 + $0x3d0] sm:$0xff] }
 0x80a   : > { %4970 = vmatpush.bf16.msrb.mxu3 %v7441_v13  ;;  %v3817_v25 = vpack.c.bf16 %v3801_v11, %v3785_v20  ;;  %v7497_v11 = vld [vmem:[%s8588_s23 + $0x3c8] sm:$0xff] }
 0x80b   : > { %v3802_v22 = vmax.f32 %v3704_v16, 0.0  ;;  %5012 = vmatpush.bf16.msra.mxu2 %v7465_v15  ;;  %v3675_v35 = vpop.f32.mrf.mxu3  ;;  %v2895_v16 = vperm.slane %v9394_v33, 7 }
 0x80c   : > { %5034 = vmatpush.bf16.msra.mxu0 %v7487_v6  ;;  %v3676_v40 = vadd.f32 %v3675_v35, %v2888_v14  ;;  %v7488_v14 = vld [vmem:[%s8588_s23 + $0x380] sm:$0xff] }
 0x80d   : > { %5048 = vmatpush.bf16.msrb.mxu1 %v7495_v10  ;;  %v3818_v0 = vpack.c.bf16 %v3802_v22, %v3786_v42  ;;  %4986 = vmatmul.bf16.vlgmr.msrb.gmra.mxu0 %v3817_v25 }
 0x80e   : > { %v3717_v41 = vpop.f32.mrf.mxu2  ;;  %v3800_v45 = vmax.f32 %v3676_v40, 0.0  ;;  %4971 = vmatpush.bf16.msrb.mxu3 %v7440_v28  ;;  %v7472_v28 = vld [vmem:[%s8588_s23 + $0x300] sm:$0xff] }
 0x80f   : > { %v3718_v43 = vadd.f32 %v3717_v41, %v2891_v37  ;;  %5000 = vmatmul.bf16.vlgmr.msra.gmra.mxu1 %v3818_v0  ;;  %5013 = vmatpush.bf16.msra.mxu2 %v7464_v36  ;;  %v7473_v37 = vld [vmem:[%s8588_s23 + $0x308] sm:$0xff]  ;;  %v7496_v36 = vld [vmem:[%s8588_s23 + $0x3c0] sm:$0xff]  ;;  %s9605_s23 = scalar_lea.vmem [#allocation20], %s8547_s27 }
 0x810   : > { %5035 = vmatpush.bf16.msra.mxu0 %v7486_v23  ;;  %v3816_v50 = vpack.c.bf16 %v3800_v45, %v3784_v30 }
 0x811   : > { %5049 = vmatpush.bf16.msrb.mxu1 %v7494_v26  ;;  %v3803_v48 = vmax.f32 %v3718_v43, 0.0 }
 0x812   : > { %5020 = vmatpush.bf16.msra.mxu3 %v7479_v38 }
 0x813   : > { %5062 = vmatpush.bf16.msrb.mxu2 %v7503_v24  ;;  %v3819_v34 = vpack.c.bf16 %v3803_v48, %v3787_v47  ;;  %4972 = vmatmul.bf16.vlgmr.msrb.gmra.mxu3 %v3816_v50 }
 0x814   : > { %5036 = vmatpush.bf16.msra.mxu0 %v7485_v21 }
 0x815   : > { %5050 = vmatpush.bf16.msrb.mxu1 %v7493_v46  ;;  %5014 = vmatmul.bf16.vlgmr.msra.gmra.mxu2 %v3819_v34 }
 0x816   : > { %5021 = vmatpush.bf16.msra.mxu3 %v7478_v49 }
 0x817   : > { %5063 = vmatpush.bf16.msrb.mxu2 %v7502_v32 }
 0x818   : > { %5037 = vmatpush.bf16.msra.mxu0 %v7484_v52  ;;  %v7624_v52 = vld [vmem:[%s1078_s28] ss:$0 sm:$0xff] }
 0x819   : > { %5051 = vmatpush.bf16.msrb.mxu1 %v7492_v54 }
 0x81a   : > { %5022 = vmatpush.bf16.msra.mxu3 %v7477_v44 }
 0x81b   : > { %5064 = vmatpush.bf16.msrb.mxu2 %v7501_v53 }
 0x81c   : > { %5038 = vmatpush.bf16.msra.mxu0 %v7483_v55 }
 0x81d   : > { %v3743_v61 = vpop.f32.mrf.mxu0  ;;  %5052 = vmatpush.bf16.msrb.mxu1 %v7491_v27 }
 0x81e   : > { %v3757_v5 = vpop.f32.mrf.mxu1  ;;  %5023 = vmatpush.bf16.msra.mxu3 %v7476_v56  ;;  %v3744_v6 = vadd.f32 %v3743_v61, %v2893_v7 }
 0x81f   : > { %5065 = vmatpush.bf16.msrb.mxu2 %v7500_v57  ;;  %v3758_v10 = vadd.f32 %v3757_v5, %v2894_v51 }
 0x820   : > { %5039 = vmatpush.bf16.msra.mxu0 %v7482_v59  ;;  %v3789_v42 = vmax.f32 %v3744_v6, 0.0 }
 0x821   : > { %5053 = vmatpush.bf16.msrb.mxu1 %v7490_v62  ;;  %v3790_v23 = vmax.f32 %v3758_v10, 0.0 }
 0x822   : > { %5024 = vmatpush.bf16.msra.mxu3 %v7475_v1 }
 0x823   : > { %v3729_v63 = vpop.f32.mrf.mxu3  ;;  %5066 = vmatpush.bf16.msrb.mxu2 %v7499_v2 }
 0x824   : > { %5040 = vmatpush.bf16.msra.mxu0 %v7481_v17  ;;  %v3730_v25 = vadd.f32 %v3729_v63, %v2892_v12 }
 0x825   : > { %v3771_v8 = vpop.f32.mrf.mxu2  ;;  %v3745_v13 = vpop.f32.mrf.mxu0  ;;  %5054 = vmatpush.bf16.msrb.mxu1 %v7489_v58 }
 0x826   : > { %v3746_v39 = vadd.f32 %v3745_v13, %v2893_v7  ;;  %v3759_v15 = vpop.f32.mrf.mxu1  ;;  %5025 = vmatpush.bf16.msra.mxu3 %v7474_v4  ;;  %v3772_v29 = vadd.f32 %v3771_v8, %v2895_v16  ;;  %v3788_v41 = vmax.f32 %v3730_v25, 0.0 }
 0x827   : > { %v3760_v20 = vadd.f32 %v3759_v15, %v2894_v51  ;;  %5067 = vmatpush.bf16.msrb.mxu2 %v7498_v31 }
 0x828   : > { %v3805_v22 = vmax.f32 %v3746_v39, 0.0  ;;  %5041 = vmatpush.bf16.msra.mxu0 %v7480_v9  ;;  %v3791_v43 = vmax.f32 %v3772_v29, 0.0 }
 0x829   : > { %v3806_v60 = vmax.f32 %v3760_v20, 0.0  ;;  %5055 = vmatpush.bf16.msrb.mxu1 %v7488_v14 }
 0x82a   : > { %v3821_v26 = vpack.c.bf16 %v3805_v22, %v3789_v42  ;;  %5026 = vmatpush.bf16.msra.mxu3 %v7473_v37 }
 0x82b   : > { %v3822_v0 = vpack.c.bf16 %v3806_v60, %v3790_v23  ;;  %v3731_v35 = vpop.f32.mrf.mxu3  ;;  %5068 = vmatpush.bf16.msrb.mxu2 %v7497_v11 }
 0x82c   : > { %v3732_v33 = vadd.f32 %v3731_v35, %v2892_v12  ;;  %5042 = vmatmul.bf16.vlgmr.msra.gmra.mxu0 %v3821_v26 }
 0x82d   : > { %v3773_v38 = vpop.f32.mrf.mxu2  ;;  %5056 = vmatmul.bf16.vlgmr.msrb.gmra.mxu1 %v3822_v0 }
 0x82e   : > { %v3774_v40 = vadd.f32 %v3773_v38, %v2895_v16  ;;  %v3804_v24 = vmax.f32 %v3732_v33, 0.0  ;;  %5027 = vmatpush.bf16.msra.mxu3 %v7472_v28 }
 0x82f   : > { %5069 = vmatpush.bf16.msrb.mxu2 %v7496_v36 }
 0x830   : > { %v3807_v21 = vmax.f32 %v3774_v40, 0.0  ;;  %v3820_v30 = vpack.c.bf16 %v3804_v24, %v3788_v41 }
 0x832   : > { %v3823_v45 = vpack.c.bf16 %v3807_v21, %v3791_v43  ;;  %5028 = vmatmul.bf16.vlgmr.msra.gmra.mxu3 %v3820_v30 }
 0x834   : > { %5070 = vmatmul.bf16.vlgmr.msrb.gmra.mxu2 %v3823_v45 }
 0x868   : > { %v4875_v46 = vpop.f32.mrf.mxu0 }
 0x869   : > { %v4889_v48 = vpop.f32.mrf.mxu1 }
 0x870   : > { %v4877_v50 = vpop.f32.mrf.mxu0 }
 0x871   : > { %v4891_v34 = vpop.f32.mrf.mxu1 }
 0x874   : > { %v4861_v47 = vpop.f32.mrf.mxu3 }
 0x875   : > { %v4903_v49 = vpop.f32.mrf.mxu2  ;;  %v4862_v44 = vadd.f32 %v7624_v52, %v4861_v47 }
 0x877   : > { %v4876_v27 = vadd.f32 %v4875_v46, %v4862_v44 }
 0x878   : > { %v4931_v53 = vpop.f32.mrf.mxu0 }
 0x879   : > { %v4945_v56 = vpop.f32.mrf.mxu1  ;;  %v4890_v59 = vadd.f32 %v4889_v48, %v4876_v27 }
 0x87b   : > { %v4904_v62 = vadd.f32 %v4903_v49, %v4890_v59 }
 0x87c   : > { %v4863_v32 = vpop.f32.mrf.mxu3 }
 0x87d   : > { %v4905_v54 = vpop.f32.mrf.mxu2  ;;  %v4864_v61 = vadd.f32 %v7624_v52, %v4863_v32 }
 0x87f   : > { %v4878_v5 = vadd.f32 %v4877_v50, %v4864_v61 }
 0x880   : > { %v4933_v1 = vpop.f32.mrf.mxu0 }
 0x881   : > { %v4947_v17 = vpop.f32.mrf.mxu1  ;;  %v4892_v51 = vadd.f32 %v4891_v34, %v4878_v5 }
 0x883   : > { %v4906_v63 = vadd.f32 %v4905_v54, %v4892_v51 }
 0x884   : > { %v4917_v55 = vpop.f32.mrf.mxu3 }
 0x885   : > { %v4959_v57 = vpop.f32.mrf.mxu2  ;;  %v4918_v7 = vadd.f32 %v4917_v55, %v4904_v62 }
 0x887   : > { %v4932_v4 = vadd.f32 %v4931_v53, %v4918_v7 }
 0x889   : > { %v4946_v31 = vadd.f32 %v4945_v56, %v4932_v4 }
 0x88a   : > { %v4987_v8 = vpop.f32.mrf.mxu0 }
 0x88b   : > { %v4960_v13 = vadd.f32 %v4959_v57, %v4946_v31 }
 0x88c   : > { %v4919_v2 = vpop.f32.mrf.mxu3  ;;  %v5001_v10 = vpop.f32.mrf.mxu1 }
 0x88d   : > { %v4961_v58 = vpop.f32.mrf.mxu2  ;;  %v4920_v6 = vadd.f32 %v4919_v2, %v4906_v63 }
 0x88f   : > { %v4934_v14 = vadd.f32 %v4933_v1, %v4920_v6 }
 0x891   : > { %v4948_v15 = vadd.f32 %v4947_v17, %v4934_v14  ;;  %v7626_v14 = vld [vmem:[%s9605_s23] ss:$0 sm:$0xff] }
 0x892   : > { %v4989_v16 = vpop.f32.mrf.mxu0 }
 0x893   : > { %v4962_v11 = vadd.f32 %v4961_v58, %v4948_v15 }
 0x894   : > { %v5003_v42 = vpop.f32.mrf.mxu1 }
 0x896   : > { %v4973_v9 = vpop.f32.mrf.mxu3 }
 0x897   : > { %v4974_v39 = vadd.f32 %v4973_v9, %v4960_v13  ;;  %v7625_v9 = vld [vmem:[%s1081_s13] ss:$0 sm:$0xff] }
 0x898   : > { %v5015_v12 = vpop.f32.mrf.mxu2 }
 0x899   : > { %v4988_v37 = vadd.f32 %v4987_v8, %v4974_v39 }
 0x89b   : > { %v5002_v22 = vadd.f32 %v5001_v10, %v4988_v37 }
 0x89d   : > { %v5016_v25 = vadd.f32 %v5015_v12, %v5002_v22 }
 0x89e   : > { %v4975_v20 = vpop.f32.mrf.mxu3 }
 0x89f   : > { %v4976_v23 = vadd.f32 %v4975_v20, %v4962_v11 }
 0x8a0   : > { %v5017_v60 = vpop.f32.mrf.mxu2 }
 0x8a1   : > { %v4990_v26 = vadd.f32 %v4989_v16, %v4976_v23 }
 0x8a3   : > { %v5004_v36 = vadd.f32 %v5003_v42, %v4990_v26 }
 0x8a5   : > { %v5018_v41 = vadd.f32 %v5017_v60, %v5004_v36 }
 0x8a9   : > { %v5043_v28 = vpop.f32.mrf.mxu0 }
 0x8aa   : > { %v5057_v35 = vpop.f32.mrf.mxu1 }
 0x8b1   : > { %v5045_v45 = vpop.f32.mrf.mxu0 }
 0x8b2   : > { %v5059_v48 = vpop.f32.mrf.mxu1 }
 0x8b5   : > { %v5029_v29 = vpop.f32.mrf.mxu3 }
 0x8b6   : > { %v5030_v0 = vadd.f32 %v5029_v29, %v5016_v25 }
 0x8b7   : > { %v5071_v38 = vpop.f32.mrf.mxu2 }
 0x8b8   : > { %v5044_v33 = vadd.f32 %v5043_v28, %v5030_v0 }
 0x8ba   : > { %v5058_v40 = vadd.f32 %v5057_v35, %v5044_v33 }
 0x8bc   : > { %v5072_v24 = vadd.f32 %v5071_v38, %v5058_v40 }
 0x8bd   : > { %v5031_v43 = vpop.f32.mrf.mxu3 }
 0x8be   : > { %v5076_v21 = vadd.f32 %v5072_v24, %v9151_v18  ;;  %v5032_v30 = vadd.f32 %v5031_v43, %v5018_v41 }
 0x8bf   : > { %v5073_v50 = vpop.f32.mrf.mxu2 }
 0x8c0   : > { %v5046_v46 = vadd.f32 %v5045_v45, %v5032_v30  ;;  %v5080_v47 = vmul.f32 %v8611_v3, %v5076_v21 }
 0x8c2   : > { %v5060_v49 = vadd.f32 %v5059_v48, %v5046_v46  ;;  %5082 = vadd.xlane.f32.xlu2 %v5080_v47 }
 0x8c4   : > { %v5074_v32 = vadd.f32 %v5073_v50, %v5060_v49 }
 0x8c6   : > { %v5077_v34 = vadd.f32 %v5074_v32, %v9153_v19 }
 0x8c8   : > { %v5081_v52 = vmul.f32 %v8611_v3, %v5077_v34 }
 0x8ca   : > { %5084 = vadd.xlane.f32.xlu0 %v5081_v52 }
 0x935   : > { %v5083_v54 = vpop.xlane.xlu2 %5082 }
 0x936   : > { %v5086_v44 = vmul.f32 0.03125, %v5083_v54 }
 0x938   : > { %v5088_v53 = vsub.f32 %v5076_v21, %v5086_v44 }
 0x93a   : > { %v5090_v18 = vmul.f32 %v8611_v3, %v5088_v53 }
 0x93c   : > { %v5092_v55 = vmul.f32 %v5090_v18, %v5090_v18 }
 0x93d   : > { %v5085_v27 = vpop.xlane.xlu0 %5084 }
 0x93e   : > { %v5087_v56 = vmul.f32 0.03125, %v5085_v27  ;;  %5094 = vadd.xlane.f32.xlu1 %v5092_v55 }
 0x940   : > { %v5089_v57 = vsub.f32 %v5077_v34, %v5087_v56 }
 0x942   : > { %v5091_v59 = vmul.f32 %v8611_v3, %v5089_v57 }
 0x944   : > { %v5093_v61 = vmul.f32 %v5091_v59, %v5091_v59 }
 0x946   : > { %5096 = vadd.xlane.f32.xlu2 %v5093_v61 }
 0x9b1   : > { %v5095_v62 = vpop.xlane.xlu1 %5094 }
 0x9b2   : > { %v5098_v5 = vmul.f32 0.03125, %v5095_v62 }
 0x9b4   : > { %v5100_v19 = vadd.f32 1e-05, %v5098_v5 }
 0x9b6   : > { %7663 = vrsqrt.f32 %v5100_v19  ;;  %vm5108_vm10 = vweird.f32 %v5100_v19 }
 0x9b9   : > { %v5097_v1 = vpop.xlane.xlu2 %5096 }
 0x9ba   : > { %v5099_v2 = vmul.f32 0.03125, %v5097_v1 }
 0x9bc   : > { %v7664_v7 = vpop.eup %7663  ;;  %v5101_v17 = vadd.f32 1e-05, %v5099_v2 }
 0x9bd   : > { %v5103_v51 = vmul.f32 %v7664_v7, %v5100_v19  ;;  %vm5109_vm9 = vweird.f32 %v7664_v7 }
 0x9be   : > { %7665 = vrsqrt.f32 %v5101_v17  ;;  %vm5110_vm11 = vmor %vm5108_vm10, %vm5109_vm9  ;;  %vm5118_vm13 = vweird.f32 %v5101_v17 }
 0x9bf   : > { %v5104_v58 = vmul.f32 %v7664_v7, %v5103_v51 }
 0x9c1   : > { %v5105_v4 = vmul.f32 0.5, %v5104_v58 }
 0x9c3   : > { %v5106_v63 = vsub.f32 1.5, %v5105_v4 }
 0x9c4   : > { %v7666_v31 = vpop.eup %7665 }
 0x9c5   : > { %v5107_v6 = vmul.f32 %v7664_v7, %v5106_v63  ;;  %v5113_v8 = vmul.f32 %v7666_v31, %v5101_v17  ;;  %vm5119_vm12 = vweird.f32 %v7666_v31 }
 0x9c6   : > { %vm5120_vm14 = vmor %vm5118_vm13, %vm5119_vm12 }
 0x9c7   : > { %v5111_v10 = vsel %vm5110_vm11, %v7664_v7, %v5107_v6  ;;  %v5114_v13 = vmul.f32 %v7666_v31, %v5113_v8 }
 0x9c8   : > { %v5122_v12 = vmul.f32 %v5111_v10, %v5090_v18 }
 0x9c9   : > { %v5115_v39 = vmul.f32 0.5, %v5114_v13 }
 0x9ca   : > { %v5127_v15 = vmul.f32 %v7625_v9, %v5122_v12 }
 0x9cb   : > { %v5116_v37 = vsub.f32 1.5, %v5115_v39 }
 0x9cc   : > { %v5132_v16 = vadd.f32 %v7626_v14, %v5127_v15 }
 0x9cd   : > { %v5117_v20 = vmul.f32 %v7666_v31, %v5116_v37 }
 0x9ce   : > { %5134 = vst [vmem:[#allocation22] sm:$0xff] %v5132_v16 }
 0x9cf   : > { %v5121_v11 = vsel %vm5120_vm14, %v7666_v31, %v5117_v20 }
 0x9d0   : > { %v5123_v42 = vmul.f32 %v5121_v11, %v5091_v59 }
 0x9d2   : > { %v5128_v22 = vmul.f32 %v7625_v9, %v5123_v42  ;;  %5139 = sbr.rel (%p7109_p7) target bundleno = 2798 (0xaee), region = 152 }
 0x9d4   : > { %v5133_v23 = vadd.f32 %v7626_v14, %v5128_v22 }
 0x9d6   : > { %5135 = vst [vmem:[#allocation22 + $0x8] sm:$0xff] %v5133_v23 }
 0x9d7   : > { %v5142_v60 = vmul.f32 %v8611_v3, %v5132_v16  ;;  %v5143_v25 = vmul.f32 %v8611_v3, %v5133_v23  ;;  %v7669_v54 = vld [vmem:[%s9606_s15] ss:$0 sm:$0xff] }
 0x9d8   : > { %v7670_v55 = vld [vmem:[%s9607_s22] ss:$0 sm:$0xff] }
 0x9d9   : > { %5144 = vadd.xlane.f32.xlu0 %v5142_v60 }
 0x9e1   : > { %5146 = vadd.xlane.f32.xlu0 %v5143_v25 }
 0xa4c   : > { %v5145_v26 = vpop.xlane.xlu0 %5144 }
 0xa4d   : > { %v5148_v28 = vmul.f32 0.03125, %v5145_v26 }
 0xa4f   : > { %v5150_v29 = vsub.f32 %v5132_v16, %v5148_v28 }
 0xa51   : > { %v5152_v0 = vmul.f32 %v8611_v3, %v5150_v29 }
 0xa53   : > { %v5154_v35 = vmul.f32 %v5152_v0, %v5152_v0 }
 0xa54   : > { %v5147_v36 = vpop.xlane.xlu0 %5146 }
 0xa55   : > { %v5149_v33 = vmul.f32 0.03125, %v5147_v36  ;;  %5156 = vadd.xlane.f32.xlu1 %v5154_v35 }
 0xa57   : > { %v5151_v38 = vsub.f32 %v5133_v23, %v5149_v33 }
 0xa59   : > { %v5153_v40 = vmul.f32 %v8611_v3, %v5151_v38 }
 0xa5b   : > { %v5155_v41 = vmul.f32 %v5153_v40, %v5153_v40 }
 0xa5d   : > { %5158 = vadd.xlane.f32.xlu1 %v5155_v41 }
 0xac8   : > { %v5157_v24 = vpop.xlane.xlu1 %5156 }
 0xac9   : > { %v5160_v43 = vmul.f32 0.03125, %v5157_v24 }
 0xacb   : > { %v5162_v21 = vadd.f32 1e-05, %v5160_v43 }
 0xacd   : > { %7671 = vrsqrt.f32 %v5162_v21  ;;  %vm5170_vm0 = vweird.f32 %v5162_v21 }
 0xad0   : > { %v5159_v30 = vpop.xlane.xlu1 %5158 }
 0xad1   : > { %v5161_v45 = vmul.f32 0.03125, %v5159_v30 }
 0xad3   : > { %v7672_v46 = vpop.eup %7671  ;;  %v5163_v47 = vadd.f32 1e-05, %v5161_v45 }
 0xad4   : > { %v5165_v48 = vmul.f32 %v7672_v46, %v5162_v21  ;;  %vm5171_vm15 = vweird.f32 %v7672_v46 }
 0xad5   : > { %7673 = vrsqrt.f32 %v5163_v47  ;;  %vm5172_vm1 = vmor %vm5170_vm0, %vm5171_vm15  ;;  %vm5180_vm4 = vweird.f32 %v5163_v47 }
 0xad6   : > { %v5166_v49 = vmul.f32 %v7672_v46, %v5165_v48 }
 0xad8   : > { %v5167_v50 = vmul.f32 0.5, %v5166_v49 }
 0xada   : > { %v5168_v32 = vsub.f32 1.5, %v5167_v50 }
 0xadb   : > { %v7674_v34 = vpop.eup %7673 }
 0xadc   : > { %v5169_v52 = vmul.f32 %v7672_v46, %v5168_v32  ;;  %v5175_v3 = vmul.f32 %v7674_v34, %v5163_v47  ;;  %vm5181_vm3 = vweird.f32 %v7674_v34 }
 0xadd   : > { %vm5182_vm5 = vmor %vm5180_vm4, %vm5181_vm3 }
 0xade   : > { %v5173_v44 = vsel %vm5172_vm1, %v7672_v46, %v5169_v52  ;;  %v5176_v53 = vmul.f32 %v7674_v34, %v5175_v3 }
 0xadf   : > { %v5184_v18 = vmul.f32 %v5173_v44, %v5152_v0 }
 0xae0   : > { %v5177_v27 = vmul.f32 0.5, %v5176_v53 }
 0xae1   : > { %v5189_v56 = vmul.f32 %v7669_v54, %v5184_v18 }
 0xae2   : > { %v5178_v57 = vsub.f32 1.5, %v5177_v27 }
 0xae3   : > { %v5194_v59 = vadd.f32 %v7670_v55, %v5189_v56 }
 0xae4   : > { %v5179_v61 = vmul.f32 %v7674_v34, %v5178_v57 }
 0xae5   : > { %5196 = vst [vmem:[#allocation22] sm:$0xff] %v5194_v59 }
 0xae6   : > { %v5183_v62 = vsel %vm5182_vm5, %v7674_v34, %v5179_v61 }
 0xae7   : > { %v5185_v5 = vmul.f32 %v5183_v62, %v5153_v40 }
 0xae9   : > { %v5190_v19 = vmul.f32 %v7669_v54, %v5185_v5 }
 0xaeb   : > { %v5195_v1 = vadd.f32 %v7670_v55, %v5190_v19 }
 0xaed   : > { %5197 = vst [vmem:[#allocation22 + $0x8] sm:$0xff] %v5195_v1 }
 0xaee PF: > { %p7575_p4 = scmp.eq.s32.totalorder %s8408_s3, 1  ;;  %s8136_s21 = smov [#allocation22]  }
 0xaef   : > { %s5203_s8 = sshll.u32 %s8136_s21, 4  ;;  %s9608_s24 = sld [smem:[#allocation54_spill]]  ;;  %s5204_s8 = int_to_ptr.vmem [resolvable:$true] %s5203_s8 }
 0xaf0   : > { %s8137_s28 = smov 128   ;;  %s8138_s19 = smov 8  }
 0xaf5   : > { %s5205_s29 = sshll.u32 %s9608_s24, 4  ;;  %s5206_s29 = int_to_ptr.hbm [resolvable:$true] %s5205_s29 }
 0xaf6   : > { %7531 = dma.vmem_to_hbm [thread:$0]  (%p7575_p4), %s5204_s8, 256, %s5206_s29, [#allocation4], %s8137_s28, %s8137_s28, %s8138_s19  }
 0xaf7   : > { %8108 = dma.done.wait (%p7575_p4), [#allocation4], 256  }
 0xaf8   : > { %8110 = vsyncadd (%p7575_p4), [#allocation4], 4294967040 }
 0xaf9 PF: > { %s9609_s21 = sld [smem:[#allocation32_spill]]  ;;  %s9612_s0 = smov %s8117_s30 }
 0xafa   : > { %s9610_s6 = sld [smem:[#allocation31_spill]] }
 0xafb   : > { %s9611_s20 = sld [smem:[#allocation33_spill]] }
 0xaff   : > { %p46_p10 = scmp.ge.s32.totalorder %s9609_s21, 4  }
 0xb00   : > { %s9613_s30 = smov %s9610_s6 }
 0xb01   :  { %48 = sbr.rel (!%p46_p10) target bundleno = 36 (0x24), region = 281 }
 0xb06   :  { %5222 = vsyncpa [#allocation3], 1 }
 0xb07   :  { %5224 = vsyncpa [#allocation3 + $0x1], 1 }
 0xb08   :  { %5225 = vsyncpa [#allocation6], 1 }
 0xb09   :  { %5227 = vsyncpa [#allocation6 + $0x1], 1 }
 0xb0a   :  { %5228 = vsyncpa [#allocation9], 1 }
 0xb0b   :  { %5230 = vsyncpa [#allocation9 + $0x1], 1 }
 0xb0c   :  { %5231 = vsyncpa [#allocation12], 1 }
 0xb0d   :  { %5233 = vsyncpa [#allocation12 + $0x1], 1 }
 0xb0e   :  { %5234 = vsyncpa [#allocation15], 1 }
 0xb0f   :  { %5236 = vsyncpa [#allocation15 + $0x1], 1 }
 0xb10   :  { %5237 = vsyncpa [#allocation18], 1 }
 0xb11   :  { %5239 = vsyncpa [#allocation18 + $0x1], 1 }
 0xb12   :  { %5240 = vsyncpa [#allocation21], 1 }
 0xb13   :  { %5242 = vsyncpa [#allocation21 + $0x1], 1 }
 0xb14   :  { %5243 = vsyncpa [#allocation4], 1 }
 0xb15   :  { %5245 = vsyncpa [#allocation4 + $0x1], 1 }

</bundles_post_ra>
